<compile_context>
chip_gen: v6e
topology: v6e:2x2x1
jax: 0.10.0
libtpu: 0.0.40
codegen_flags: <defaults>
</compile_context>

<pallas_src>
import functools

import jax
import jax.numpy as jnp
import numpy as np
from jax.experimental import pallas as pl
from jax.experimental.pallas import tpu as pltpu

_PAD_MODE = {'zero': 'constant', 'reflect': 'reflect', 'replicate': 'edge'}
_EPS = 1e-5


def _round_up(n, m):
    return ((n + m - 1) // m) * m


# ---------------------------------------------------------------------------
# In-kernel helpers
# ---------------------------------------------------------------------------
def _instance_norm_lanes(x, batch, hw, eps, relu):
    """InstanceNorm2d(affine=False) on a (C, batch*hw) f32 tile.

    Lanes are batch-major (lane = b*hw + y*W + x).  Stats are computed per
    (channel, batch) lane segment with masked full-width reductions, so every
    op stays lane-dense (no lane-sparse slices / reshapes).
    """
    lane = jax.lax.broadcasted_iota(jnp.int32, x.shape, 1)
    inv_hw = 1.0 / float(hw)
    mean_full = jnp.zeros_like(x)
    istd_full = jnp.zeros_like(x)
    for b in range(batch):
        m = ((lane >= b * hw) & (lane < (b + 1) * hw)).astype(x.dtype)
        xm = x * m
        s = jnp.sum(xm, axis=-1, keepdims=True)
        ss = jnp.sum(xm * xm, axis=-1, keepdims=True)
        mean = s * inv_hw
        # E[x^2] - mean^2 can go slightly negative in f32 -> clamp (review).
        var = jnp.maximum(ss * inv_hw - mean * mean, 0.0)
        mean_full = mean_full + mean * m
        istd_full = istd_full + jax.lax.rsqrt(var + eps) * m
    y = (x - mean_full) * istd_full
    if relu:
        y = jnp.maximum(y, 0.0)
    return y


# ---------------------------------------------------------------------------
# Kernel 1: conv (from wrapper im2col patches) + InstanceNorm + ReLU
#   W (Cout, P) @ patches (P, B*HW) -> (Cout, B*HW); lanes = B*HW (dense).
# ---------------------------------------------------------------------------
def _conv_in_relu_call(patches, w_mat, batch, hw, eps):
    p, l = patches.shape
    cout = w_mat.shape[0]

    def kernel(p_ref, w_ref, o_ref):
        acc = jnp.dot(w_ref[...], p_ref[...], preferred_element_type=jnp.float32)
        y = _instance_norm_lanes(acc, batch, hw, eps, relu=True)
        for b in range(batch):                 # per-batch stores, hw lanes each
            o_ref[b] = y[:, b * hw:(b + 1) * hw].astype(o_ref.dtype)

    return pl.pallas_call(
        kernel,
        out_shape=jax.ShapeDtypeStruct((batch, cout, hw), jnp.bfloat16),
        grid=(1,),
        in_specs=[pl.BlockSpec((p, l), lambda i: (0, 0)),
                  pl.BlockSpec((cout, p), lambda i: (0, 0))],
        out_specs=pl.BlockSpec((batch, cout, hw), lambda i: (0, 0, 0)),
        compiler_params=pltpu.CompilerParams(
            dimension_semantics=("arbitrary",)),
        cost_estimate=pl.CostEstimate(
            flops=2 * p * l * cout,
            transcendentals=cout * batch,
            bytes_accessed=(p * l + cout * p + batch * cout * hw) * 2),
    )(patches, w_mat)


# ---------------------------------------------------------------------------
# Kernel 2: [optional downsample conv] + ResBlock, fully fused.
#   The 3x3 reflect-pad convs are done in-kernel: for each of the 9 taps,
#   gather the shifted image with a constant 0/1 matrix (L, L) on the MXU,
#   then apply the (C, C) tap weight.  All intermediates stay in VMEM/vregs.
# ---------------------------------------------------------------------------
def _fused_resblock_call(x_or_patches, down_wmat, w3_taps, w4_taps, gather,
                         batch, hw, eps):
    fuse_down = down_wmat is not None
    n_taps, c, _ = w3_taps.shape
    l = batch * hw

    def kernel(*refs):
        i = 0
        if fuse_down:
            p_ref = refs[i]; i += 1        # (P, L)       bf16 downsample patches
            wd_ref = refs[i]; i += 1       # (C, P)       bf16
        else:
            x_ref = refs[i]; i += 1        # (C, L)       bf16 ResBlock input
        w3_ref = refs[i]; i += 1           # (taps, C, C) bf16
        w4_ref = refs[i]; i += 1           # (taps, C, C) bf16
        g_ref = refs[i]; i += 1            # (taps, L, L) bf16 0/1 gather mats
        o_ref = refs[i]                    # (C, L)       f32

        if fuse_down:
            a = jnp.dot(wd_ref[...], p_ref[...],
                        preferred_element_type=jnp.float32)
            y_in = _instance_norm_lanes(a, batch, hw, eps, relu=True)  # residual (f32)
            y_in_b = y_in.astype(jnp.bfloat16)
        else:
            y_in_b = x_ref[...]
            y_in = y_in_b.astype(jnp.float32)

        def conv3x3(xb, w_taps_ref):
            acc = jnp.zeros((c, l), jnp.float32)
            for k in range(n_taps):
                gathered = jnp.dot(xb, g_ref[k],
                                   preferred_element_type=jnp.float32)
                acc = acc + jnp.dot(w_taps_ref[k],
                                    gathered.astype(jnp.bfloat16),
                                    preferred_element_type=jnp.float32)
            return acc

        y1 = _instance_norm_lanes(conv3x3(y_in_b, w3_ref), batch, hw, eps,
                                  relu=True)
        y2 = _instance_norm_lanes(conv3x3(y1.astype(jnp.bfloat16), w4_ref),
                                  batch, hw, eps, relu=False)
        o_ref[...] = (y2 + y_in).astype(o_ref.dtype)          # residual add

    args, in_specs = [], []
    if fuse_down:
        p_dim = x_or_patches.shape[0]
        args += [x_or_patches, down_wmat]
        in_specs += [pl.BlockSpec((p_dim, l), lambda i: (0, 0)),
                     pl.BlockSpec((c, p_dim), lambda i: (0, 0))]
        down_flops = 2 * p_dim * l * c
    else:
        args += [x_or_patches]
        in_specs += [pl.BlockSpec((c, l), lambda i: (0, 0))]
        down_flops = 0
    args += [w3_taps, w4_taps, gather]
    in_specs += [pl.BlockSpec((n_taps, c, c), lambda i: (0, 0, 0)),
                 pl.BlockSpec((n_taps, c, c), lambda i: (0, 0, 0)),
                 pl.BlockSpec((n_taps, l, l), lambda i: (0, 0, 0))]

    bytes_in = sum(int(np.prod(a.shape)) * a.dtype.itemsize for a in args)
    return pl.pallas_call(
        kernel,
        out_shape=jax.ShapeDtypeStruct((c, l), jnp.float32),
        grid=(1,),
        in_specs=in_specs,
        out_specs=pl.BlockSpec((c, l), lambda i: (0, 0)),
        compiler_params=pltpu.CompilerParams(
            dimension_semantics=("arbitrary",)),
        cost_estimate=pl.CostEstimate(
            flops=down_flops + 2 * n_taps * 2 * (c * l * l + c * c * l),
            transcendentals=3 * c * batch,
            bytes_accessed=bytes_in + c * l * 4),
    )(*args)


# ---------------------------------------------------------------------------
# Wrapper-side glue (XLA): reflect pad, transposed im2col, constant gather mats
# ---------------------------------------------------------------------------
def _im2col_transposed(x_nchw, k, stride):
    """(B,C,Hp,Wp) -> (k*k*C, B*Ho*Wo); features ordered (di,dj,c), lanes b-major."""
    b, c, h, w = x_nchw.shape
    ho = (h - k) // stride + 1
    wo = (w - k) // stride + 1
    cols = []
    for di in range(k):
        for dj in range(k):
            cols.append(x_nchw[:, :, di:di + (ho - 1) * stride + 1:stride,
                               dj:dj + (wo - 1) * stride + 1:stride])
    p = jnp.concatenate(cols, axis=1).reshape(b, k * k * c, ho * wo)
    p = jnp.transpose(p, (1, 0, 2)).reshape(k * k * c, b * ho * wo)
    return p, ho, wo


def _pad_rows(p, rows):
    if p.shape[0] == rows:
        return p
    return jnp.pad(p, ((0, rows - p.shape[0]), (0, 0)))


def _build_gather_mats(batch, h, w, ksize, pad, pad_type):
    """Constant 0/1 matrices (k*k, L, L), L=batch*h*w: tap-wise shifted-image
    gather with the padding mode baked in (used for in-kernel 3x3 im2col)."""
    def _map(t, n):
        if 0 <= t < n:
            return t
        if pad_type == 'reflect':
            return -t if t < 0 else 2 * n - 2 - t
        if pad_type == 'replicate':
            return 0 if t < 0 else n - 1
        return None                       # zero padding: no source -> stays 0
    hw = h * w
    big_l = batch * hw
    mats = np.zeros((ksize * ksize, big_l, big_l), np.float32)
    for di in range(ksize):
        for dj in range(ksize):
            k = di * ksize + dj
            for b in range(batch):
                for yo in range(h):
                    iy = _map(yo + di - pad, h)
                    if iy is None:
                        continue
                    for xo in range(w):
                        ix = _map(xo + dj - pad, w)
                        if ix is None:
                            continue
                        mats[k, b * hw + iy * w + ix, b * hw + yo * w + xo] = 1.0
    return mats


def _conv_weight_to_mat(w_oihw, p_pad):
    cout, cin, kh, kw = w_oihw.shape
    m = jnp.transpose(w_oihw, (0, 2, 3, 1)).reshape(cout, kh * kw * cin)
    if p_pad > kh * kw * cin:
        m = jnp.pad(m, ((0, 0), (0, p_pad - kh * kw * cin)))
    return m.astype(jnp.bfloat16)


def _conv_weight_to_taps(w_oihw):
    cout, cin, kh, kw = w_oihw.shape
    return jnp.transpose(w_oihw, (2, 3, 0, 1)).reshape(
        kh * kw, cout, cin).astype(jnp.bfloat16)


# ---------------------------------------------------------------------------
# ContentEncoder: parameter init + forward (specialized to norm='in', activ='relu')
# ---------------------------------------------------------------------------
def init_content_encoder_params(key, n_downsample, n_res, input_dim, dim):
    """Deterministic synthetic init.  Returns (kernel params, raw params, out_dim)."""
    raw = []

    def conv_init(k, cout, cin, ks):
        kw, kb = jax.random.split(k)
        fan_in = cin * ks * ks
        w = jax.random.normal(kw, (cout, cin, ks, ks), jnp.float32)
        w = w / jnp.sqrt(jnp.float32(fan_in))
        b = jax.random.normal(kb, (cout,), jnp.float32) * 0.01
        return w, b

    key, sub = jax.random.split(key)
    raw.append(conv_init(sub, dim, input_dim, 7))
    d = dim
    for _ in range(n_downsample):
        key, sub = jax.random.split(key)
        raw.append(conv_init(sub, 2 * d, d, 4))
        d *= 2
    for _ in range(n_res):
        key, sub = jax.random.split(key)
        raw.append(conv_init(sub, d, d, 3))
        key, sub = jax.random.split(key)
        raw.append(conv_init(sub, d, d, 3))

    # Pre-transform weights once (review: hoist out of the jitted forward).
    # Conv biases are dropped: InstanceNorm(affine=False) right after the conv
    # cancels any per-channel bias exactly.
    idx = 0
    params = {}
    w, _ = raw[idx]; idx += 1
    params['stem_w'] = _conv_weight_to_mat(w, _round_up(input_dim * 49, 128))
    down = []
    for _ in range(n_downsample):
        w, _ = raw[idx]; idx += 1
        down.append(_conv_weight_to_mat(w, _round_up(w.shape[1] * 16, 128)))
    params['down_w'] = down
    r3, r4 = [], []
    for _ in range(n_res):
        w, _ = raw[idx]; idx += 1
        r3.append(_conv_weight_to_taps(w))
        w, _ = raw[idx]; idx += 1
        r4.append(_conv_weight_to_taps(w))
    params['res_w3'] = r3
    params['res_w4'] = r4
    return params, raw, d


def content_encoder_forward(params, x, *, n_downsample, n_res,
                            pad_type='reflect'):
    """ContentEncoder.forward (norm='in', activ='relu'); NCHW in / NCHW out."""
    batch = x.shape[0]
    x = x.astype(jnp.bfloat16)

    # stem: Conv2dBlock(input_dim, dim, 7, 1, 3) + IN + ReLU
    stem_w = params['stem_w']
    dim0 = stem_w.shape[0]
    xp = jnp.pad(x, ((0, 0), (0, 0), (3, 3), (3, 3)), mode=_PAD_MODE[pad_type])
    patches, h, w = _im2col_transposed(xp, 7, 1)
    patches = _pad_rows(patches, stem_w.shape[1])
    y = _conv_in_relu_call(patches, stem_w, batch, h * w, _EPS)
    y = y.reshape(batch, dim0, h, w)                       # bf16, NCHW

    # downsampling: Conv2dBlock(d, 2d, 4, 2, 1) + IN + ReLU
    d = dim0
    pend_patches, pend_w = None, None
    for i in range(n_downsample):
        w_mat = params['down_w'][i]
        cout = w_mat.shape[0]
        yp = jnp.pad(y, ((0, 0), (0, 0), (1, 1), (1, 1)),
                     mode=_PAD_MODE[pad_type])
        patches, h, w = _im2col_transposed(yp, 4, 2)
        patches = _pad_rows(patches, w_mat.shape[1])
        if (i == n_downsample - 1) and n_res > 0:
            pend_patches, pend_w = patches, w_mat    # fused into first ResBlock
        else:
            y = _conv_in_relu_call(patches, w_mat, batch, h * w, _EPS)
            y = y.reshape(batch, cout, h, w)
        d = cout

    # ResBlocks (conv+IN+ReLU, conv+IN, + residual), fully fused per block
    if n_res > 0:
        hw = h * w
        gather = jnp.asarray(_build_gather_mats(batch, h, w, 3, 1, pad_type),
                             jnp.bfloat16)
        if pend_patches is not None:
            z = _fused_resblock_call(pend_patches, pend_w,
                                     params['res_w3'][0], params['res_w4'][0],
                                     gather, batch, hw, _EPS)
        else:
            z0 = jnp.transpose(y.reshape(batch, d, hw), (1, 0, 2))
            z0 = z0.reshape(d, batch * hw).astype(jnp.bfloat16)
            z = _fused_resblock_call(z0, None,
                                     params['res_w3'][0], params['res_w4'][0],
                                     gather, batch, hw, _EPS)
        for r in range(1, n_res):
            z = _fused_resblock_call(z.astype(jnp.bfloat16), None,
                                     params['res_w3'][r], params['res_w4'][r],
                                     gather, batch, hw, _EPS)
        out = jnp.transpose(z.reshape(d, batch, hw), (1, 0, 2))
        out = out.reshape(batch, d, h, w)
    else:
        out = y.astype(jnp.float32)
    return out


# ---------------------------------------------------------------------------
# Pure-JAX f32 reference (faithful to the PyTorch module, incl. conv bias)
# ---------------------------------------------------------------------------
def _ref_conv_block(x, w, b, stride, pad, relu, pad_type):
    if pad > 0:
        x = jnp.pad(x, ((0, 0), (0, 0), (pad, pad), (pad, pad)),
                    mode=_PAD_MODE[pad_type])
    y = jax.lax.conv_general_dilated(
        x, w, (stride, stride), 'VALID',
        dimension_numbers=('NCHW', 'OIHW', 'NCHW'),
        precision=jax.lax.Precision.HIGHEST)
    y = y + b.reshape(1, -1, 1, 1)
    m = y.mean(axis=(2, 3), keepdims=True)
    v = y.var(axis=(2, 3), keepdims=True)
    y = (y - m) * jax.lax.rsqrt(v + _EPS)
    if relu:
        y = jnp.maximum(y, 0.0)
    return y


def content_encoder_reference(raw_params, x, n_downsample, n_res, pad_type):
    idx = 0
    w, b = raw_params[idx]; idx += 1
    y = _ref_conv_block(x, w, b, 1, 3, True, pad_type)
    for _ in range(n_downsample):
        w, b = raw_params[idx]; idx += 1
        y = _ref_conv_block(y, w, b, 2, 1, True, pad_type)
    for _ in range(n_res):
        w, b = raw_params[idx]; idx += 1
        hmid = _ref_conv_block(y, w, b, 1, 1, True, pad_type)
        w, b = raw_params[idx]; idx += 1
        hmid = _ref_conv_block(hmid, w, b, 1, 1, False, pad_type)
        y = y + hmid
    return y


# ---------------------------------------------------------------------------
if __name__ == "__main__":
    key = jax.random.PRNGKey(0)
    k_x, k_p = jax.random.split(key)

    n_downsample, n_res = 1, 1
    input_dim, dim = 4, 8
    batch, spatial = 2, 16

    x = jax.random.normal(k_x, (batch, input_dim, spatial, spatial), jnp.float32)
    params, raw_params, output_dim = init_content_encoder_params(
        k_p, n_downsample, n_res, input_dim, dim)

    fwd = jax.jit(functools.partial(
        content_encoder_forward, n_downsample=n_downsample, n_res=n_res,
        pad_type='reflect'))
    out = jax.block_until_ready(fwd(params, x))

    expected = (batch, output_dim,
                spatial // (2 ** n_downsample), spatial // (2 ** n_downsample))
    assert out.shape == expected, (out.shape, expected)
    assert bool(jnp.all(jnp.isfinite(out)))

    # Loose-tolerance check vs. an f32 reference (bf16 MXU operands in-kernel).
    ref = content_encoder_reference(raw_params, x, n_downsample, n_res, 'reflect')
    assert jnp.allclose(out, ref, atol=0.1, rtol=0.1), \
        float(jnp.max(jnp.abs(out - ref)))

    print("KERNEL_OK")
</pallas_src>

<mosaic_0001>
module attributes {stable_mosaic.version = 11 : i64} {
  func.func @kernel(%arg0: i32, %arg1: memref<256x512xbf16, #tpu.memory_space<vmem>>, %arg2: memref<8x256xbf16, #tpu.memory_space<vmem>>, %arg3: memref<2x8x256xbf16, #tpu.memory_space<vmem>>) attributes {dimension_semantics = [#tpu.dimension_semantics<arbitrary>], iteration_bounds = array<i64: 1>, scalar_prefetch = 0 : i64, scratch_operands = 0 : i64, tpu.core_type = #tpu.core_type<tc>, window_params = [{pipeline_mode = #tpu.pipeline_mode<synchronous>, transform_indices = @transform_0, window_bounds = array<i64: 256, 512>}, {pipeline_mode = #tpu.pipeline_mode<synchronous>, transform_indices = @transform_1, window_bounds = array<i64: 8, 256>}, {pipeline_mode = #tpu.pipeline_mode<synchronous>, transform_indices = @transform_2, window_bounds = array<i64: 2, 8, 256>}]} {
    %c0 = arith.constant 0 : index
    %c0_0 = arith.constant 0 : index
    %0 = vector.load %arg2[%c0, %c0_0] : memref<8x256xbf16, #tpu.memory_space<vmem>>, vector<8x256xbf16>
    %c0_1 = arith.constant 0 : index
    %c0_2 = arith.constant 0 : index
    %1 = vector.load %arg1[%c0_1, %c0_2] : memref<256x512xbf16, #tpu.memory_space<vmem>>, vector<256x512xbf16>
    %cst = arith.constant dense<0.000000e+00> : vector<8x512xf32>
    %2 = tpu.matmul %0, %1, %cst {dimension_numbers = #tpu.dot_dimension_numbers<[1], [0], [0], [1], [0, 0, 1, 1], [], []>} : vector<8x256xbf16>, vector<256x512xbf16>, vector<8x512xf32> -> vector<8x512xf32>
    %3 = tpu.iota {dimensions = array<i32: 1>} : vector<8x512xi32>
    %cst_3 = arith.constant 0.000000e+00 : f32
    %4 = vector.broadcast %cst_3 : f32 to vector<8x512xf32>
    %cst_4 = arith.constant 0.000000e+00 : f32
    %5 = vector.broadcast %cst_4 : f32 to vector<8x512xf32>
    %c0_i32 = arith.constant 0 : i32
    %6 = vector.broadcast %c0_i32 : i32 to vector<8x512xi32>
    %7 = arith.cmpi sge, %3, %6 : vector<8x512xi32>
    %c256_i32 = arith.constant 256 : i32
    %8 = vector.broadcast %c256_i32 : i32 to vector<8x512xi32>
    %9 = arith.cmpi slt, %3, %8 : vector<8x512xi32>
    %10 = arith.andi %7, %9 : vector<8x512xi1>
    %11 = arith.extui %10 : vector<8x512xi1> to vector<8x512xi32>
    %12 = arith.sitofp %11 : vector<8x512xi32> to vector<8x512xf32>
    %13 = arith.mulf %2, %12 : vector<8x512xf32>
    %cst_5 = arith.constant dense<0.000000e+00> : vector<8xf32>
    %14 = vector.multi_reduction <add>, %13, %cst_5 [1] : vector<8x512xf32> to vector<8xf32>
    %15 = vector.shape_cast %14 : vector<8xf32> to vector<8x1xf32>
    %16 = arith.mulf %13, %13 : vector<8x512xf32>
    %cst_6 = arith.constant dense<0.000000e+00> : vector<8xf32>
    %17 = vector.multi_reduction <add>, %16, %cst_6 [1] : vector<8x512xf32> to vector<8xf32>
    %18 = vector.shape_cast %17 : vector<8xf32> to vector<8x1xf32>
    %cst_7 = arith.constant 3.906250e-03 : f32
    %19 = vector.broadcast %cst_7 : f32 to vector<8x1xf32>
    %20 = arith.mulf %15, %19 : vector<8x1xf32>
    %cst_8 = arith.constant 3.906250e-03 : f32
    %21 = vector.broadcast %cst_8 : f32 to vector<8x1xf32>
    %22 = arith.mulf %18, %21 : vector<8x1xf32>
    %23 = arith.mulf %20, %20 : vector<8x1xf32>
    %24 = arith.subf %22, %23 : vector<8x1xf32>
    %cst_9 = arith.constant 0.000000e+00 : f32
    %25 = vector.broadcast %cst_9 : f32 to vector<8x1xf32>
    %26 = arith.maximumf %24, %25 : vector<8x1xf32>
    %27 = vector.broadcast %20 : vector<8x1xf32> to vector<8x512xf32>
    %28 = arith.mulf %27, %12 : vector<8x512xf32>
    %29 = arith.addf %4, %28 : vector<8x512xf32>
    %cst_10 = arith.constant 9.99999974E-6 : f32
    %30 = vector.broadcast %cst_10 : f32 to vector<8x1xf32>
    %31 = arith.addf %26, %30 : vector<8x1xf32>
    %32 = math.rsqrt %31 : vector<8x1xf32>
    %33 = vector.broadcast %32 : vector<8x1xf32> to vector<8x512xf32>
    %34 = arith.mulf %33, %12 : vector<8x512xf32>
    %35 = arith.addf %5, %34 : vector<8x512xf32>
    %c256_i32_11 = arith.constant 256 : i32
    %36 = vector.broadcast %c256_i32_11 : i32 to vector<8x512xi32>
    %37 = arith.cmpi sge, %3, %36 : vector<8x512xi32>
    %c512_i32 = arith.constant 512 : i32
    %38 = vector.broadcast %c512_i32 : i32 to vector<8x512xi32>
    %39 = arith.cmpi slt, %3, %38 : vector<8x512xi32>
    %40 = arith.andi %37, %39 : vector<8x512xi1>
    %41 = arith.extui %40 : vector<8x512xi1> to vector<8x512xi32>
    %42 = arith.sitofp %41 : vector<8x512xi32> to vector<8x512xf32>
    %43 = arith.mulf %2, %42 : vector<8x512xf32>
    %cst_12 = arith.constant dense<0.000000e+00> : vector<8xf32>
    %44 = vector.multi_reduction <add>, %43, %cst_12 [1] : vector<8x512xf32> to vector<8xf32>
    %45 = vector.shape_cast %44 : vector<8xf32> to vector<8x1xf32>
    %46 = arith.mulf %43, %43 : vector<8x512xf32>
    %cst_13 = arith.constant dense<0.000000e+00> : vector<8xf32>
    %47 = vector.multi_reduction <add>, %46, %cst_13 [1] : vector<8x512xf32> to vector<8xf32>
    %48 = vector.shape_cast %47 : vector<8xf32> to vector<8x1xf32>
    %cst_14 = arith.constant 3.906250e-03 : f32
    %49 = vector.broadcast %cst_14 : f32 to vector<8x1xf32>
    %50 = arith.mulf %45, %49 : vector<8x1xf32>
    %cst_15 = arith.constant 3.906250e-03 : f32
    %51 = vector.broadcast %cst_15 : f32 to vector<8x1xf32>
    %52 = arith.mulf %48, %51 : vector<8x1xf32>
    %53 = arith.mulf %50, %50 : vector<8x1xf32>
    %54 = arith.subf %52, %53 : vector<8x1xf32>
    %cst_16 = arith.constant 0.000000e+00 : f32
    %55 = vector.broadcast %cst_16 : f32 to vector<8x1xf32>
    %56 = arith.maximumf %54, %55 : vector<8x1xf32>
    %57 = vector.broadcast %50 : vector<8x1xf32> to vector<8x512xf32>
    %58 = arith.mulf %57, %42 : vector<8x512xf32>
    %59 = arith.addf %29, %58 : vector<8x512xf32>
    %cst_17 = arith.constant 9.99999974E-6 : f32
    %60 = vector.broadcast %cst_17 : f32 to vector<8x1xf32>
    %61 = arith.addf %56, %60 : vector<8x1xf32>
    %62 = math.rsqrt %61 : vector<8x1xf32>
    %63 = vector.broadcast %62 : vector<8x1xf32> to vector<8x512xf32>
    %64 = arith.mulf %63, %42 : vector<8x512xf32>
    %65 = arith.addf %35, %64 : vector<8x512xf32>
    %66 = arith.subf %2, %59 : vector<8x512xf32>
    %67 = arith.mulf %66, %65 : vector<8x512xf32>
    %cst_18 = arith.constant 0.000000e+00 : f32
    %68 = vector.broadcast %cst_18 : f32 to vector<8x512xf32>
    %69 = arith.maximumf %67, %68 : vector<8x512xf32>
    %70 = vector.extract_strided_slice %69 {offsets = [0, 0], sizes = [8, 256], strides = [1, 1]} : vector<8x512xf32> to vector<8x256xf32>
    %71 = arith.truncf %70 : vector<8x256xf32> to vector<8x256xbf16>
    %c0_19 = arith.constant 0 : index
    %c0_20 = arith.constant 0 : index
    %c0_21 = arith.constant 0 : index
    %72 = vector.load %arg3[%c0_19, %c0_20, %c0_21] : memref<2x8x256xbf16, #tpu.memory_space<vmem>>, vector<1x8x256xbf16>
    %73 = vector.shape_cast %72 : vector<1x8x256xbf16> to vector<8x256xbf16>
    %74 = vector.shape_cast %71 : vector<8x256xbf16> to vector<1x8x256xbf16>
    tpu.vector_store %arg3[%c0_19, %c0_20, %c0_21], %74 {strides = array<i32>} : memref<2x8x256xbf16, #tpu.memory_space<vmem>>, vector<1x8x256xbf16>,
    %75 = vector.extract_strided_slice %69 {offsets = [0, 256], sizes = [8, 256], strides = [1, 1]} : vector<8x512xf32> to vector<8x256xf32>
    %76 = arith.truncf %75 : vector<8x256xf32> to vector<8x256xbf16>
    %c1 = arith.constant 1 : index
    %c0_22 = arith.constant 0 : index
    %c0_23 = arith.constant 0 : index
    %77 = vector.load %arg3[%c1, %c0_22, %c0_23] : memref<2x8x256xbf16, #tpu.memory_space<vmem>>, vector<1x8x256xbf16>
    %78 = vector.shape_cast %77 : vector<1x8x256xbf16> to vector<8x256xbf16>
    %79 = vector.shape_cast %76 : vector<8x256xbf16> to vector<1x8x256xbf16>
    tpu.vector_store %arg3[%c1, %c0_22, %c0_23], %79 {strides = array<i32>} : memref<2x8x256xbf16, #tpu.memory_space<vmem>>, vector<1x8x256xbf16>,
    return
  }
  func.func @transform_0(%arg0: i32) -> (i32, i32) {
    %c0_i32 = arith.constant 0 : i32
    %c0_i32_0 = arith.constant 0 : i32
    %c0_i32_1 = arith.constant 0 : i32
    return %c0_i32, %c0_i32_0 : i32, i32
  }
  func.func @transform_1(%arg0: i32) -> (i32, i32) {
    %c0_i32 = arith.constant 0 : i32
    %c0_i32_0 = arith.constant 0 : i32
    %c0_i32_1 = arith.constant 0 : i32
    return %c0_i32, %c0_i32_0 : i32, i32
  }
  func.func @transform_2(%arg0: i32) -> (i32, i32, i32) {
    %c0_i32 = arith.constant 0 : i32
    %c0_i32_0 = arith.constant 0 : i32
    %c0_i32_1 = arith.constant 0 : i32
    %c0_i32_2 = arith.constant 0 : i32
    return %c0_i32, %c0_i32_0, %c0_i32_1 : i32, i32, i32
  }
}

module attributes {stable_mosaic.version = 11 : i64} {
  func.func @kernel(%arg0: i32, %arg1: memref<128x128xbf16, #tpu.memory_space<vmem>>, %arg2: memref<16x128xbf16, #tpu.memory_space<vmem>>, %arg3: memref<9x16x16xbf16, #tpu.memory_space<vmem>>, %arg4: memref<9x16x16xbf16, #tpu.memory_space<vmem>>, %arg5: memref<9x128x128xbf16, #tpu.memory_space<vmem>>, %arg6: memref<16x128xf32, #tpu.memory_space<vmem>>) attributes {dimension_semantics = [#tpu.dimension_semantics<arbitrary>], iteration_bounds = array<i64: 1>, scalar_prefetch = 0 : i64, scratch_operands = 0 : i64, tpu.core_type = #tpu.core_type<tc>, window_params = [{pipeline_mode = #tpu.pipeline_mode<synchronous>, transform_indices = @transform_0, window_bounds = array<i64: 128, 128>}, {pipeline_mode = #tpu.pipeline_mode<synchronous>, transform_indices = @transform_1, window_bounds = array<i64: 16, 128>}, {pipeline_mode = #tpu.pipeline_mode<synchronous>, transform_indices = @transform_2, window_bounds = array<i64: 9, 16, 16>}, {pipeline_mode = #tpu.pipeline_mode<synchronous>, transform_indices = @transform_3, window_bounds = array<i64: 9, 16, 16>}, {pipeline_mode = #tpu.pipeline_mode<synchronous>, transform_indices = @transform_4, window_bounds = array<i64: 9, 128, 128>}, {pipeline_mode = #tpu.pipeline_mode<synchronous>, transform_indices = @transform_5, window_bounds = array<i64: 16, 128>}]} {
    %c0 = arith.constant 0 : index
    %c0_0 = arith.constant 0 : index
    %0 = vector.load %arg2[%c0, %c0_0] : memref<16x128xbf16, #tpu.memory_space<vmem>>, vector<16x128xbf16>
    %c0_1 = arith.constant 0 : index
    %c0_2 = arith.constant 0 : index
    %1 = vector.load %arg1[%c0_1, %c0_2] : memref<128x128xbf16, #tpu.memory_space<vmem>>, vector<128x128xbf16>
    %cst = arith.constant dense<0.000000e+00> : vector<16x128xf32>
    %2 = tpu.matmul %0, %1, %cst {dimension_numbers = #tpu.dot_dimension_numbers<[1], [0], [0], [1], [0, 0, 1, 1], [], []>} : vector<16x128xbf16>, vector<128x128xbf16>, vector<16x128xf32> -> vector<16x128xf32>
    %3 = tpu.iota {dimensions = array<i32: 1>} : vector<16x128xi32>
    %cst_3 = arith.constant 0.000000e+00 : f32
    %4 = vector.broadcast %cst_3 : f32 to vector<16x128xf32>
    %cst_4 = arith.constant 0.000000e+00 : f32
    %5 = vector.broadcast %cst_4 : f32 to vector<16x128xf32>
    %c0_i32 = arith.constant 0 : i32
    %6 = vector.broadcast %c0_i32 : i32 to vector<16x128xi32>
    %7 = arith.cmpi sge, %3, %6 : vector<16x128xi32>
    %c64_i32 = arith.constant 64 : i32
    %8 = vector.broadcast %c64_i32 : i32 to vector<16x128xi32>
    %9 = arith.cmpi slt, %3, %8 : vector<16x128xi32>
    %10 = arith.andi %7, %9 : vector<16x128xi1>
    %11 = arith.extui %10 : vector<16x128xi1> to vector<16x128xi32>
    %12 = arith.sitofp %11 : vector<16x128xi32> to vector<16x128xf32>
    %13 = arith.mulf %2, %12 : vector<16x128xf32>
    %cst_5 = arith.constant dense<0.000000e+00> : vector<16xf32>
    %14 = vector.multi_reduction <add>, %13, %cst_5 [1] : vector<16x128xf32> to vector<16xf32>
    %15 = vector.shape_cast %14 : vector<16xf32> to vector<16x1xf32>
    %16 = arith.mulf %13, %13 : vector<16x128xf32>
    %cst_6 = arith.constant dense<0.000000e+00> : vector<16xf32>
    %17 = vector.multi_reduction <add>, %16, %cst_6 [1] : vector<16x128xf32> to vector<16xf32>
    %18 = vector.shape_cast %17 : vector<16xf32> to vector<16x1xf32>
    %cst_7 = arith.constant 1.562500e-02 : f32
    %19 = vector.broadcast %cst_7 : f32 to vector<16x1xf32>
    %20 = arith.mulf %15, %19 : vector<16x1xf32>
    %cst_8 = arith.constant 1.562500e-02 : f32
    %21 = vector.broadcast %cst_8 : f32 to vector<16x1xf32>
    %22 = arith.mulf %18, %21 : vector<16x1xf32>
    %23 = arith.mulf %20, %20 : vector<16x1xf32>
    %24 = arith.subf %22, %23 : vector<16x1xf32>
    %cst_9 = arith.constant 0.000000e+00 : f32
    %25 = vector.broadcast %cst_9 : f32 to vector<16x1xf32>
    %26 = arith.maximumf %24, %25 : vector<16x1xf32>
    %27 = vector.broadcast %20 : vector<16x1xf32> to vector<16x128xf32>
    %28 = arith.mulf %27, %12 : vector<16x128xf32>
    %29 = arith.addf %4, %28 : vector<16x128xf32>
    %cst_10 = arith.constant 9.99999974E-6 : f32
    %30 = vector.broadcast %cst_10 : f32 to vector<16x1xf32>
    %31 = arith.addf %26, %30 : vector<16x1xf32>
    %32 = math.rsqrt %31 : vector<16x1xf32>
    %33 = vector.broadcast %32 : vector<16x1xf32> to vector<16x128xf32>
    %34 = arith.mulf %33, %12 : vector<16x128xf32>
    %35 = arith.addf %5, %34 : vector<16x128xf32>
    %c64_i32_11 = arith.constant 64 : i32
    %36 = vector.broadcast %c64_i32_11 : i32 to vector<16x128xi32>
    %37 = arith.cmpi sge, %3, %36 : vector<16x128xi32>
    %c128_i32 = arith.constant 128 : i32
    %38 = vector.broadcast %c128_i32 : i32 to vector<16x128xi32>
    %39 = arith.cmpi slt, %3, %38 : vector<16x128xi32>
    %40 = arith.andi %37, %39 : vector<16x128xi1>
    %41 = arith.extui %40 : vector<16x128xi1> to vector<16x128xi32>
    %42 = arith.sitofp %41 : vector<16x128xi32> to vector<16x128xf32>
    %43 = arith.mulf %2, %42 : vector<16x128xf32>
    %cst_12 = arith.constant dense<0.000000e+00> : vector<16xf32>
    %44 = vector.multi_reduction <add>, %43, %cst_12 [1] : vector<16x128xf32> to vector<16xf32>
    %45 = vector.shape_cast %44 : vector<16xf32> to vector<16x1xf32>
    %46 = arith.mulf %43, %43 : vector<16x128xf32>
    %cst_13 = arith.constant dense<0.000000e+00> : vector<16xf32>
    %47 = vector.multi_reduction <add>, %46, %cst_13 [1] : vector<16x128xf32> to vector<16xf32>
    %48 = vector.shape_cast %47 : vector<16xf32> to vector<16x1xf32>
    %cst_14 = arith.constant 1.562500e-02 : f32
    %49 = vector.broadcast %cst_14 : f32 to vector<16x1xf32>
    %50 = arith.mulf %45, %49 : vector<16x1xf32>
    %cst_15 = arith.constant 1.562500e-02 : f32
    %51 = vector.broadcast %cst_15 : f32 to vector<16x1xf32>
    %52 = arith.mulf %48, %51 : vector<16x1xf32>
    %53 = arith.mulf %50, %50 : vector<16x1xf32>
    %54 = arith.subf %52, %53 : vector<16x1xf32>
    %cst_16 = arith.constant 0.000000e+00 : f32
    %55 = vector.broadcast %cst_16 : f32 to vector<16x1xf32>
    %56 = arith.maximumf %54, %55 : vector<16x1xf32>
    %57 = vector.broadcast %50 : vector<16x1xf32> to vector<16x128xf32>
    %58 = arith.mulf %57, %42 : vector<16x128xf32>
    %59 = arith.addf %29, %58 : vector<16x128xf32>
    %cst_17 = arith.constant 9.99999974E-6 : f32
    %60 = vector.broadcast %cst_17 : f32 to vector<16x1xf32>
    %61 = arith.addf %56, %60 : vector<16x1xf32>
    %62 = math.rsqrt %61 : vector<16x1xf32>
    %63 = vector.broadcast %62 : vector<16x1xf32> to vector<16x128xf32>
    %64 = arith.mulf %63, %42 : vector<16x128xf32>
    %65 = arith.addf %35, %64 : vector<16x128xf32>
    %66 = arith.subf %2, %59 : vector<16x128xf32>
    %67 = arith.mulf %66, %65 : vector<16x128xf32>
    %cst_18 = arith.constant 0.000000e+00 : f32
    %68 = vector.broadcast %cst_18 : f32 to vector<16x128xf32>
    %69 = arith.maximumf %67, %68 : vector<16x128xf32>
    %70 = arith.truncf %69 : vector<16x128xf32> to vector<16x128xbf16>
    %cst_19 = arith.constant 0.000000e+00 : f32
    %71 = vector.broadcast %cst_19 : f32 to vector<16x128xf32>
    %c0_20 = arith.constant 0 : index
    %c0_21 = arith.constant 0 : index
    %c0_22 = arith.constant 0 : index
    %72 = vector.load %arg5[%c0_20, %c0_21, %c0_22] : memref<9x128x128xbf16, #tpu.memory_space<vmem>>, vector<1x128x128xbf16>
    %73 = vector.shape_cast %72 : vector<1x128x128xbf16> to vector<128x128xbf16>
    %cst_23 = arith.constant dense<0.000000e+00> : vector<16x128xf32>
    %74 = tpu.matmul %70, %73, %cst_23 {dimension_numbers = #tpu.dot_dimension_numbers<[1], [0], [0], [1], [0, 0, 1, 1], [], []>} : vector<16x128xbf16>, vector<128x128xbf16>, vector<16x128xf32> -> vector<16x128xf32>
    %c0_24 = arith.constant 0 : index
    %c0_25 = arith.constant 0 : index
    %c0_26 = arith.constant 0 : index
    %75 = vector.load %arg3[%c0_24, %c0_25, %c0_26] : memref<9x16x16xbf16, #tpu.memory_space<vmem>>, vector<1x16x16xbf16>
    %76 = vector.shape_cast %75 : vector<1x16x16xbf16> to vector<16x16xbf16>
    %77 = arith.truncf %74 : vector<16x128xf32> to vector<16x128xbf16>
    %cst_27 = arith.constant dense<0.000000e+00> : vector<16x128xf32>
    %78 = tpu.matmul %76, %77, %cst_27 {dimension_numbers = #tpu.dot_dimension_numbers<[1], [0], [0], [1], [0, 0, 1, 1], [], []>} : vector<16x16xbf16>, vector<16x128xbf16>, vector<16x128xf32> -> vector<16x128xf32>
    %79 = arith.addf %71, %78 : vector<16x128xf32>
    %c1 = arith.constant 1 : index
    %c0_28 = arith.constant 0 : index
    %c0_29 = arith.constant 0 : index
    %80 = vector.load %arg5[%c1, %c0_28, %c0_29] : memref<9x128x128xbf16, #tpu.memory_space<vmem>>, vector<1x128x128xbf16>
    %81 = vector.shape_cast %80 : vector<1x128x128xbf16> to vector<128x128xbf16>
    %cst_30 = arith.constant dense<0.000000e+00> : vector<16x128xf32>
    %82 = tpu.matmul %70, %81, %cst_30 {dimension_numbers = #tpu.dot_dimension_numbers<[1], [0], [0], [1], [0, 0, 1, 1], [], []>} : vector<16x128xbf16>, vector<128x128xbf16>, vector<16x128xf32> -> vector<16x128xf32>
    %c1_31 = arith.constant 1 : index
    %c0_32 = arith.constant 0 : index
    %c0_33 = arith.constant 0 : index
    %83 = vector.load %arg3[%c1_31, %c0_32, %c0_33] : memref<9x16x16xbf16, #tpu.memory_space<vmem>>, vector<1x16x16xbf16>
    %84 = vector.shape_cast %83 : vector<1x16x16xbf16> to vector<16x16xbf16>
    %85 = arith.truncf %82 : vector<16x128xf32> to vector<16x128xbf16>
    %cst_34 = arith.constant dense<0.000000e+00> : vector<16x128xf32>
    %86 = tpu.matmul %84, %85, %cst_34 {dimension_numbers = #tpu.dot_dimension_numbers<[1], [0], [0], [1], [0, 0, 1, 1], [], []>} : vector<16x16xbf16>, vector<16x128xbf16>, vector<16x128xf32> -> vector<16x128xf32>
    %87 = arith.addf %79, %86 : vector<16x128xf32>
    %c2 = arith.constant 2 : index
    %c0_35 = arith.constant 0 : index
    %c0_36 = arith.constant 0 : index
    %88 = vector.load %arg5[%c2, %c0_35, %c0_36] : memref<9x128x128xbf16, #tpu.memory_space<vmem>>, vector<1x128x128xbf16>
    %89 = vector.shape_cast %88 : vector<1x128x128xbf16> to vector<128x128xbf16>
    %cst_37 = arith.constant dense<0.000000e+00> : vector<16x128xf32>
    %90 = tpu.matmul %70, %89, %cst_37 {dimension_numbers = #tpu.dot_dimension_numbers<[1], [0], [0], [1], [0, 0, 1, 1], [], []>} : vector<16x128xbf16>, vector<128x128xbf16>, vector<16x128xf32> -> vector<16x128xf32>
    %c2_38 = arith.constant 2 : index
    %c0_39 = arith.constant 0 : index
    %c0_40 = arith.constant 0 : index
    %91 = vector.load %arg3[%c2_38, %c0_39, %c0_40] : memref<9x16x16xbf16, #tpu.memory_space<vmem>>, vector<1x16x16xbf16>
    %92 = vector.shape_cast %91 : vector<1x16x16xbf16> to vector<16x16xbf16>
    %93 = arith.truncf %90 : vector<16x128xf32> to vector<16x128xbf16>
    %cst_41 = arith.constant dense<0.000000e+00> : vector<16x128xf32>
    %94 = tpu.matmul %92, %93, %cst_41 {dimension_numbers = #tpu.dot_dimension_numbers<[1], [0], [0], [1], [0, 0, 1, 1], [], []>} : vector<16x16xbf16>, vector<16x128xbf16>, vector<16x128xf32> -> vector<16x128xf32>
    %95 = arith.addf %87, %94 : vector<16x128xf32>
    %c3 = arith.constant 3 : index
    %c0_42 = arith.constant 0 : index
    %c0_43 = arith.constant 0 : index
    %96 = vector.load %arg5[%c3, %c0_42, %c0_43] : memref<9x128x128xbf16, #tpu.memory_space<vmem>>, vector<1x128x128xbf16>
    %97 = vector.shape_cast %96 : vector<1x128x128xbf16> to vector<128x128xbf16>
    %cst_44 = arith.constant dense<0.000000e+00> : vector<16x128xf32>
    %98 = tpu.matmul %70, %97, %cst_44 {dimension_numbers = #tpu.dot_dimension_numbers<[1], [0], [0], [1], [0, 0, 1, 1], [], []>} : vector<16x128xbf16>, vector<128x128xbf16>, vector<16x128xf32> -> vector<16x128xf32>
    %c3_45 = arith.constant 3 : index
    %c0_46 = arith.constant 0 : index
    %c0_47 = arith.constant 0 : index
    %99 = vector.load %arg3[%c3_45, %c0_46, %c0_47] : memref<9x16x16xbf16, #tpu.memory_space<vmem>>, vector<1x16x16xbf16>
    %100 = vector.shape_cast %99 : vector<1x16x16xbf16> to vector<16x16xbf16>
    %101 = arith.truncf %98 : vector<16x128xf32> to vector<16x128xbf16>
    %cst_48 = arith.constant dense<0.000000e+00> : vector<16x128xf32>
    %102 = tpu.matmul %100, %101, %cst_48 {dimension_numbers = #tpu.dot_dimension_numbers<[1], [0], [0], [1], [0, 0, 1, 1], [], []>} : vector<16x16xbf16>, vector<16x128xbf16>, vector<16x128xf32> -> vector<16x128xf32>
    %103 = arith.addf %95, %102 : vector<16x128xf32>
    %c4 = arith.constant 4 : index
    %c0_49 = arith.constant 0 : index
    %c0_50 = arith.constant 0 : index
    %104 = vector.load %arg5[%c4, %c0_49, %c0_50] : memref<9x128x128xbf16, #tpu.memory_space<vmem>>, vector<1x128x128xbf16>
    %105 = vector.shape_cast %104 : vector<1x128x128xbf16> to vector<128x128xbf16>
    %cst_51 = arith.constant dense<0.000000e+00> : vector<16x128xf32>
    %106 = tpu.matmul %70, %105, %cst_51 {dimension_numbers = #tpu.dot_dimension_numbers<[1], [0], [0], [1], [0, 0, 1, 1], [], []>} : vector<16x128xbf16>, vector<128x128xbf16>, vector<16x128xf32> -> vector<16x128xf32>
    %c4_52 = arith.constant 4 : index
    %c0_53 = arith.constant 0 : index
    %c0_54 = arith.constant 0 : index
    %107 = vector.load %arg3[%c4_52, %c0_53, %c0_54] : memref<9x16x16xbf16, #tpu.memory_space<vmem>>, vector<1x16x16xbf16>
    %108 = vector.shape_cast %107 : vector<1x16x16xbf16> to vector<16x16xbf16>
    %109 = arith.truncf %106 : vector<16x128xf32> to vector<16x128xbf16>
    %cst_55 = arith.constant dense<0.000000e+00> : vector<16x128xf32>
    %110 = tpu.matmul %108, %109, %cst_55 {dimension_numbers = #tpu.dot_dimension_numbers<[1], [0], [0], [1], [0, 0, 1, 1], [], []>} : vector<16x16xbf16>, vector<16x128xbf16>, vector<16x128xf32> -> vector<16x128xf32>
    %111 = arith.addf %103, %110 : vector<16x128xf32>
    %c5 = arith.constant 5 : index
    %c0_56 = arith.constant 0 : index
    %c0_57 = arith.constant 0 : index
    %112 = vector.load %arg5[%c5, %c0_56, %c0_57] : memref<9x128x128xbf16, #tpu.memory_space<vmem>>, vector<1x128x128xbf16>
    %113 = vector.shape_cast %112 : vector<1x128x128xbf16> to vector<128x128xbf16>
    %cst_58 = arith.constant dense<0.000000e+00> : vector<16x128xf32>
    %114 = tpu.matmul %70, %113, %cst_58 {dimension_numbers = #tpu.dot_dimension_numbers<[1], [0], [0], [1], [0, 0, 1, 1], [], []>} : vector<16x128xbf16>, vector<128x128xbf16>, vector<16x128xf32> -> vector<16x128xf32>
    %c5_59 = arith.constant 5 : index
    %c0_60 = arith.constant 0 : index
    %c0_61 = arith.constant 0 : index
    %115 = vector.load %arg3[%c5_59, %c0_60, %c0_61] : memref<9x16x16xbf16, #tpu.memory_space<vmem>>, vector<1x16x16xbf16>
    %116 = vector.shape_cast %115 : vector<1x16x16xbf16> to vector<16x16xbf16>
    %117 = arith.truncf %114 : vector<16x128xf32> to vector<16x128xbf16>
    %cst_62 = arith.constant dense<0.000000e+00> : vector<16x128xf32>
    %118 = tpu.matmul %116, %117, %cst_62 {dimension_numbers = #tpu.dot_dimension_numbers<[1], [0], [0], [1], [0, 0, 1, 1], [], []>} : vector<16x16xbf16>, vector<16x128xbf16>, vector<16x128xf32> -> vector<16x128xf32>
    %119 = arith.addf %111, %118 : vector<16x128xf32>
    %c6 = arith.constant 6 : index
    %c0_63 = arith.constant 0 : index
    %c0_64 = arith.constant 0 : index
    %120 = vector.load %arg5[%c6, %c0_63, %c0_64] : memref<9x128x128xbf16, #tpu.memory_space<vmem>>, vector<1x128x128xbf16>
    %121 = vector.shape_cast %120 : vector<1x128x128xbf16> to vector<128x128xbf16>
    %cst_65 = arith.constant dense<0.000000e+00> : vector<16x128xf32>
    %122 = tpu.matmul %70, %121, %cst_65 {dimension_numbers = #tpu.dot_dimension_numbers<[1], [0], [0], [1], [0, 0, 1, 1], [], []>} : vector<16x128xbf16>, vector<128x128xbf16>, vector<16x128xf32> -> vector<16x128xf32>
    %c6_66 = arith.constant 6 : index
    %c0_67 = arith.constant 0 : index
    %c0_68 = arith.constant 0 : index
    %123 = vector.load %arg3[%c6_66, %c0_67, %c0_68] : memref<9x16x16xbf16, #tpu.memory_space<vmem>>, vector<1x16x16xbf16>
    %124 = vector.shape_cast %123 : vector<1x16x16xbf16> to vector<16x16xbf16>
    %125 = arith.truncf %122 : vector<16x128xf32> to vector<16x128xbf16>
    %cst_69 = arith.constant dense<0.000000e+00> : vector<16x128xf32>
    %126 = tpu.matmul %124, %125, %cst_69 {dimension_numbers = #tpu.dot_dimension_numbers<[1], [0], [0], [1], [0, 0, 1, 1], [], []>} : vector<16x16xbf16>, vector<16x128xbf16>, vector<16x128xf32> -> vector<16x128xf32>
    %127 = arith.addf %119, %126 : vector<16x128xf32>
    %c7 = arith.constant 7 : index
    %c0_70 = arith.constant 0 : index
    %c0_71 = arith.constant 0 : index
    %128 = vector.load %arg5[%c7, %c0_70, %c0_71] : memref<9x128x128xbf16, #tpu.memory_space<vmem>>, vector<1x128x128xbf16>
    %129 = vector.shape_cast %128 : vector<1x128x128xbf16> to vector<128x128xbf16>
    %cst_72 = arith.constant dense<0.000000e+00> : vector<16x128xf32>
    %130 = tpu.matmul %70, %129, %cst_72 {dimension_numbers = #tpu.dot_dimension_numbers<[1], [0], [0], [1], [0, 0, 1, 1], [], []>} : vector<16x128xbf16>, vector<128x128xbf16>, vector<16x128xf32> -> vector<16x128xf32>
    %c7_73 = arith.constant 7 : index
    %c0_74 = arith.constant 0 : index
    %c0_75 = arith.constant 0 : index
    %131 = vector.load %arg3[%c7_73, %c0_74, %c0_75] : memref<9x16x16xbf16, #tpu.memory_space<vmem>>, vector<1x16x16xbf16>
    %132 = vector.shape_cast %131 : vector<1x16x16xbf16> to vector<16x16xbf16>
    %133 = arith.truncf %130 : vector<16x128xf32> to vector<16x128xbf16>
    %cst_76 = arith.constant dense<0.000000e+00> : vector<16x128xf32>
    %134 = tpu.matmul %132, %133, %cst_76 {dimension_numbers = #tpu.dot_dimension_numbers<[1], [0], [0], [1], [0, 0, 1, 1], [], []>} : vector<16x16xbf16>, vector<16x128xbf16>, vector<16x128xf32> -> vector<16x128xf32>
    %135 = arith.addf %127, %134 : vector<16x128xf32>
    %c8 = arith.constant 8 : index
    %c0_77 = arith.constant 0 : index
    %c0_78 = arith.constant 0 : index
    %136 = vector.load %arg5[%c8, %c0_77, %c0_78] : memref<9x128x128xbf16, #tpu.memory_space<vmem>>, vector<1x128x128xbf16>
    %137 = vector.shape_cast %136 : vector<1x128x128xbf16> to vector<128x128xbf16>
    %cst_79 = arith.constant dense<0.000000e+00> : vector<16x128xf32>
    %138 = tpu.matmul %70, %137, %cst_79 {dimension_numbers = #tpu.dot_dimension_numbers<[1], [0], [0], [1], [0, 0, 1, 1], [], []>} : vector<16x128xbf16>, vector<128x128xbf16>, vector<16x128xf32> -> vector<16x128xf32>
    %c8_80 = arith.constant 8 : index
    %c0_81 = arith.constant 0 : index
    %c0_82 = arith.constant 0 : index
    %139 = vector.load %arg3[%c8_80, %c0_81, %c0_82] : memref<9x16x16xbf16, #tpu.memory_space<vmem>>, vector<1x16x16xbf16>
    %140 = vector.shape_cast %139 : vector<1x16x16xbf16> to vector<16x16xbf16>
    %141 = arith.truncf %138 : vector<16x128xf32> to vector<16x128xbf16>
    %cst_83 = arith.constant dense<0.000000e+00> : vector<16x128xf32>
    %142 = tpu.matmul %140, %141, %cst_83 {dimension_numbers = #tpu.dot_dimension_numbers<[1], [0], [0], [1], [0, 0, 1, 1], [], []>} : vector<16x16xbf16>, vector<16x128xbf16>, vector<16x128xf32> -> vector<16x128xf32>
    %143 = arith.addf %135, %142 : vector<16x128xf32>
    %144 = tpu.iota {dimensions = array<i32: 1>} : vector<16x128xi32>
    %cst_84 = arith.constant 0.000000e+00 : f32
    %145 = vector.broadcast %cst_84 : f32 to vector<16x128xf32>
    %cst_85 = arith.constant 0.000000e+00 : f32
    %146 = vector.broadcast %cst_85 : f32 to vector<16x128xf32>
    %c0_i32_86 = arith.constant 0 : i32
    %147 = vector.broadcast %c0_i32_86 : i32 to vector<16x128xi32>
    %148 = arith.cmpi sge, %144, %147 : vector<16x128xi32>
    %c64_i32_87 = arith.constant 64 : i32
    %149 = vector.broadcast %c64_i32_87 : i32 to vector<16x128xi32>
    %150 = arith.cmpi slt, %144, %149 : vector<16x128xi32>
    %151 = arith.andi %148, %150 : vector<16x128xi1>
    %152 = arith.extui %151 : vector<16x128xi1> to vector<16x128xi32>
    %153 = arith.sitofp %152 : vector<16x128xi32> to vector<16x128xf32>
    %154 = arith.mulf %143, %153 : vector<16x128xf32>
    %cst_88 = arith.constant dense<0.000000e+00> : vector<16xf32>
    %155 = vector.multi_reduction <add>, %154, %cst_88 [1] : vector<16x128xf32> to vector<16xf32>
    %156 = vector.shape_cast %155 : vector<16xf32> to vector<16x1xf32>
    %157 = arith.mulf %154, %154 : vector<16x128xf32>
    %cst_89 = arith.constant dense<0.000000e+00> : vector<16xf32>
    %158 = vector.multi_reduction <add>, %157, %cst_89 [1] : vector<16x128xf32> to vector<16xf32>
    %159 = vector.shape_cast %158 : vector<16xf32> to vector<16x1xf32>
    %cst_90 = arith.constant 1.562500e-02 : f32
    %160 = vector.broadcast %cst_90 : f32 to vector<16x1xf32>
    %161 = arith.mulf %156, %160 : vector<16x1xf32>
    %cst_91 = arith.constant 1.562500e-02 : f32
    %162 = vector.broadcast %cst_91 : f32 to vector<16x1xf32>
    %163 = arith.mulf %159, %162 : vector<16x1xf32>
    %164 = arith.mulf %161, %161 : vector<16x1xf32>
    %165 = arith.subf %163, %164 : vector<16x1xf32>
    %cst_92 = arith.constant 0.000000e+00 : f32
    %166 = vector.broadcast %cst_92 : f32 to vector<16x1xf32>
    %167 = arith.maximumf %165, %166 : vector<16x1xf32>
    %168 = vector.broadcast %161 : vector<16x1xf32> to vector<16x128xf32>
    %169 = arith.mulf %168, %153 : vector<16x128xf32>
    %170 = arith.addf %145, %169 : vector<16x128xf32>
    %cst_93 = arith.constant 9.99999974E-6 : f32
    %171 = vector.broadcast %cst_93 : f32 to vector<16x1xf32>
    %172 = arith.addf %167, %171 : vector<16x1xf32>
    %173 = math.rsqrt %172 : vector<16x1xf32>
    %174 = vector.broadcast %173 : vector<16x1xf32> to vector<16x128xf32>
    %175 = arith.mulf %174, %153 : vector<16x128xf32>
    %176 = arith.addf %146, %175 : vector<16x128xf32>
    %c64_i32_94 = arith.constant 64 : i32
    %177 = vector.broadcast %c64_i32_94 : i32 to vector<16x128xi32>
    %178 = arith.cmpi sge, %144, %177 : vector<16x128xi32>
    %c128_i32_95 = arith.constant 128 : i32
    %179 = vector.broadcast %c128_i32_95 : i32 to vector<16x128xi32>
    %180 = arith.cmpi slt, %144, %179 : vector<16x128xi32>
    %181 = arith.andi %178, %180 : vector<16x128xi1>
    %182 = arith.extui %181 : vector<16x128xi1> to vector<16x128xi32>
    %183 = arith.sitofp %182 : vector<16x128xi32> to vector<16x128xf32>
    %184 = arith.mulf %143, %183 : vector<16x128xf32>
    %cst_96 = arith.constant dense<0.000000e+00> : vector<16xf32>
    %185 = vector.multi_reduction <add>, %184, %cst_96 [1] : vector<16x128xf32> to vector<16xf32>
    %186 = vector.shape_cast %185 : vector<16xf32> to vector<16x1xf32>
    %187 = arith.mulf %184, %184 : vector<16x128xf32>
    %cst_97 = arith.constant dense<0.000000e+00> : vector<16xf32>
    %188 = vector.multi_reduction <add>, %187, %cst_97 [1] : vector<16x128xf32> to vector<16xf32>
    %189 = vector.shape_cast %188 : vector<16xf32> to vector<16x1xf32>
    %cst_98 = arith.constant 1.562500e-02 : f32
    %190 = vector.broadcast %cst_98 : f32 to vector<16x1xf32>
    %191 = arith.mulf %186, %190 : vector<16x1xf32>
    %cst_99 = arith.constant 1.562500e-02 : f32
    %192 = vector.broadcast %cst_99 : f32 to vector<16x1xf32>
    %193 = arith.mulf %189, %192 : vector<16x1xf32>
    %194 = arith.mulf %191, %191 : vector<16x1xf32>
    %195 = arith.subf %193, %194 : vector<16x1xf32>
    %cst_100 = arith.constant 0.000000e+00 : f32
    %196 = vector.broadcast %cst_100 : f32 to vector<16x1xf32>
    %197 = arith.maximumf %195, %196 : vector<16x1xf32>
    %198 = vector.broadcast %191 : vector<16x1xf32> to vector<16x128xf32>
    %199 = arith.mulf %198, %183 : vector<16x128xf32>
    %200 = arith.addf %170, %199 : vector<16x128xf32>
    %cst_101 = arith.constant 9.99999974E-6 : f32
    %201 = vector.broadcast %cst_101 : f32 to vector<16x1xf32>
    %202 = arith.addf %197, %201 : vector<16x1xf32>
    %203 = math.rsqrt %202 : vector<16x1xf32>
    %204 = vector.broadcast %203 : vector<16x1xf32> to vector<16x128xf32>
    %205 = arith.mulf %204, %183 : vector<16x128xf32>
    %206 = arith.addf %176, %205 : vector<16x128xf32>
    %207 = arith.subf %143, %200 : vector<16x128xf32>
    %208 = arith.mulf %207, %206 : vector<16x128xf32>
    %cst_102 = arith.constant 0.000000e+00 : f32
    %209 = vector.broadcast %cst_102 : f32 to vector<16x128xf32>
    %210 = arith.maximumf %208, %209 : vector<16x128xf32>
    %211 = arith.truncf %210 : vector<16x128xf32> to vector<16x128xbf16>
    %cst_103 = arith.constant 0.000000e+00 : f32
    %212 = vector.broadcast %cst_103 : f32 to vector<16x128xf32>
    %c0_104 = arith.constant 0 : index
    %c0_105 = arith.constant 0 : index
    %c0_106 = arith.constant 0 : index
    %213 = vector.load %arg5[%c0_104, %c0_105, %c0_106] : memref<9x128x128xbf16, #tpu.memory_space<vmem>>, vector<1x128x128xbf16>
    %214 = vector.shape_cast %213 : vector<1x128x128xbf16> to vector<128x128xbf16>
    %cst_107 = arith.constant dense<0.000000e+00> : vector<16x128xf32>
    %215 = tpu.matmul %211, %214, %cst_107 {dimension_numbers = #tpu.dot_dimension_numbers<[1], [0], [0], [1], [0, 0, 1, 1], [], []>} : vector<16x128xbf16>, vector<128x128xbf16>, vector<16x128xf32> -> vector<16x128xf32>
    %c0_108 = arith.constant 0 : index
    %c0_109 = arith.constant 0 : index
    %c0_110 = arith.constant 0 : index
    %216 = vector.load %arg4[%c0_108, %c0_109, %c0_110] : memref<9x16x16xbf16, #tpu.memory_space<vmem>>, vector<1x16x16xbf16>
    %217 = vector.shape_cast %216 : vector<1x16x16xbf16> to vector<16x16xbf16>
    %218 = arith.truncf %215 : vector<16x128xf32> to vector<16x128xbf16>
    %cst_111 = arith.constant dense<0.000000e+00> : vector<16x128xf32>
    %219 = tpu.matmul %217, %218, %cst_111 {dimension_numbers = #tpu.dot_dimension_numbers<[1], [0], [0], [1], [0, 0, 1, 1], [], []>} : vector<16x16xbf16>, vector<16x128xbf16>, vector<16x128xf32> -> vector<16x128xf32>
    %220 = arith.addf %212, %219 : vector<16x128xf32>
    %c1_112 = arith.constant 1 : index
    %c0_113 = arith.constant 0 : index
    %c0_114 = arith.constant 0 : index
    %221 = vector.load %arg5[%c1_112, %c0_113, %c0_114] : memref<9x128x128xbf16, #tpu.memory_space<vmem>>, vector<1x128x128xbf16>
    %222 = vector.shape_cast %221 : vector<1x128x128xbf16> to vector<128x128xbf16>
    %cst_115 = arith.constant dense<0.000000e+00> : vector<16x128xf32>
    %223 = tpu.matmul %211, %222, %cst_115 {dimension_numbers = #tpu.dot_dimension_numbers<[1], [0], [0], [1], [0, 0, 1, 1], [], []>} : vector<16x128xbf16>, vector<128x128xbf16>, vector<16x128xf32> -> vector<16x128xf32>
    %c1_116 = arith.constant 1 : index
    %c0_117 = arith.constant 0 : index
    %c0_118 = arith.constant 0 : index
    %224 = vector.load %arg4[%c1_116, %c0_117, %c0_118] : memref<9x16x16xbf16, #tpu.memory_space<vmem>>, vector<1x16x16xbf16>
    %225 = vector.shape_cast %224 : vector<1x16x16xbf16> to vector<16x16xbf16>
    %226 = arith.truncf %223 : vector<16x128xf32> to vector<16x128xbf16>
    %cst_119 = arith.constant dense<0.000000e+00> : vector<16x128xf32>
    %227 = tpu.matmul %225, %226, %cst_119 {dimension_numbers = #tpu.dot_dimension_numbers<[1], [0], [0], [1], [0, 0, 1, 1], [], []>} : vector<16x16xbf16>, vector<16x128xbf16>, vector<16x128xf32> -> vector<16x128xf32>
    %228 = arith.addf %220, %227 : vector<16x128xf32>
    %c2_120 = arith.constant 2 : index
    %c0_121 = arith.constant 0 : index
    %c0_122 = arith.constant 0 : index
    %229 = vector.load %arg5[%c2_120, %c0_121, %c0_122] : memref<9x128x128xbf16, #tpu.memory_space<vmem>>, vector<1x128x128xbf16>
    %230 = vector.shape_cast %229 : vector<1x128x128xbf16> to vector<128x128xbf16>
    %cst_123 = arith.constant dense<0.000000e+00> : vector<16x128xf32>
    %231 = tpu.matmul %211, %230, %cst_123 {dimension_numbers = #tpu.dot_dimension_numbers<[1], [0], [0], [1], [0, 0, 1, 1], [], []>} : vector<16x128xbf16>, vector<128x128xbf16>, vector<16x128xf32> -> vector<16x128xf32>
    %c2_124 = arith.constant 2 : index
    %c0_125 = arith.constant 0 : index
    %c0_126 = arith.constant 0 : index
    %232 = vector.load %arg4[%c2_124, %c0_125, %c0_126] : memref<9x16x16xbf16, #tpu.memory_space<vmem>>, vector<1x16x16xbf16>
    %233 = vector.shape_cast %232 : vector<1x16x16xbf16> to vector<16x16xbf16>
    %234 = arith.truncf %231 : vector<16x128xf32> to vector<16x128xbf16>
    %cst_127 = arith.constant dense<0.000000e+00> : vector<16x128xf32>
    %235 = tpu.matmul %233, %234, %cst_127 {dimension_numbers = #tpu.dot_dimension_numbers<[1], [0], [0], [1], [0, 0, 1, 1], [], []>} : vector<16x16xbf16>, vector<16x128xbf16>, vector<16x128xf32> -> vector<16x128xf32>
    %236 = arith.addf %228, %235 : vector<16x128xf32>
    %c3_128 = arith.constant 3 : index
    %c0_129 = arith.constant 0 : index
    %c0_130 = arith.constant 0 : index
    %237 = vector.load %arg5[%c3_128, %c0_129, %c0_130] : memref<9x128x128xbf16, #tpu.memory_space<vmem>>, vector<1x128x128xbf16>
    %238 = vector.shape_cast %237 : vector<1x128x128xbf16> to vector<128x128xbf16>
    %cst_131 = arith.constant dense<0.000000e+00> : vector<16x128xf32>
    %239 = tpu.matmul %211, %238, %cst_131 {dimension_numbers = #tpu.dot_dimension_numbers<[1], [0], [0], [1], [0, 0, 1, 1], [], []>} : vector<16x128xbf16>, vector<128x128xbf16>, vector<16x128xf32> -> vector<16x128xf32>
    %c3_132 = arith.constant 3 : index
    %c0_133 = arith.constant 0 : index
    %c0_134 = arith.constant 0 : index
    %240 = vector.load %arg4[%c3_132, %c0_133, %c0_134] : memref<9x16x16xbf16, #tpu.memory_space<vmem>>, vector<1x16x16xbf16>
    %241 = vector.shape_cast %240 : vector<1x16x16xbf16> to vector<16x16xbf16>
    %242 = arith.truncf %239 : vector<16x128xf32> to vector<16x128xbf16>
    %cst_135 = arith.constant dense<0.000000e+00> : vector<16x128xf32>
    %243 = tpu.matmul %241, %242, %cst_135 {dimension_numbers = #tpu.dot_dimension_numbers<[1], [0], [0], [1], [0, 0, 1, 1], [], []>} : vector<16x16xbf16>, vector<16x128xbf16>, vector<16x128xf32> -> vector<16x128xf32>
    %244 = arith.addf %236, %243 : vector<16x128xf32>
    %c4_136 = arith.constant 4 : index
    %c0_137 = arith.constant 0 : index
    %c0_138 = arith.constant 0 : index
    %245 = vector.load %arg5[%c4_136, %c0_137, %c0_138] : memref<9x128x128xbf16, #tpu.memory_space<vmem>>, vector<1x128x128xbf16>
    %246 = vector.shape_cast %245 : vector<1x128x128xbf16> to vector<128x128xbf16>
    %cst_139 = arith.constant dense<0.000000e+00> : vector<16x128xf32>
    %247 = tpu.matmul %211, %246, %cst_139 {dimension_numbers = #tpu.dot_dimension_numbers<[1], [0], [0], [1], [0, 0, 1, 1], [], []>} : vector<16x128xbf16>, vector<128x128xbf16>, vector<16x128xf32> -> vector<16x128xf32>
    %c4_140 = arith.constant 4 : index
    %c0_141 = arith.constant 0 : index
    %c0_142 = arith.constant 0 : index
    %248 = vector.load %arg4[%c4_140, %c0_141, %c0_142] : memref<9x16x16xbf16, #tpu.memory_space<vmem>>, vector<1x16x16xbf16>
    %249 = vector.shape_cast %248 : vector<1x16x16xbf16> to vector<16x16xbf16>
    %250 = arith.truncf %247 : vector<16x128xf32> to vector<16x128xbf16>
    %cst_143 = arith.constant dense<0.000000e+00> : vector<16x128xf32>
    %251 = tpu.matmul %249, %250, %cst_143 {dimension_numbers = #tpu.dot_dimension_numbers<[1], [0], [0], [1], [0, 0, 1, 1], [], []>} : vector<16x16xbf16>, vector<16x128xbf16>, vector<16x128xf32> -> vector<16x128xf32>
    %252 = arith.addf %244, %251 : vector<16x128xf32>
    %c5_144 = arith.constant 5 : index
    %c0_145 = arith.constant 0 : index
    %c0_146 = arith.constant 0 : index
    %253 = vector.load %arg5[%c5_144, %c0_145, %c0_146] : memref<9x128x128xbf16, #tpu.memory_space<vmem>>, vector<1x128x128xbf16>
    %254 = vector.shape_cast %253 : vector<1x128x128xbf16> to vector<128x128xbf16>
    %cst_147 = arith.constant dense<0.000000e+00> : vector<16x128xf32>
    %255 = tpu.matmul %211, %254, %cst_147 {dimension_numbers = #tpu.dot_dimension_numbers<[1], [0], [0], [1], [0, 0, 1, 1], [], []>} : vector<16x128xbf16>, vector<128x128xbf16>, vector<16x128xf32> -> vector<16x128xf32>
    %c5_148 = arith.constant 5 : index
    %c0_149 = arith.constant 0 : index
    %c0_150 = arith.constant 0 : index
    %256 = vector.load %arg4[%c5_148, %c0_149, %c0_150] : memref<9x16x16xbf16, #tpu.memory_space<vmem>>, vector<1x16x16xbf16>
    %257 = vector.shape_cast %256 : vector<1x16x16xbf16> to vector<16x16xbf16>
    %258 = arith.truncf %255 : vector<16x128xf32> to vector<16x128xbf16>
    %cst_151 = arith.constant dense<0.000000e+00> : vector<16x128xf32>
    %259 = tpu.matmul %257, %258, %cst_151 {dimension_numbers = #tpu.dot_dimension_numbers<[1], [0], [0], [1], [0, 0, 1, 1], [], []>} : vector<16x16xbf16>, vector<16x128xbf16>, vector<16x128xf32> -> vector<16x128xf32>
    %260 = arith.addf %252, %259 : vector<16x128xf32>
    %c6_152 = arith.constant 6 : index
    %c0_153 = arith.constant 0 : index
    %c0_154 = arith.constant 0 : index
    %261 = vector.load %arg5[%c6_152, %c0_153, %c0_154] : memref<9x128x128xbf16, #tpu.memory_space<vmem>>, vector<1x128x128xbf16>
    %262 = vector.shape_cast %261 : vector<1x128x128xbf16> to vector<128x128xbf16>
    %cst_155 = arith.constant dense<0.000000e+00> : vector<16x128xf32>
    %263 = tpu.matmul %211, %262, %cst_155 {dimension_numbers = #tpu.dot_dimension_numbers<[1], [0], [0], [1], [0, 0, 1, 1], [], []>} : vector<16x128xbf16>, vector<128x128xbf16>, vector<16x128xf32> -> vector<16x128xf32>
    %c6_156 = arith.constant 6 : index
    %c0_157 = arith.constant 0 : index
    %c0_158 = arith.constant 0 : index
    %264 = vector.load %arg4[%c6_156, %c0_157, %c0_158] : memref<9x16x16xbf16, #tpu.memory_space<vmem>>, vector<1x16x16xbf16>
    %265 = vector.shape_cast %264 : vector<1x16x16xbf16> to vector<16x16xbf16>
    %266 = arith.truncf %263 : vector<16x128xf32> to vector<16x128xbf16>
    %cst_159 = arith.constant dense<0.000000e+00> : vector<16x128xf32>
    %267 = tpu.matmul %265, %266, %cst_159 {dimension_numbers = #tpu.dot_dimension_numbers<[1], [0], [0], [1], [0, 0, 1, 1], [], []>} : vector<16x16xbf16>, vector<16x128xbf16>, vector<16x128xf32> -> vector<16x128xf32>
    %268 = arith.addf %260, %267 : vector<16x128xf32>
    %c7_160 = arith.constant 7 : index
    %c0_161 = arith.constant 0 : index
    %c0_162 = arith.constant 0 : index
    %269 = vector.load %arg5[%c7_160, %c0_161, %c0_162] : memref<9x128x128xbf16, #tpu.memory_space<vmem>>, vector<1x128x128xbf16>
    %270 = vector.shape_cast %269 : vector<1x128x128xbf16> to vector<128x128xbf16>
    %cst_163 = arith.constant dense<0.000000e+00> : vector<16x128xf32>
    %271 = tpu.matmul %211, %270, %cst_163 {dimension_numbers = #tpu.dot_dimension_numbers<[1], [0], [0], [1], [0, 0, 1, 1], [], []>} : vector<16x128xbf16>, vector<128x128xbf16>, vector<16x128xf32> -> vector<16x128xf32>
    %c7_164 = arith.constant 7 : index
    %c0_165 = arith.constant 0 : index
    %c0_166 = arith.constant 0 : index
    %272 = vector.load %arg4[%c7_164, %c0_165, %c0_166] : memref<9x16x16xbf16, #tpu.memory_space<vmem>>, vector<1x16x16xbf16>
    %273 = vector.shape_cast %272 : vector<1x16x16xbf16> to vector<16x16xbf16>
    %274 = arith.truncf %271 : vector<16x128xf32> to vector<16x128xbf16>
    %cst_167 = arith.constant dense<0.000000e+00> : vector<16x128xf32>
    %275 = tpu.matmul %273, %274, %cst_167 {dimension_numbers = #tpu.dot_dimension_numbers<[1], [0], [0], [1], [0, 0, 1, 1], [], []>} : vector<16x16xbf16>, vector<16x128xbf16>, vector<16x128xf32> -> vector<16x128xf32>
    %276 = arith.addf %268, %275 : vector<16x128xf32>
    %c8_168 = arith.constant 8 : index
    %c0_169 = arith.constant 0 : index
    %c0_170 = arith.constant 0 : index
    %277 = vector.load %arg5[%c8_168, %c0_169, %c0_170] : memref<9x128x128xbf16, #tpu.memory_space<vmem>>, vector<1x128x128xbf16>
    %278 = vector.shape_cast %277 : vector<1x128x128xbf16> to vector<128x128xbf16>
    %cst_171 = arith.constant dense<0.000000e+00> : vector<16x128xf32>
    %279 = tpu.matmul %211, %278, %cst_171 {dimension_numbers = #tpu.dot_dimension_numbers<[1], [0], [0], [1], [0, 0, 1, 1], [], []>} : vector<16x128xbf16>, vector<128x128xbf16>, vector<16x128xf32> -> vector<16x128xf32>
    %c8_172 = arith.constant 8 : index
    %c0_173 = arith.constant 0 : index
    %c0_174 = arith.constant 0 : index
    %280 = vector.load %arg4[%c8_172, %c0_173, %c0_174] : memref<9x16x16xbf16, #tpu.memory_space<vmem>>, vector<1x16x16xbf16>
    %281 = vector.shape_cast %280 : vector<1x16x16xbf16> to vector<16x16xbf16>
    %282 = arith.truncf %279 : vector<16x128xf32> to vector<16x128xbf16>
    %cst_175 = arith.constant dense<0.000000e+00> : vector<16x128xf32>
    %283 = tpu.matmul %281, %282, %cst_175 {dimension_numbers = #tpu.dot_dimension_numbers<[1], [0], [0], [1], [0, 0, 1, 1], [], []>} : vector<16x16xbf16>, vector<16x128xbf16>, vector<16x128xf32> -> vector<16x128xf32>
    %284 = arith.addf %276, %283 : vector<16x128xf32>
    %285 = tpu.iota {dimensions = array<i32: 1>} : vector<16x128xi32>
    %cst_176 = arith.constant 0.000000e+00 : f32
    %286 = vector.broadcast %cst_176 : f32 to vector<16x128xf32>
    %cst_177 = arith.constant 0.000000e+00 : f32
    %287 = vector.broadcast %cst_177 : f32 to vector<16x128xf32>
    %c0_i32_178 = arith.constant 0 : i32
    %288 = vector.broadcast %c0_i32_178 : i32 to vector<16x128xi32>
    %289 = arith.cmpi sge, %285, %288 : vector<16x128xi32>
    %c64_i32_179 = arith.constant 64 : i32
    %290 = vector.broadcast %c64_i32_179 : i32 to vector<16x128xi32>
    %291 = arith.cmpi slt, %285, %290 : vector<16x128xi32>
    %292 = arith.andi %289, %291 : vector<16x128xi1>
    %293 = arith.extui %292 : vector<16x128xi1> to vector<16x128xi32>
    %294 = arith.sitofp %293 : vector<16x128xi32> to vector<16x128xf32>
    %295 = arith.mulf %284, %294 : vector<16x128xf32>
    %cst_180 = arith.constant dense<0.000000e+00> : vector<16xf32>
    %296 = vector.multi_reduction <add>, %295, %cst_180 [1] : vector<16x128xf32> to vector<16xf32>
    %297 = vector.shape_cast %296 : vector<16xf32> to vector<16x1xf32>
    %298 = arith.mulf %295, %295 : vector<16x128xf32>
    %cst_181 = arith.constant dense<0.000000e+00> : vector<16xf32>
    %299 = vector.multi_reduction <add>, %298, %cst_181 [1] : vector<16x128xf32> to vector<16xf32>
    %300 = vector.shape_cast %299 : vector<16xf32> to vector<16x1xf32>
    %cst_182 = arith.constant 1.562500e-02 : f32
    %301 = vector.broadcast %cst_182 : f32 to vector<16x1xf32>
    %302 = arith.mulf %297, %301 : vector<16x1xf32>
    %cst_183 = arith.constant 1.562500e-02 : f32
    %303 = vector.broadcast %cst_183 : f32 to vector<16x1xf32>
    %304 = arith.mulf %300, %303 : vector<16x1xf32>
    %305 = arith.mulf %302, %302 : vector<16x1xf32>
    %306 = arith.subf %304, %305 : vector<16x1xf32>
    %cst_184 = arith.constant 0.000000e+00 : f32
    %307 = vector.broadcast %cst_184 : f32 to vector<16x1xf32>
    %308 = arith.maximumf %306, %307 : vector<16x1xf32>
    %309 = vector.broadcast %302 : vector<16x1xf32> to vector<16x128xf32>
    %310 = arith.mulf %309, %294 : vector<16x128xf32>
    %311 = arith.addf %286, %310 : vector<16x128xf32>
    %cst_185 = arith.constant 9.99999974E-6 : f32
    %312 = vector.broadcast %cst_185 : f32 to vector<16x1xf32>
    %313 = arith.addf %308, %312 : vector<16x1xf32>
    %314 = math.rsqrt %313 : vector<16x1xf32>
    %315 = vector.broadcast %314 : vector<16x1xf32> to vector<16x128xf32>
    %316 = arith.mulf %315, %294 : vector<16x128xf32>
    %317 = arith.addf %287, %316 : vector<16x128xf32>
    %c64_i32_186 = arith.constant 64 : i32
    %318 = vector.broadcast %c64_i32_186 : i32 to vector<16x128xi32>
    %319 = arith.cmpi sge, %285, %318 : vector<16x128xi32>
    %c128_i32_187 = arith.constant 128 : i32
    %320 = vector.broadcast %c128_i32_187 : i32 to vector<16x128xi32>
    %321 = arith.cmpi slt, %285, %320 : vector<16x128xi32>
    %322 = arith.andi %319, %321 : vector<16x128xi1>
    %323 = arith.extui %322 : vector<16x128xi1> to vector<16x128xi32>
    %324 = arith.sitofp %323 : vector<16x128xi32> to vector<16x128xf32>
    %325 = arith.mulf %284, %324 : vector<16x128xf32>
    %cst_188 = arith.constant dense<0.000000e+00> : vector<16xf32>
    %326 = vector.multi_reduction <add>, %325, %cst_188 [1] : vector<16x128xf32> to vector<16xf32>
    %327 = vector.shape_cast %326 : vector<16xf32> to vector<16x1xf32>
    %328 = arith.mulf %325, %325 : vector<16x128xf32>
    %cst_189 = arith.constant dense<0.000000e+00> : vector<16xf32>
    %329 = vector.multi_reduction <add>, %328, %cst_189 [1] : vector<16x128xf32> to vector<16xf32>
    %330 = vector.shape_cast %329 : vector<16xf32> to vector<16x1xf32>
    %cst_190 = arith.constant 1.562500e-02 : f32
    %331 = vector.broadcast %cst_190 : f32 to vector<16x1xf32>
    %332 = arith.mulf %327, %331 : vector<16x1xf32>
    %cst_191 = arith.constant 1.562500e-02 : f32
    %333 = vector.broadcast %cst_191 : f32 to vector<16x1xf32>
    %334 = arith.mulf %330, %333 : vector<16x1xf32>
    %335 = arith.mulf %332, %332 : vector<16x1xf32>
    %336 = arith.subf %334, %335 : vector<16x1xf32>
    %cst_192 = arith.constant 0.000000e+00 : f32
    %337 = vector.broadcast %cst_192 : f32 to vector<16x1xf32>
    %338 = arith.maximumf %336, %337 : vector<16x1xf32>
    %339 = vector.broadcast %332 : vector<16x1xf32> to vector<16x128xf32>
    %340 = arith.mulf %339, %324 : vector<16x128xf32>
    %341 = arith.addf %311, %340 : vector<16x128xf32>
    %cst_193 = arith.constant 9.99999974E-6 : f32
    %342 = vector.broadcast %cst_193 : f32 to vector<16x1xf32>
    %343 = arith.addf %338, %342 : vector<16x1xf32>
    %344 = math.rsqrt %343 : vector<16x1xf32>
    %345 = vector.broadcast %344 : vector<16x1xf32> to vector<16x128xf32>
    %346 = arith.mulf %345, %324 : vector<16x128xf32>
    %347 = arith.addf %317, %346 : vector<16x128xf32>
    %348 = arith.subf %284, %341 : vector<16x128xf32>
    %349 = arith.mulf %348, %347 : vector<16x128xf32>
    %350 = arith.addf %349, %69 : vector<16x128xf32>
    %c0_194 = arith.constant 0 : index
    %c0_195 = arith.constant 0 : index
    %351 = vector.load %arg6[%c0_194, %c0_195] : memref<16x128xf32, #tpu.memory_space<vmem>>, vector<16x128xf32>
    tpu.vector_store %arg6[%c0_194, %c0_195], %350 {strides = array<i32>} : memref<16x128xf32, #tpu.memory_space<vmem>>, vector<16x128xf32>,
    return
  }
  func.func @transform_0(%arg0: i32) -> (i32, i32) {
    %c0_i32 = arith.constant 0 : i32
    %c0_i32_0 = arith.constant 0 : i32
    %c0_i32_1 = arith.constant 0 : i32
    return %c0_i32, %c0_i32_0 : i32, i32
  }
  func.func @transform_1(%arg0: i32) -> (i32, i32) {
    %c0_i32 = arith.constant 0 : i32
    %c0_i32_0 = arith.constant 0 : i32
    %c0_i32_1 = arith.constant 0 : i32
    return %c0_i32, %c0_i32_0 : i32, i32
  }
  func.func @transform_2(%arg0: i32) -> (i32, i32, i32) {
    %c0_i32 = arith.constant 0 : i32
    %c0_i32_0 = arith.constant 0 : i32
    %c0_i32_1 = arith.constant 0 : i32
    %c0_i32_2 = arith.constant 0 : i32
    return %c0_i32, %c0_i32_0, %c0_i32_1 : i32, i32, i32
  }
  func.func @transform_3(%arg0: i32) -> (i32, i32, i32) {
    %c0_i32 = arith.constant 0 : i32
    %c0_i32_0 = arith.constant 0 : i32
    %c0_i32_1 = arith.constant 0 : i32
    %c0_i32_2 = arith.constant 0 : i32
    return %c0_i32, %c0_i32_0, %c0_i32_1 : i32, i32, i32
  }
  func.func @transform_4(%arg0: i32) -> (i32, i32, i32) {
    %c0_i32 = arith.constant 0 : i32
    %c0_i32_0 = arith.constant 0 : i32
    %c0_i32_1 = arith.constant 0 : i32
    %c0_i32_2 = arith.constant 0 : i32
    return %c0_i32, %c0_i32_0, %c0_i32_1 : i32, i32, i32
  }
  func.func @transform_5(%arg0: i32) -> (i32, i32) {
    %c0_i32 = arith.constant 0 : i32
    %c0_i32_0 = arith.constant 0 : i32
    %c0_i32_1 = arith.constant 0 : i32
    return %c0_i32, %c0_i32_0 : i32, i32
  }
}

</mosaic_0001>

<bundles_post_ra>
// kernel: content_encoder_forward.2
= control target key start
LH: loop header
LB: loop body
LE: loop exit
PB: predicated region body
PF: predicated region fallthrough
CT: control target
= control target key end

     0   :  { %s1064_s0 = inlined_call_operand.vmem [shape: bf16[256,512], index: 0, kind: input, shape index: {}]   ;;  %s1065_s1 = inlined_call_operand.vmem [shape: bf16[8,256], index: 1, kind: input, shape index: {}]   ;;  %s1066_s2 = inlined_call_operand.vmem [shape: bf16[2,8,256], index: 2, kind: output, shape index: {}]  }
   0x1   :  { %v718_v0 = vld [vmem:[%s1064_s0 + $0xe4] ss:$16 sps:$4 sm:$0xff]   ;;  %v720_v1 = vld [vmem:[%s1064_s0 + $0xec] ss:$16 sps:$4 sm:$0xff]   ;;  %v722_v2 = vld [vmem:[%s1064_s0 + $0xe0] ss:$16 sps:$4 sm:$0xff]  }
   0x2   :  { %403 = vmatprep.subr.bf16.mxu0 %v718_v0  ;;  %v723_v3 = vld [vmem:[%s1064_s0 + $0xe8] ss:$16 sps:$4 sm:$0xff]   ;;  %444 = vmatprep.subr.bf16.mxu1 %v720_v1  ;;  %v724_v4 = vld [vmem:[%s1064_s0 + $0xc4] ss:$16 sps:$4 sm:$0xff]   ;;  %v726_v5 = vld [vmem:[%s1064_s0 + $0xcc] ss:$16 sps:$4 sm:$0xff]  }
   0x3   :  { %404 = vmatpush1.bf16.msra.mxu0 %v722_v2  ;;  %445 = vmatpush1.bf16.msra.mxu1 %v723_v3  ;;  %v728_v6 = vld [vmem:[%s1064_s0 + $0xc0] ss:$16 sps:$4 sm:$0xff]   ;;  %v729_v7 = vld [vmem:[%s1064_s0 + $0xc8] ss:$16 sps:$4 sm:$0xff]   ;;  %v730_v8 = vld [vmem:[%s1064_s0 + $0xa4] ss:$16 sps:$4 sm:$0xff]  }
   0x4   :  { %405 = vmatprep.subr.bf16.mxu0 %v724_v4  ;;  %446 = vmatprep.subr.bf16.mxu1 %v726_v5  ;;  %v732_v9 = vld [vmem:[%s1064_s0 + $0xac] ss:$16 sps:$4 sm:$0xff]   ;;  %v734_v10 = vld [vmem:[%s1064_s0 + $0xa0] ss:$16 sps:$4 sm:$0xff]   ;;  %v735_v11 = vld [vmem:[%s1064_s0 + $0xa8] ss:$16 sps:$4 sm:$0xff]  }
   0x5   :  { %v736_v12 = vld [vmem:[%s1064_s0 + $0x84] ss:$16 sps:$4 sm:$0xff]   ;;  %v738_v13 = vld [vmem:[%s1064_s0 + $0x8c] ss:$16 sps:$4 sm:$0xff]   ;;  %v740_v14 = vld [vmem:[%s1064_s0 + $0x80] ss:$16 sps:$4 sm:$0xff]  }
   0x6   :  { %v741_v15 = vld [vmem:[%s1064_s0 + $0x88] ss:$16 sps:$4 sm:$0xff]   ;;  %v742_v16 = vld [vmem:[%s1064_s0 + $0x64] ss:$16 sps:$4 sm:$0xff]   ;;  %v744_v17 = vld [vmem:[%s1064_s0 + $0x6c] ss:$16 sps:$4 sm:$0xff]  }
   0x7   :  { %406 = vmatpush1.bf16.msra.mxu0 %v728_v6  ;;  %447 = vmatpush1.bf16.msra.mxu1 %v729_v7  ;;  %v746_v18 = vld [vmem:[%s1064_s0 + $0x60] ss:$16 sps:$4 sm:$0xff]   ;;  %v747_v19 = vld [vmem:[%s1064_s0 + $0x68] ss:$16 sps:$4 sm:$0xff]   ;;  %v748_v20 = vld [vmem:[%s1064_s0 + $0x44] ss:$16 sps:$4 sm:$0xff]  }
   0x8   :  { %407 = vmatprep.subr.bf16.mxu0 %v730_v8  ;;  %448 = vmatprep.subr.bf16.mxu1 %v732_v9  ;;  %v750_v21 = vld [vmem:[%s1064_s0 + $0x4c] ss:$16 sps:$4 sm:$0xff]   ;;  %v752_v22 = vld [vmem:[%s1064_s0 + $0x40] ss:$16 sps:$4 sm:$0xff]   ;;  %v753_v23 = vld [vmem:[%s1064_s0 + $0x48] ss:$16 sps:$4 sm:$0xff]  }
   0x9   :  { %v754_v24 = vld [vmem:[%s1064_s0 + $0x24] ss:$16 sps:$4 sm:$0xff]   ;;  %v756_v25 = vld [vmem:[%s1064_s0 + $0x2c] ss:$16 sps:$4 sm:$0xff]   ;;  %v758_v26 = vld [vmem:[%s1064_s0 + $0x20] ss:$16 sps:$4 sm:$0xff]  }
   0xa   :  { %v759_v27 = vld [vmem:[%s1064_s0 + $0x28] ss:$16 sps:$4 sm:$0xff]   ;;  %v760_v28 = vld [vmem:[%s1064_s0 + $0x4] ss:$16 sps:$4 sm:$0xff]   ;;  %v762_v29 = vld [vmem:[%s1064_s0 + $0xc] ss:$16 sps:$4 sm:$0xff]  }
   0xb   :  { %408 = vmatpush1.bf16.msra.mxu0 %v734_v10  ;;  %449 = vmatpush1.bf16.msra.mxu1 %v735_v11  ;;  %v764_v30 = vld [vmem:[%s1064_s0] ss:$16 sps:$4 sm:$0xff]   ;;  %v765_v31 = vld [vmem:[%s1064_s0 + $0x8] ss:$16 sps:$4 sm:$0xff]   ;;  %v766_v32 = vld [vmem:[%s1064_s0 + $0x1e4] ss:$16 sps:$4 sm:$0xff]  }
   0xc   :  { %409 = vmatprep.subr.bf16.mxu0 %v736_v12  ;;  %450 = vmatprep.subr.bf16.mxu1 %v738_v13  ;;  %v768_v33 = vld [vmem:[%s1064_s0 + $0x1ec] ss:$16 sps:$4 sm:$0xff]   ;;  %v770_v34 = vld [vmem:[%s1064_s0 + $0x1e0] ss:$16 sps:$4 sm:$0xff]   ;;  %v771_v35 = vld [vmem:[%s1064_s0 + $0x1e8] ss:$16 sps:$4 sm:$0xff]  }
   0xd   :  { %v772_v36 = vld [vmem:[%s1064_s0 + $0x1c4] ss:$16 sps:$4 sm:$0xff]   ;;  %v774_v37 = vld [vmem:[%s1064_s0 + $0x1cc] ss:$16 sps:$4 sm:$0xff]   ;;  %v776_v38 = vld [vmem:[%s1064_s0 + $0x1c0] ss:$16 sps:$4 sm:$0xff]  }
   0xe   :  { %v777_v39 = vld [vmem:[%s1064_s0 + $0x1c8] ss:$16 sps:$4 sm:$0xff]   ;;  %v778_v40 = vld [vmem:[%s1064_s0 + $0x1a4] ss:$16 sps:$4 sm:$0xff]   ;;  %v780_v41 = vld [vmem:[%s1064_s0 + $0x1ac] ss:$16 sps:$4 sm:$0xff]  }
   0xf   :  { %410 = vmatpush1.bf16.msra.mxu0 %v740_v14  ;;  %451 = vmatpush1.bf16.msra.mxu1 %v741_v15  ;;  %v782_v42 = vld [vmem:[%s1064_s0 + $0x1a0] ss:$16 sps:$4 sm:$0xff]   ;;  %v783_v43 = vld [vmem:[%s1064_s0 + $0x1a8] ss:$16 sps:$4 sm:$0xff]   ;;  %v784_v44 = vld [vmem:[%s1064_s0 + $0x184] ss:$16 sps:$4 sm:$0xff]  }
  0x10   :  { %411 = vmatprep.subr.bf16.mxu0 %v742_v16  ;;  %452 = vmatprep.subr.bf16.mxu1 %v744_v17  ;;  %v786_v45 = vld [vmem:[%s1064_s0 + $0x18c] ss:$16 sps:$4 sm:$0xff]   ;;  %v11_v46 = vld [vmem:[%s1065_s1] sm:$0xff]  ;;  %v789_v49 = vld [vmem:[%s1064_s0 + $0x188] ss:$16 sps:$4 sm:$0xff]  }
  0x11   :  { %v648_v47 = vcombine.high %v11_v46, %v11_v46  ;;  %v788_v48 = vld [vmem:[%s1064_s0 + $0x180] ss:$16 sps:$4 sm:$0xff]   ;;  %v790_v50 = vld [vmem:[%s1064_s0 + $0x164] ss:$16 sps:$4 sm:$0xff]   ;;  %v792_v51 = vld [vmem:[%s1064_s0 + $0x16c] ss:$16 sps:$4 sm:$0xff]   ;;  %v647_v2 = vcombine.low %v11_v46, %v11_v46 }
  0x12   :  { %v794_v52 = vld [vmem:[%s1064_s0 + $0x160] ss:$16 sps:$4 sm:$0xff]   ;;  %v795_v53 = vld [vmem:[%s1064_s0 + $0x168] ss:$16 sps:$4 sm:$0xff]   ;;  %v796_v54 = vld [vmem:[%s1064_s0 + $0x144] ss:$16 sps:$4 sm:$0xff]  }
  0x13   :  { %412 = vmatpush1.bf16.msra.mxu0 %v746_v18  ;;  %453 = vmatpush1.bf16.msra.mxu1 %v747_v19  ;;  %v798_v55 = vld [vmem:[%s1064_s0 + $0x14c] ss:$16 sps:$4 sm:$0xff]   ;;  %v800_v56 = vld [vmem:[%s1064_s0 + $0x140] ss:$16 sps:$4 sm:$0xff]   ;;  %v801_v57 = vld [vmem:[%s1064_s0 + $0x148] ss:$16 sps:$4 sm:$0xff]  }
  0x14   :  { %413 = vmatprep.subr.bf16.mxu0 %v748_v20  ;;  %454 = vmatprep.subr.bf16.mxu1 %v750_v21  ;;  %v802_v58 = vld [vmem:[%s1064_s0 + $0x124] ss:$16 sps:$4 sm:$0xff]   ;;  %v804_v59 = vld [vmem:[%s1064_s0 + $0x12c] ss:$16 sps:$4 sm:$0xff]   ;;  %v806_v60 = vld [vmem:[%s1064_s0 + $0x120] ss:$16 sps:$4 sm:$0xff]  }
  0x15   :  { %435 = vmatprep.mubr.bf16.mxu0 %v648_v47  ;;  %476 = vmatprep.mubr.bf16.mxu1 %v648_v47  ;;  %v807_v61 = vld [vmem:[%s1064_s0 + $0x128] ss:$16 sps:$4 sm:$0xff]   ;;  %v808_v62 = vld [vmem:[%s1064_s0 + $0x104] ss:$16 sps:$4 sm:$0xff]   ;;  %v810_v63 = vld [vmem:[%s1064_s0 + $0x10c] ss:$16 sps:$4 sm:$0xff]  }
  0x16   :  { %v812_v0 = vld [vmem:[%s1064_s0 + $0x100] ss:$16 sps:$4 sm:$0xff]   ;;  %v813_v1 = vld [vmem:[%s1064_s0 + $0x108] ss:$16 sps:$4 sm:$0xff]  }
  0x17   :  { %414 = vmatpush1.bf16.msra.mxu0 %v752_v22  ;;  %455 = vmatpush1.bf16.msra.mxu1 %v753_v23 }
  0x18   :  { %415 = vmatprep.subr.bf16.mxu0 %v754_v24  ;;  %456 = vmatprep.subr.bf16.mxu1 %v756_v25 }
  0x1b   :  { %416 = vmatpush1.bf16.msra.mxu0 %v758_v26  ;;  %457 = vmatpush1.bf16.msra.mxu1 %v759_v27 }
  0x1c   :  { %417 = vmatprep.subr.bf16.mxu0 %v760_v28  ;;  %458 = vmatprep.subr.bf16.mxu1 %v762_v29 }
  0x1f   :  { %418 = vmatpush1.bf16.msra.mxu0 %v764_v30  ;;  %459 = vmatpush1.bf16.msra.mxu1 %v765_v31 }
  0x20   :  { %419 = vmatprep.subr.bf16.mxu0 %v766_v32  ;;  %460 = vmatprep.subr.bf16.mxu1 %v768_v33 }
  0x23   :  { %420 = vmatpush2.bf16.msra.mxu0 %v770_v34  ;;  %461 = vmatpush2.bf16.msra.mxu1 %v771_v35 }
  0x24   :  { %421 = vmatprep.subr.bf16.mxu0 %v772_v36  ;;  %462 = vmatprep.subr.bf16.mxu1 %v774_v37 }
  0x27   :  { %422 = vmatpush2.bf16.msra.mxu0 %v776_v38  ;;  %463 = vmatpush2.bf16.msra.mxu1 %v777_v39 }
  0x28   :  { %423 = vmatprep.subr.bf16.mxu0 %v778_v40  ;;  %464 = vmatprep.subr.bf16.mxu1 %v780_v41 }
  0x2b   :  { %424 = vmatpush2.bf16.msra.mxu0 %v782_v42  ;;  %465 = vmatpush2.bf16.msra.mxu1 %v783_v43 }
  0x2c   :  { %425 = vmatprep.subr.bf16.mxu0 %v784_v44  ;;  %466 = vmatprep.subr.bf16.mxu1 %v786_v45 }
  0x2f   :  { %426 = vmatpush2.bf16.msra.mxu0 %v788_v48  ;;  %467 = vmatpush2.bf16.msra.mxu1 %v789_v49 }
  0x30   :  { %427 = vmatprep.subr.bf16.mxu0 %v790_v50  ;;  %468 = vmatprep.subr.bf16.mxu1 %v792_v51 }
  0x33   :  { %428 = vmatpush2.bf16.msra.mxu0 %v794_v52  ;;  %469 = vmatpush2.bf16.msra.mxu1 %v795_v53 }
  0x34   :  { %429 = vmatprep.subr.bf16.mxu0 %v796_v54  ;;  %470 = vmatprep.subr.bf16.mxu1 %v798_v55 }
  0x37   :  { %430 = vmatpush2.bf16.msra.mxu0 %v800_v56  ;;  %471 = vmatpush2.bf16.msra.mxu1 %v801_v57 }
  0x38   :  { %431 = vmatprep.subr.bf16.mxu0 %v802_v58  ;;  %472 = vmatprep.subr.bf16.mxu1 %v804_v59 }
  0x3b   :  { %432 = vmatpush2.bf16.msra.mxu0 %v806_v60  ;;  %473 = vmatpush2.bf16.msra.mxu1 %v807_v61 }
  0x3c   :  { %433 = vmatprep.subr.bf16.mxu0 %v808_v62  ;;  %474 = vmatprep.subr.bf16.mxu1 %v810_v63 }
  0x3f   :  { %434 = vmatpush2.bf16.msra.mxu0 %v812_v0  ;;  %475 = vmatpush2.bf16.msra.mxu1 %v813_v1 }
  0x42   :  { %436 = vmatmul.mubr.bf16.vlgmr.msra.gmra.mxu0 %v647_v2  ;;  %477 = vmatmul.mubr.bf16.vlgmr.msra.gmra.mxu1 %v647_v2 }
 0x102   :  { %v1030_v3 = vpop.f32.mrf.mxu0  ;;  %v1032_v4 = vpop.f32.mrf.mxu1 }
 0x103   :  { %v512_v5 = vmul.f32 0.0, %v1032_v4  ;;  %v519_v6 = vmul.f32 %v1030_v3, %v1030_v3  ;;  %v571_v7 = vmul.f32 0.0, %v1030_v3  ;;  %v582_v28 = vmul.f32 %v1032_v4, %v1032_v4 }
 0x104   :  { %v1038_v8 = vpop.f32.mrf.mxu0  ;;  %v1040_v9 = vpop.f32.mrf.mxu1 }
 0x105   :  { %v520_v10 = vmul.f32 %v1038_v8, %v1038_v8  ;;  %v572_v11 = vmul.f32 0.0, %v1038_v8  ;;  %v513_v12 = vmul.f32 0.0, %v1040_v9  ;;  %v514_v13 = vadd.f32 %v1038_v8, %v1030_v3 }
 0x106   :  { %v441_v14 = vpop.f32.mrf.mxu0  ;;  %v482_v15 = vpop.f32.mrf.mxu1  ;;  %v521_v16 = vmul.f32 %v512_v5, %v512_v5  ;;  %v580_v22 = vmul.f32 %v571_v7, %v571_v7  ;;  %v583_v33 = vmul.f32 %v1040_v9, %v1040_v9 }
 0x107   :  { %v515_v17 = vadd.f32 %v514_v13, %v512_v5  ;;  %v523_v18 = vadd.f32 %v520_v10, %v519_v6  ;;  %v575_v19 = vadd.f32 %v572_v11, %v571_v7  ;;  %v581_v23 = vmul.f32 %v572_v11, %v572_v11 }
 0x108   :  { %v442_v20 = vpop.f32.mrf.mxu0  ;;  %v483_v21 = vpop.f32.mrf.mxu1  ;;  %v522_v25 = vmul.f32 %v513_v12, %v513_v12 }
 0x109   :  { %v516_v24 = vadd.f32 %v515_v17, %v513_v12  ;;  %v524_v26 = vadd.f32 %v523_v18, %v521_v16  ;;  %v576_v27 = vadd.f32 %v575_v19, %v1032_v4  ;;  %v584_v29 = vadd.f32 %v581_v23, %v580_v22 }
 0x10b   :  { %517 = vadd.xlane.f32.xlu0 %v516_v24  ;;  %v525_v30 = vadd.f32 %v524_v26, %v522_v25  ;;  %v585_v31 = vadd.f32 %v584_v29, %v582_v28  ;;  %v577_v32 = vadd.f32 %v576_v27, %v1040_v9 }
 0x10d   :  { %526 = vadd.xlane.f32.xlu1 %v525_v30  ;;  %v586_v34 = vadd.f32 %v585_v31, %v583_v33 }
 0x10f   :  { %578 = vadd.xlane.f32.xlu0 %v577_v32 }
 0x111   :  { %587 = vadd.xlane.f32.xlu1 %v586_v34 }
 0x194   :  { %v518_v35 = vpop.xlane.xlu0 %517 }
 0x195   :  { %v528_v36 = vmul.f32 0.00390625, %v518_v35 }
 0x196   :  { %v527_v37 = vpop.xlane.xlu1 %526 }
 0x197   :  { %v529_v38 = vmul.f32 0.00390625, %v527_v37  ;;  %v530_v39 = vmul.f32 %v528_v36, %v528_v36  ;;  %v535_v52 = vmul.f32 0.0, %v528_v36 }
 0x198   :  { %v579_v40 = vpop.xlane.xlu0 %578 }
 0x199   :  { %v531_v41 = vsub.f32 %v529_v38, %v530_v39  ;;  %v589_v42 = vmul.f32 0.00390625, %v579_v40 }
 0x19a   :  { %v588_v43 = vpop.xlane.xlu1 %587 }
 0x19b   :  { %v532_v44 = vmax.f32 %v531_v41, 0.0  ;;  %v590_v45 = vmul.f32 0.00390625, %v588_v43  ;;  %v591_v46 = vmul.f32 %v589_v42, %v589_v42  ;;  %v594_v51 = vmul.f32 0.0, %v589_v42 }
 0x19c   :  { %v600_v54 = vadd.f32 %v589_v42, %v535_v52 }
 0x19d   :  { %v541_v47 = vadd.f32 1e-05, %v532_v44  ;;  %v592_v48 = vsub.f32 %v590_v45, %v591_v46  ;;  %v598_v55 = vadd.f32 %v594_v51, %v528_v36 }
 0x19e   :  { %v614_v58 = vsub.f32 %v1032_v4, %v600_v54  ;;  %v615_v59 = vsub.f32 %v1040_v9, %v600_v54 }
 0x19f   :  { %816 = vrsqrt.f32 %v541_v47  ;;  %v593_v49 = vmax.f32 %v592_v48, 0.0  ;;  %v612_v62 = vsub.f32 %v1030_v3, %v598_v55  ;;  %v613_v63 = vsub.f32 %v1038_v8, %v598_v55 }
 0x1a1   :  { %v602_v50 = vadd.f32 1e-05, %v593_v49 }
 0x1a3   :  { %818 = vrsqrt.f32 %v602_v50 }
 0x1ac   :  { %v817_v53 = vpop.eup %816 }
 0x1ad   :  { %v545_v56 = vmul.f32 0.0, %v817_v53 }
 0x1b0   :  { %v819_v57 = vpop.eup %818 }
 0x1b1   :  { %v604_v60 = vmul.f32 0.0, %v819_v57  ;;  %v610_v61 = vadd.f32 %v819_v57, %v545_v56 }
 0x1b3   :  { %v608_v0 = vadd.f32 %v817_v53, %v604_v60  ;;  %v618_v1 = vmul.f32 %v614_v58, %v610_v61  ;;  %v619_v2 = vmul.f32 %v615_v59, %v610_v61 }
 0x1b5   :  { %v616_v5 = vmul.f32 %v612_v62, %v608_v0  ;;  %v617_v6 = vmul.f32 %v613_v63, %v608_v0  ;;  %v622_v7 = vmax.f32 %v618_v1, 0.0  ;;  %v623_v10 = vmax.f32 %v619_v2, 0.0 }
 0x1b7   :  { %v620_v11 = vmax.f32 %v616_v5, 0.0  ;;  %v621_v12 = vmax.f32 %v617_v6, 0.0  ;;  %v717_v13 = vpack.c.bf16 %v623_v10, %v622_v7 }
 0x1b9   :  { %v716_v14 = vpack.c.bf16 %v621_v12, %v620_v11  ;;  %715 = vst [vmem:[%s1066_s2 + $0x8] sm:$0xff] %v717_v13 }
 0x1bb   :  { %632 = vst [vmem:[%s1066_s2] sm:$0xff] %v716_v14 }

// kernel: content_encoder_forward.3
= control target key start
LH: loop header
LB: loop body
LE: loop exit
PB: predicated region body
PF: predicated region fallthrough
CT: control target
= control target key end

     0   :  { %v4785_v0 = vmov 0.0   ;;  %vm3791_vm0 = vmmov 0   ;;  %v134_v10 = vlaneseq  ;;  %vm444_vm3 = vcmask 130048   ;;  %s4777_s0 = inlined_call_operand.vmem [shape: bf16[128,128], index: 0, kind: input, shape index: {}]   ;;  %s4778_s1 = inlined_call_operand.vmem [shape: bf16[16,128], index: 1, kind: input, shape index: {}]   ;;  %s4779_s4 = inlined_call_operand.vmem [shape: bf16[9,128,128], index: 4, kind: input, shape index: {}]   ;;  %s4780_s2 = inlined_call_operand.vmem [shape: bf16[9,16,16], index: 2, kind: input, shape index: {}]   ;;  %s4781_s3 = inlined_call_operand.vmem [shape: bf16[9,16,16], index: 3, kind: input, shape index: {}]   ;;  %s4782_s5 = inlined_call_operand.vmem [shape: f32[16,128], index: 5, kind: output, shape index: {}]  }
   0x1   :  { %3165 = vmatprep.subr.bf16.mxu0 %v4785_v0  ;;  %v3655_v1 = vld [vmem:[%s4777_s0 + $0x38] sm:$0xff]   ;;  %3181 = vmatprep.mubr.msk.bf16.mxu0 %vm3791_vm0, %v4785_v0  ;;  %v3656_v2 = vld [vmem:[%s4777_s0 + $0x30] sm:$0xff]   ;;  %v3657_v3 = vld [vmem:[%s4777_s0 + $0x28] sm:$0xff]  }
   0x2   :  { %3185 = vmatprep.subr.bf16.mxu1 %v4785_v0  ;;  %3201 = vmatprep.mubr.msk.bf16.mxu1 %vm3791_vm0, %v4785_v0  ;;  %v3658_v4 = vld [vmem:[%s4777_s0 + $0x20] sm:$0xff]   ;;  %v3659_v5 = vld [vmem:[%s4777_s0 + $0x18] sm:$0xff]   ;;  %v3660_v6 = vld [vmem:[%s4777_s0 + $0x10] sm:$0xff]   ;;  %v135_v11 = vand.u32 127, %v134_v10 }
   0x3   :  { %3166 = vmatpush3.bf16.msra.mxu0 %v3655_v1  ;;  %v3661_v7 = vld [vmem:[%s4777_s0 + $0x8] sm:$0xff]   ;;  %v3662_v8 = vld [vmem:[%s4777_s0] sm:$0xff]   ;;  %v3664_v26 = vld [vmem:[%s4779_s4 + $0x38] sm:$0xff]  }
   0x4   :  { %3167 = vmatprep.subr.bf16.mxu0 %v4785_v0  ;;  %v3663_v9 = vld [vmem:[%s4778_s1] sm:$0xff]   ;;  %vm175_vm1 = vcmp.ge.s32.totalorder %v135_v11, 64  ;;  %vm137_vm2 = vcmp.lt.s32.totalorder %v135_v11, 64  ;;  %v3665_v27 = vld [vmem:[%s4779_s4 + $0x78] sm:$0xff]   ;;  %3186 = vmatpush3.bf16.msra.mxu1 %v3664_v26  ;;  %v3666_v28 = vld [vmem:[%s4779_s4 + $0x30] sm:$0xff]  }
   0x5   :  { %v3866_v12 = vsel %vm175_vm1, 1.0, %v4785_v0  ;;  %v3869_v13 = vsel %vm137_vm2, 1.0, %v4785_v0  ;;  %3187 = vmatprep.subr.bf16.mxu1 %v4785_v0  ;;  %v3667_v29 = vld [vmem:[%s4779_s4 + $0x70] sm:$0xff]   ;;  %v3668_v30 = vld [vmem:[%s4779_s4 + $0x28] sm:$0xff]   ;;  %v3670_v32 = vld [vmem:[%s4779_s4 + $0x20] sm:$0xff]  }
   0x6   :  { %v3669_v31 = vld [vmem:[%s4779_s4 + $0x68] sm:$0xff]   ;;  %v3671_v33 = vld [vmem:[%s4779_s4 + $0x60] sm:$0xff]   ;;  %v3672_v34 = vld [vmem:[%s4779_s4 + $0x18] sm:$0xff]  }
   0x7   :  { %3168 = vmatpush3.bf16.msra.mxu0 %v3656_v2  ;;  %v3673_v35 = vld [vmem:[%s4779_s4 + $0x58] sm:$0xff]   ;;  %v3674_v36 = vld [vmem:[%s4779_s4 + $0x10] sm:$0xff]   ;;  %v3676_v38 = vld [vmem:[%s4779_s4 + $0x8] sm:$0xff]  }
   0x8   :  { %3169 = vmatprep.subr.bf16.mxu0 %v4785_v0  ;;  %3188 = vmatpush3.bf16.msra.mxu1 %v3666_v28  ;;  %v3929_v37 = vld [vmem:[%s4779_s4 + $0x50] sm:$0xff]   ;;  %v3940_v39 = vld [vmem:[%s4779_s4 + $0x48] sm:$0xff]   ;;  %v3948_v40 = vld [vmem:[%s4779_s4] sm:$0xff]  }
   0x9   :  { %3189 = vmatprep.subr.bf16.mxu1 %v4785_v0  ;;  %v3953_v41 = vld [vmem:[%s4779_s4 + $0x40] sm:$0xff]  }
   0xb   :  { %3170 = vmatpush3.bf16.msra.mxu0 %v3657_v3 }
   0xc   :  { %3171 = vmatprep.subr.bf16.mxu0 %v4785_v0  ;;  %3190 = vmatpush3.bf16.msra.mxu1 %v3668_v30 }
   0xd   :  { %3191 = vmatprep.subr.bf16.mxu1 %v4785_v0 }
   0xf   :  { %3172 = vmatpush3.bf16.msra.mxu0 %v3658_v4 }
  0x10   :  { %3173 = vmatprep.subr.bf16.mxu0 %v4785_v0  ;;  %3192 = vmatpush3.bf16.msra.mxu1 %v3670_v32 }
  0x11   :  { %3193 = vmatprep.subr.bf16.mxu1 %v4785_v0 }
  0x13   :  { %3174 = vmatpush3.bf16.msra.mxu0 %v3659_v5 }
  0x14   :  { %3175 = vmatprep.subr.bf16.mxu0 %v4785_v0  ;;  %3194 = vmatpush3.bf16.msra.mxu1 %v3672_v34 }
  0x15   :  { %3195 = vmatprep.subr.bf16.mxu1 %v4785_v0 }
  0x17   :  { %3176 = vmatpush3.bf16.msra.mxu0 %v3660_v6 }
  0x18   :  { %3177 = vmatprep.subr.bf16.mxu0 %v4785_v0  ;;  %3196 = vmatpush3.bf16.msra.mxu1 %v3674_v36 }
  0x19   :  { %3197 = vmatprep.subr.bf16.mxu1 %v4785_v0 }
  0x1b   :  { %3178 = vmatpush3.bf16.msra.mxu0 %v3661_v7 }
  0x1c   :  { %3179 = vmatprep.subr.bf16.mxu0 %v4785_v0  ;;  %3198 = vmatpush3.bf16.msra.mxu1 %v3676_v38 }
  0x1d   :  { %3199 = vmatprep.subr.bf16.mxu1 %v4785_v0 }
  0x1f   :  { %3180 = vmatpush3.bf16.msra.mxu0 %v3662_v8 }
  0x20   :  { %3205 = vmatprep.subr.bf16.mxu0 %v4785_v0  ;;  %3200 = vmatpush3.bf16.msra.mxu1 %v3948_v40 }
  0x21   :  { %3231 = vmatprep.subr.bf16.mxu1 %v4785_v0 }
  0x22   :  { %3182 = vmatmul.mubr.bf16.vlgmr.msra.gmra.mxu0 %v3663_v9 }
  0x23   :  { %3221 = vmatprep.mubr.msk.bf16.mxu0 %vm3791_vm0, %v4785_v0  ;;  %3206 = vmatpush3.bf16.msra.mxu0 %v3665_v27 }
  0x24   :  { %3207 = vmatprep.subr.bf16.mxu0 %v4785_v0 }
  0x27   :  { %3208 = vmatpush3.bf16.msra.mxu0 %v3667_v29 }
  0x28   :  { %3209 = vmatprep.subr.bf16.mxu0 %v4785_v0 }
  0x2b   :  { %3210 = vmatpush3.bf16.msra.mxu0 %v3669_v31 }
  0x2c   :  { %3211 = vmatprep.subr.bf16.mxu0 %v4785_v0 }
  0x2f   :  { %3212 = vmatpush3.bf16.msra.mxu0 %v3671_v33 }
  0x30   :  { %3213 = vmatprep.subr.bf16.mxu0 %v4785_v0 }
  0x33   :  { %3214 = vmatpush3.bf16.msra.mxu0 %v3673_v35 }
  0x34   :  { %3215 = vmatprep.subr.bf16.mxu0 %v4785_v0 }
  0x37   :  { %3216 = vmatpush3.bf16.msra.mxu0 %v3929_v37 }
  0x38   :  { %3217 = vmatprep.subr.bf16.mxu0 %v4785_v0 }
  0x3b   :  { %3218 = vmatpush3.bf16.msra.mxu0 %v3940_v39 }
  0x3c   :  { %3219 = vmatprep.subr.bf16.mxu0 %v4785_v0 }
  0x3f   :  { %3220 = vmatpush3.bf16.msra.mxu0 %v3953_v41 }
  0x40   :  { %3225 = vmatprep.subr.bf16.mxu0 %v4785_v0 }
  0xe2   :  { %v3871_v14 = vpop.f32.mrf.mxu0 }
  0xe3   :  { %v180_v15 = vmul.f32 %v3866_v12, %v3871_v14  ;;  %v141_v16 = vmul.f32 %v3869_v13, %v3871_v14 }
  0xe4   :  { %v3183_v17 = vpop.f32.mrf.mxu0 }
  0xe5   :  { %182 = vadd.xlane.f32.xlu1 %v180_v15  ;;  %143 = vadd.xlane.f32.xlu0 %v141_v16  ;;  %v147_v19 = vmul.f32 %v141_v16, %v141_v16  ;;  %v186_v24 = vmul.f32 %v180_v15, %v180_v15 }
  0xe6   :  { %v3877_v18 = vpop.f32.mrf.mxu0 }
  0xe7   :  { %v181_v20 = vmul.f32 %v3866_v12, %v3877_v18  ;;  %v142_v21 = vmul.f32 %v3869_v13, %v3877_v18 }
  0xe8   :  { %v3184_v22 = vpop.f32.mrf.mxu0 }
  0xe9   :  { %149 = vadd.xlane.f32.xlu0 %v147_v19  ;;  %184 = vadd.xlane.f32.xlu1 %v181_v20  ;;  %v148_v23 = vmul.f32 %v142_v21, %v142_v21  ;;  %v187_v25 = vmul.f32 %v181_v20, %v181_v20 }
  0xed   :  { %145 = vadd.xlane.f32.xlu0 %v142_v21  ;;  %151 = vadd.xlane.f32.xlu1 %v148_v23 }
  0xf1   :  { %188 = vadd.xlane.f32.xlu0 %v186_v24  ;;  %190 = vadd.xlane.f32.xlu1 %v187_v25 }
 0x16e   :  { %v183_v42 = vpop.xlane.xlu1 %182  ;;  %v144_v43 = vpop.xlane.xlu0 %143 }
 0x16f   :  { %v153_v44 = vmul.f32 0.015625, %v144_v43  ;;  %v192_v52 = vmul.f32 0.015625, %v183_v42 }
 0x171   :  { %v157_v47 = vmul.f32 %v153_v44, %v153_v44  ;;  %v196_v60 = vmul.f32 %v192_v52, %v192_v52  ;;  %v202_v11 = vmul.f32 %v3866_v12, %v192_v52  ;;  %v163_v15 = vmul.f32 %v3869_v13, %v153_v44  ;;  %v3996_v52 = vld [vmem:[%s4779_s4 + $0xb8] sm:$0xff]  }
 0x172   :  { %v150_v45 = vpop.xlane.xlu0 %149  ;;  %v185_v46 = vpop.xlane.xlu1 %184 }
 0x173   :  { %v155_v48 = vmul.f32 0.015625, %v150_v45  ;;  %v193_v54 = vmul.f32 0.015625, %v185_v46  ;;  %v204_v21 = vadd.f32 %v202_v11, %v163_v15  ;;  %v3690_v15 = vld [vmem:[%s4780_s2 + $0x10] sm:$0xff]  }
 0x175   :  { %v159_v49 = vsub.f32 %v155_v48, %v157_v47  ;;  %v197_v63 = vmul.f32 %v193_v54, %v193_v54  ;;  %v203_v19 = vmul.f32 %v3866_v12, %v193_v54  ;;  %v214_v29 = vsub.f32 %v3871_v14, %v204_v21  ;;  %v4017_v54 = vld [vmem:[%s4779_s4 + $0xa8] sm:$0xff]   ;;  %v4097_v21 = vld [vmem:[%s4779_s4 + $0xd8] sm:$0xff]  }
 0x176   :  { %v146_v50 = vpop.xlane.xlu0 %145  ;;  %v152_v51 = vpop.xlane.xlu1 %151 }
 0x177   :  { %v154_v53 = vmul.f32 0.015625, %v146_v50  ;;  %v161_v55 = vmax.f32 %v159_v49, 0.0  ;;  %v156_v57 = vmul.f32 0.015625, %v152_v51  ;;  %v3680_v50 = vld [vmem:[%s4780_s2 + $0x8] sm:$0xff]   ;;  %v3681_v51 = vld [vmem:[%s4780_s2] sm:$0xff]  }
 0x179   :  { %v158_v56 = vmul.f32 %v154_v53, %v154_v53  ;;  %v167_v2 = vadd.f32 1e-05, %v161_v55  ;;  %v164_v16 = vmul.f32 %v3869_v13, %v154_v53  ;;  %v4006_v53 = vld [vmem:[%s4779_s4 + $0xb0] sm:$0xff]   ;;  %v4024_v55 = vld [vmem:[%s4779_s4 + $0xa0] sm:$0xff]  }
 0x17a   :  { %v189_v58 = vpop.xlane.xlu0 %188  ;;  %v191_v59 = vpop.xlane.xlu1 %190 }
 0x17b   :  { %v160_v61 = vsub.f32 %v156_v57, %v158_v56  ;;  %v194_v62 = vmul.f32 0.015625, %v189_v58  ;;  %v195_v1 = vmul.f32 0.015625, %v191_v59  ;;  %3754 = vrsqrt.f32 %v167_v2  ;;  %v4031_v56 = vld [vmem:[%s4779_s4 + $0x98] sm:$0xff]   ;;  %v4038_v57 = vld [vmem:[%s4779_s4 + $0x90] sm:$0xff]   ;;  %v4045_v58 = vld [vmem:[%s4779_s4 + $0x88] sm:$0xff]  }
 0x17c   :  { %v205_v23 = vadd.f32 %v203_v19, %v164_v16  ;;  %v4052_v59 = vld [vmem:[%s4779_s4 + $0x80] sm:$0xff]   ;;  %v4066_v16 = vld [vmem:[%s4779_s4 + $0xf8] sm:$0xff]   ;;  %v4083_v19 = vld [vmem:[%s4779_s4 + $0xe8] sm:$0xff]  }
 0x17d   :  { %v162_v3 = vmax.f32 %v160_v61, 0.0  ;;  %v198_v4 = vsub.f32 %v194_v62, %v196_v60  ;;  %v199_v5 = vsub.f32 %v195_v1, %v197_v63 }
 0x17e   :  { %v215_v31 = vsub.f32 %v3877_v18, %v205_v23  ;;  %v4111_v23 = vld [vmem:[%s4779_s4 + $0xc8] sm:$0xff]  }
 0x17f   :  { %v168_v6 = vadd.f32 1e-05, %v162_v3  ;;  %v200_v7 = vmax.f32 %v198_v4, 0.0  ;;  %v201_v8 = vmax.f32 %v199_v5, 0.0 }
 0x181   :  { %v206_v9 = vadd.f32 1e-05, %v200_v7  ;;  %3756 = vrsqrt.f32 %v168_v6  ;;  %v207_v10 = vadd.f32 1e-05, %v201_v8 }
 0x183   :  { %3758 = vrsqrt.f32 %v206_v9 }
 0x184   :  { %3760 = vrsqrt.f32 %v207_v10 }
 0x188   :  { %v3755_v17 = vpop.eup %3754 }
 0x189   :  { %v171_v25 = vmul.f32 %v3755_v17, %v3869_v13  ;;  %v4074_v17 = vld [vmem:[%s4779_s4 + $0xf0] sm:$0xff]  }
 0x18e   :  { %v3757_v20 = vpop.eup %3756 }
 0x18f   :  { %v172_v27 = vmul.f32 %v3757_v20, %v3869_v13  ;;  %v4090_v20 = vld [vmem:[%s4779_s4 + $0xe0] sm:$0xff]  }
 0x190   :  { %v3759_v22 = vpop.eup %3758 }
 0x191   :  { %v3761_v24 = vpop.eup %3760  ;;  %v210_v26 = vmul.f32 %v3759_v22, %v3866_v12  ;;  %v4104_v22 = vld [vmem:[%s4779_s4 + $0xd0] sm:$0xff]  }
 0x192   :  { %v211_v28 = vmul.f32 %v3761_v24, %v3866_v12  ;;  %v4118_v24 = vld [vmem:[%s4779_s4 + $0xc0] sm:$0xff]  }
 0x193   :  { %v212_v30 = vadd.f32 %v210_v26, %v171_v25 }
 0x194   :  { %v213_v32 = vadd.f32 %v211_v28, %v172_v27 }
 0x195   :  { %v3969_v33 = vmul.f32 %v214_v29, %v212_v30 }
 0x196   :  { %v3971_v34 = vmul.f32 %v215_v31, %v213_v32 }
 0x197   :  { %4812 = vst [vmem:[#allocation2_spill] sm:$0xff] %v3969_v33  ;;  %v4784_v35 = vmax.f32 %v3969_v33, 0.0 }
 0x198   :  { %4813 = vst [vmem:[#allocation3_spill] sm:$0xff] %v3971_v34  ;;  %v4783_v36 = vmax.f32 %v3971_v34, 0.0 }
 0x19a   :  { %v3979_v38 = vpack.c.bf16 %v4783_v36, %v4784_v35  ;;  %v3726_v35 = vld [vmem:[%s4780_s2 + $0x30] sm:$0xff]  }
 0x19c   :  { %3202 = vmatmul.mubr.bf16.vlgmr.msra.gmra.mxu1 %v3979_v38  ;;  %3222 = vmatmul.mubr.bf16.vlgmr.msra.gmra.mxu0 %v3979_v38 }
 0x19d   :  { %3227 = vmatprep.mubr.msk.bf16.mxu0 %vm3791_vm0, %v4785_v0  ;;  %3233 = vmatprep.mubr.msk.bf16.mxu1 %vm3791_vm0, %v4785_v0 }
 0x25c   :  { %v319_v14 = vpop.f32.mrf.mxu1  ;;  %v428_v18 = vpop.f32.mrf.mxu0 }
 0x25e   :  { %v3203_v42 = vpop.f32.mrf.mxu1  ;;  %v3223_v43 = vpop.f32.mrf.mxu0 }
 0x25f   :  { %v3699_v43 = vld [vmem:[%s4780_s2 + $0x18] sm:$0xff]  }
 0x260   :  { %v322_v44 = vpop.f32.mrf.mxu1  ;;  %v431_v45 = vpop.f32.mrf.mxu0 }
 0x261   :  { %v328_v46 = vpack.c.bf16 %v322_v44, %v319_v14  ;;  %v438_v47 = vpack.c.bf16 %v431_v45, %v428_v18  ;;  %v4132_v44 = vld [vmem:[%s4779_s4 + $0x138] sm:$0xff]   ;;  %v4140_v45 = vld [vmem:[%s4779_s4 + $0x130] sm:$0xff]  }
 0x262   :  { %v3204_v48 = vpop.f32.mrf.mxu1  ;;  %v3224_v49 = vpop.f32.mrf.mxu0 }
 0x263   :  { %3226 = vmatpush3.bf16.msra.mxu0 %v438_v47  ;;  %3232 = vmatpush3.bf16.msra.mxu1 %v328_v46  ;;  %v4149_v46 = vld [vmem:[%s4779_s4 + $0x128] sm:$0xff]   ;;  %v4156_v47 = vld [vmem:[%s4779_s4 + $0x120] sm:$0xff]   ;;  %v4163_v48 = vld [vmem:[%s4779_s4 + $0x118] sm:$0xff]  }
 0x264   :  { %3237 = vmatprep.subr.bf16.mxu1 %v4785_v0  ;;  %3257 = vmatprep.subr.bf16.mxu0 %v4785_v0  ;;  %v4170_v49 = vld [vmem:[%s4779_s4 + $0x110] sm:$0xff]  }
 0x266   :  { %3228 = vmatmul.mubr.msk.bf16.vlgmr.msra.gmra.mxu0 %vm444_vm3, %v3680_v50  ;;  %3234 = vmatmul.mubr.msk.bf16.vlgmr.msra.gmra.mxu1 %vm444_vm3, %v3681_v51  ;;  %v4177_v50 = vld [vmem:[%s4779_s4 + $0x108] sm:$0xff]   ;;  %v4184_v51 = vld [vmem:[%s4779_s4 + $0x100] sm:$0xff]  }
 0x267   :  { %3238 = vmatpush3.bf16.msra.mxu1 %v3996_v52  ;;  %3253 = vmatprep.mubr.msk.bf16.mxu1 %vm3791_vm0, %v4785_v0 }
 0x268   :  { %3239 = vmatprep.subr.bf16.mxu1 %v4785_v0  ;;  %3259 = vmatprep.mubr.msk.bf16.mxu0 %vm3791_vm0, %v4785_v0 }
 0x26b   :  { %3240 = vmatpush3.bf16.msra.mxu1 %v4006_v53 }
 0x26c   :  { %3241 = vmatprep.subr.bf16.mxu1 %v4785_v0 }
 0x26f   :  { %3242 = vmatpush3.bf16.msra.mxu1 %v4017_v54 }
 0x270   :  { %3243 = vmatprep.subr.bf16.mxu1 %v4785_v0 }
 0x273   :  { %3244 = vmatpush3.bf16.msra.mxu1 %v4024_v55 }
 0x274   :  { %3245 = vmatprep.subr.bf16.mxu1 %v4785_v0 }
 0x277   :  { %3246 = vmatpush3.bf16.msra.mxu1 %v4031_v56 }
 0x278   :  { %3247 = vmatprep.subr.bf16.mxu1 %v4785_v0 }
 0x27b   :  { %3248 = vmatpush3.bf16.msra.mxu1 %v4038_v57 }
 0x27c   :  { %3249 = vmatprep.subr.bf16.mxu1 %v4785_v0 }
 0x27f   :  { %3250 = vmatpush3.bf16.msra.mxu1 %v4045_v58 }
 0x280   :  { %3251 = vmatprep.subr.bf16.mxu1 %v4785_v0 }
 0x283   :  { %3252 = vmatpush3.bf16.msra.mxu1 %v4052_v59 }
 0x284   :  { %3283 = vmatprep.subr.bf16.mxu1 %v4785_v0 }
 0x286   :  { %3254 = vmatmul.mubr.bf16.vlgmr.msra.gmra.mxu1 %v3979_v38 }
 0x287   :  { %3285 = vmatprep.mubr.msk.bf16.mxu1 %vm3791_vm0, %v4785_v0 }
 0x326   :  { %v482_v60 = vpop.f32.mrf.mxu0  ;;  %v531_v61 = vpop.f32.mrf.mxu1 }
 0x327   :  { %v532_v62 = vadd.f32 %v531_v61, %v482_v60 }
 0x328   :  { %v3229_v63 = vpop.f32.mrf.mxu0  ;;  %v3235_v1 = vpop.f32.mrf.mxu1 }
 0x32a   :  { %v485_v2 = vpop.f32.mrf.mxu0  ;;  %v534_v3 = vpop.f32.mrf.mxu1 }
 0x32b   :  { %v535_v4 = vadd.f32 %v534_v3, %v485_v2 }
 0x32c   :  { %v3236_v5 = vpop.f32.mrf.mxu1  ;;  %v3230_v6 = vpop.f32.mrf.mxu0 }
 0x346   :  { %v637_v7 = vpop.f32.mrf.mxu1 }
 0x348   :  { %v3255_v8 = vpop.f32.mrf.mxu1 }
 0x349   :  { %v3708_v8 = vld [vmem:[%s4780_s2 + $0x20] sm:$0xff]  }
 0x34a   :  { %v640_v9 = vpop.f32.mrf.mxu1 }
 0x34b   :  { %v647_v10 = vpack.c.bf16 %v640_v9, %v637_v7  ;;  %v4198_v9 = vld [vmem:[%s4779_s4 + $0x178] sm:$0xff]  }
 0x34c   :  { %v3256_v11 = vpop.f32.mrf.mxu1 }
 0x34d   :  { %3258 = vmatpush3.bf16.msra.mxu0 %v647_v10  ;;  %v4206_v10 = vld [vmem:[%s4779_s4 + $0x170] sm:$0xff]   ;;  %v4215_v11 = vld [vmem:[%s4779_s4 + $0x168] sm:$0xff]  }
 0x34e   :  { %3263 = vmatprep.subr.bf16.mxu0 %v4785_v0 }
 0x350   :  { %3260 = vmatmul.mubr.msk.bf16.vlgmr.msra.gmra.mxu0 %vm444_vm3, %v3690_v15  ;;  %v4222_v15 = vld [vmem:[%s4779_s4 + $0x160] sm:$0xff]  }
 0x351   :  { %3264 = vmatpush3.bf16.msra.mxu0 %v4066_v16  ;;  %3279 = vmatprep.mubr.msk.bf16.mxu0 %vm3791_vm0, %v4785_v0 }
 0x352   :  { %3265 = vmatprep.subr.bf16.mxu0 %v4785_v0 }
 0x355   :  { %3266 = vmatpush3.bf16.msra.mxu0 %v4074_v17 }
 0x356   :  { %3267 = vmatprep.subr.bf16.mxu0 %v4785_v0 }
 0x359   :  { %3268 = vmatpush3.bf16.msra.mxu0 %v4083_v19 }
 0x35a   :  { %3269 = vmatprep.subr.bf16.mxu0 %v4785_v0 }
 0x35d   :  { %3270 = vmatpush3.bf16.msra.mxu0 %v4090_v20 }
 0x35e   :  { %3271 = vmatprep.subr.bf16.mxu0 %v4785_v0 }
 0x361   :  { %3272 = vmatpush3.bf16.msra.mxu0 %v4097_v21 }
 0x362   :  { %3273 = vmatprep.subr.bf16.mxu0 %v4785_v0 }
 0x365   :  { %3274 = vmatpush3.bf16.msra.mxu0 %v4104_v22 }
 0x366   :  { %3275 = vmatprep.subr.bf16.mxu0 %v4785_v0 }
 0x369   :  { %3276 = vmatpush3.bf16.msra.mxu0 %v4111_v23 }
 0x36a   :  { %3277 = vmatprep.subr.bf16.mxu0 %v4785_v0 }
 0x36d   :  { %3278 = vmatpush3.bf16.msra.mxu0 %v4118_v24 }
 0x36e   :  { %3309 = vmatprep.subr.bf16.mxu0 %v4785_v0 }
 0x370   :  { %3280 = vmatmul.mubr.bf16.vlgmr.msra.gmra.mxu0 %v3979_v38 }
 0x371   :  { %3311 = vmatprep.mubr.msk.bf16.mxu0 %vm3791_vm0, %v4785_v0 }
 0x410   :  { %v690_v25 = vpop.f32.mrf.mxu0 }
 0x411   :  { %v697_v26 = vadd.f32 %v690_v25, %v532_v62  ;;  %v4229_v25 = vld [vmem:[%s4779_s4 + $0x158] sm:$0xff]  }
 0x412   :  { %v3261_v27 = vpop.f32.mrf.mxu0 }
 0x413   :  { %v4243_v27 = vld [vmem:[%s4779_s4 + $0x148] sm:$0xff]  }
 0x414   :  { %v693_v28 = vpop.f32.mrf.mxu0 }
 0x415   :  { %v698_v29 = vadd.f32 %v693_v28, %v535_v4  ;;  %v4250_v28 = vld [vmem:[%s4779_s4 + $0x140] sm:$0xff]  }
 0x416   :  { %v3262_v30 = vpop.f32.mrf.mxu0 }
 0x430   :  { %v798_v31 = vpop.f32.mrf.mxu0 }
 0x432   :  { %v3281_v32 = vpop.f32.mrf.mxu0 }
 0x434   :  { %v801_v14 = vpop.f32.mrf.mxu0 }
 0x435   :  { %v808_v18 = vpack.c.bf16 %v801_v14, %v798_v31 }
 0x436   :  { %v3282_v42 = vpop.f32.mrf.mxu0 }
 0x437   :  { %3284 = vmatpush3.bf16.msra.mxu1 %v808_v18 }
 0x438   :  { %3289 = vmatprep.subr.bf16.mxu1 %v4785_v0 }
 0x43a   :  { %3286 = vmatmul.mubr.msk.bf16.vlgmr.msra.gmra.mxu1 %vm444_vm3, %v3699_v43 }
 0x43b   :  { %3290 = vmatpush3.bf16.msra.mxu1 %v4132_v44  ;;  %3305 = vmatprep.mubr.msk.bf16.mxu1 %vm3791_vm0, %v4785_v0 }
 0x43c   :  { %3291 = vmatprep.subr.bf16.mxu1 %v4785_v0 }
 0x43f   :  { %3292 = vmatpush3.bf16.msra.mxu1 %v4140_v45 }
 0x440   :  { %3293 = vmatprep.subr.bf16.mxu1 %v4785_v0 }
 0x443   :  { %3294 = vmatpush3.bf16.msra.mxu1 %v4149_v46 }
 0x444   :  { %3295 = vmatprep.subr.bf16.mxu1 %v4785_v0 }
 0x447   :  { %3296 = vmatpush3.bf16.msra.mxu1 %v4156_v47 }
 0x448   :  { %3297 = vmatprep.subr.bf16.mxu1 %v4785_v0 }
 0x44b   :  { %3298 = vmatpush3.bf16.msra.mxu1 %v4163_v48 }
 0x44c   :  { %3299 = vmatprep.subr.bf16.mxu1 %v4785_v0 }
 0x44f   :  { %3300 = vmatpush3.bf16.msra.mxu1 %v4170_v49 }
 0x450   :  { %3301 = vmatprep.subr.bf16.mxu1 %v4785_v0 }
 0x453   :  { %3302 = vmatpush3.bf16.msra.mxu1 %v4177_v50 }
 0x454   :  { %3303 = vmatprep.subr.bf16.mxu1 %v4785_v0 }
 0x457   :  { %3304 = vmatpush3.bf16.msra.mxu1 %v4184_v51 }
 0x458   :  { %3335 = vmatprep.subr.bf16.mxu1 %v4785_v0 }
 0x45a   :  { %3306 = vmatmul.mubr.bf16.vlgmr.msra.gmra.mxu1 %v3979_v38 }
 0x45b   :  { %3337 = vmatprep.mubr.msk.bf16.mxu1 %vm3791_vm0, %v4785_v0 }
 0x4fa   :  { %v851_v60 = vpop.f32.mrf.mxu1 }
 0x4fb   :  { %v858_v61 = vadd.f32 %v851_v60, %v697_v26  ;;  %v4236_v26 = vld [vmem:[%s4779_s4 + $0x150] sm:$0xff]  }
 0x4fc   :  { %v3287_v62 = vpop.f32.mrf.mxu1 }
 0x4fe   :  { %v854_v63 = vpop.f32.mrf.mxu1 }
 0x4ff   :  { %v859_v1 = vadd.f32 %v854_v63, %v698_v29 }
 0x500   :  { %v3288_v2 = vpop.f32.mrf.mxu1 }
 0x501   :  { %v3717_v2 = vld [vmem:[%s4780_s2 + $0x28] sm:$0xff]  }
 0x51a   :  { %v959_v3 = vpop.f32.mrf.mxu1 }
 0x51c   :  { %v3307_v4 = vpop.f32.mrf.mxu1 }
 0x51d   :  { %v4288_v4 = vld [vmem:[%s4779_s4 + $0x1a0] sm:$0xff]  }
 0x51e   :  { %v962_v5 = vpop.f32.mrf.mxu1  ;;  %4816 = vst [vmem:[#allocation6_spill] sm:$0xff] %v4288_v4 }
 0x51f   :  { %v969_v6 = vpack.c.bf16 %v962_v5, %v959_v3  ;;  %v4264_v3 = vld [vmem:[%s4779_s4 + $0x1b8] sm:$0xff]  }
 0x520   :  { %v3308_v7 = vpop.f32.mrf.mxu1  ;;  %v4295_v5 = vld [vmem:[%s4779_s4 + $0x198] sm:$0xff]  }
 0x521   :  { %3310 = vmatpush3.bf16.msra.mxu0 %v969_v6  ;;  %4817 = vst [vmem:[#allocation7_spill] sm:$0xff] %v4295_v5  ;;  %v4302_v6 = vld [vmem:[%s4779_s4 + $0x190] sm:$0xff]   ;;  %v4309_v7 = vld [vmem:[%s4779_s4 + $0x188] sm:$0xff]  }
 0x522   :  { %3315 = vmatprep.subr.bf16.mxu0 %v4785_v0  ;;  %4818 = vst [vmem:[#allocation8_spill] sm:$0xff] %v4302_v6  ;;  %4819 = vst [vmem:[#allocation9_spill] sm:$0xff] %v4309_v7 }
 0x524   :  { %3312 = vmatmul.mubr.msk.bf16.vlgmr.msra.gmra.mxu0 %vm444_vm3, %v3708_v8  ;;  %v4316_v8 = vld [vmem:[%s4779_s4 + $0x180] sm:$0xff]  }
 0x525   :  { %3316 = vmatpush3.bf16.msra.mxu0 %v4198_v9  ;;  %3331 = vmatprep.mubr.msk.bf16.mxu0 %vm3791_vm0, %v4785_v0  ;;  %4820 = vst [vmem:[#allocation10_spill] sm:$0xff] %v4316_v8 }
 0x526   :  { %3317 = vmatprep.subr.bf16.mxu0 %v4785_v0 }
 0x529   :  { %3318 = vmatpush3.bf16.msra.mxu0 %v4206_v10 }
 0x52a   :  { %3319 = vmatprep.subr.bf16.mxu0 %v4785_v0 }
 0x52d   :  { %3320 = vmatpush3.bf16.msra.mxu0 %v4215_v11 }
 0x52e   :  { %3321 = vmatprep.subr.bf16.mxu0 %v4785_v0 }
 0x531   :  { %3322 = vmatpush3.bf16.msra.mxu0 %v4222_v15 }
 0x532   :  { %3323 = vmatprep.subr.bf16.mxu0 %v4785_v0 }
 0x535   :  { %3324 = vmatpush3.bf16.msra.mxu0 %v4229_v25 }
 0x536   :  { %3325 = vmatprep.subr.bf16.mxu0 %v4785_v0 }
 0x539   :  { %3326 = vmatpush3.bf16.msra.mxu0 %v4236_v26 }
 0x53a   :  { %3327 = vmatprep.subr.bf16.mxu0 %v4785_v0 }
 0x53d   :  { %3328 = vmatpush3.bf16.msra.mxu0 %v4243_v27 }
 0x53e   :  { %3329 = vmatprep.subr.bf16.mxu0 %v4785_v0 }
 0x541   :  { %3330 = vmatpush3.bf16.msra.mxu0 %v4250_v28 }
 0x542   :  { %3361 = vmatprep.subr.bf16.mxu0 %v4785_v0 }
 0x544   :  { %3332 = vmatmul.mubr.bf16.vlgmr.msra.gmra.mxu0 %v3979_v38 }
 0x545   :  { %3363 = vmatprep.mubr.msk.bf16.mxu0 %vm3791_vm0, %v4785_v0 }
 0x5e4   :  { %v1012_v29 = vpop.f32.mrf.mxu0 }
 0x5e5   :  { %v1019_v30 = vadd.f32 %v1012_v29, %v858_v61  ;;  %v4272_v61 = vld [vmem:[%s4779_s4 + $0x1b0] sm:$0xff]  }
 0x5e6   :  { %v3313_v31 = vpop.f32.mrf.mxu0  ;;  %4814 = vst [vmem:[#allocation4_spill] sm:$0xff] %v4272_v61 }
 0x5e8   :  { %v1015_v32 = vpop.f32.mrf.mxu0 }
 0x5e9   :  { %v1020_v14 = vadd.f32 %v1015_v32, %v859_v1  ;;  %v4281_v1 = vld [vmem:[%s4779_s4 + $0x1a8] sm:$0xff]  }
 0x5ea   :  { %v3314_v18 = vpop.f32.mrf.mxu0  ;;  %4815 = vst [vmem:[#allocation5_spill] sm:$0xff] %v4281_v1 }
 0x604   :  { %v1120_v42 = vpop.f32.mrf.mxu0 }
 0x606   :  { %v3333_v43 = vpop.f32.mrf.mxu0 }
 0x608   :  { %v1123_v60 = vpop.f32.mrf.mxu0 }
 0x609   :  { %v1130_v62 = vpack.c.bf16 %v1123_v60, %v1120_v42 }
 0x60a   :  { %v3334_v63 = vpop.f32.mrf.mxu0 }
 0x60b   :  { %3336 = vmatpush3.bf16.msra.mxu1 %v1130_v62 }
 0x60c   :  { %3341 = vmatprep.subr.bf16.mxu1 %v4785_v0 }
 0x60e   :  { %3338 = vmatmul.mubr.msk.bf16.vlgmr.msra.gmra.mxu1 %vm444_vm3, %v3717_v2 }
 0x60f   :  { %3342 = vmatpush3.bf16.msra.mxu1 %v4264_v3  ;;  %3357 = vmatprep.mubr.msk.bf16.mxu1 %vm3791_vm0, %v4785_v0 }
 0x610   :  { %3343 = vmatprep.subr.bf16.mxu1 %v4785_v0 }
 0x613   :  { %3344 = vmatpush3.bf16.msra.mxu1 %v4272_v61 }
 0x614   :  { %3345 = vmatprep.subr.bf16.mxu1 %v4785_v0 }
 0x617   :  { %3346 = vmatpush3.bf16.msra.mxu1 %v4281_v1 }
 0x618   :  { %3347 = vmatprep.subr.bf16.mxu1 %v4785_v0 }
 0x61b   :  { %3348 = vmatpush3.bf16.msra.mxu1 %v4288_v4 }
 0x61c   :  { %3349 = vmatprep.subr.bf16.mxu1 %v4785_v0 }
 0x61f   :  { %3350 = vmatpush3.bf16.msra.mxu1 %v4295_v5 }
 0x620   :  { %3351 = vmatprep.subr.bf16.mxu1 %v4785_v0 }
 0x623   :  { %3352 = vmatpush3.bf16.msra.mxu1 %v4302_v6 }
 0x624   :  { %3353 = vmatprep.subr.bf16.mxu1 %v4785_v0 }
 0x627   :  { %3354 = vmatpush3.bf16.msra.mxu1 %v4309_v7 }
 0x628   :  { %3355 = vmatprep.subr.bf16.mxu1 %v4785_v0 }
 0x62b   :  { %3356 = vmatpush3.bf16.msra.mxu1 %v4316_v8 }
 0x62c   :  { %3387 = vmatprep.subr.bf16.mxu1 %v4785_v0 }
 0x62e   :  { %3358 = vmatmul.mubr.bf16.vlgmr.msra.gmra.mxu1 %v3979_v38 }
 0x62f   :  { %3389 = vmatprep.mubr.msk.bf16.mxu1 %vm3791_vm0, %v4785_v0  ;;  %v4330_v0 = vld [vmem:[%s4779_s4 + $0x1f8] sm:$0xff]  }
 0x630   :  { %4821 = vst [vmem:[#allocation11_spill] sm:$0xff] %v4330_v0 }
 0x6ce   :  { %v1173_v29 = vpop.f32.mrf.mxu1 }
 0x6cf   :  { %v1180_v31 = vadd.f32 %v1173_v29, %v1019_v30  ;;  %v4822_v30 = vmov 0.0   ;;  %v4361_v29 = vld [vmem:[%s4779_s4 + $0x1d8] sm:$0xff]  }
 0x6d0   :  { %v3339_v32 = vpop.f32.mrf.mxu1  ;;  %4826 = vst [vmem:[#allocation15_spill] sm:$0xff] %v4361_v29 }
 0x6d1   :  { %v4368_v32 = vld [vmem:[%s4779_s4 + $0x1d0] sm:$0xff]  }
 0x6d2   :  { %v1176_v18 = vpop.f32.mrf.mxu1  ;;  %4827 = vst [vmem:[#allocation16_spill] sm:$0xff] %v4368_v32 }
 0x6d3   :  { %v1181_v42 = vadd.f32 %v1176_v18, %v1020_v14  ;;  %v4347_v14 = vld [vmem:[%s4779_s4 + $0x1e8] sm:$0xff]  }
 0x6d4   :  { %v3340_v43 = vpop.f32.mrf.mxu1  ;;  %4824 = vst [vmem:[#allocation13_spill] sm:$0xff] %v4347_v14  ;;  %v4375_v18 = vld [vmem:[%s4779_s4 + $0x1c8] sm:$0xff]  }
 0x6d5   :  { %4828 = vst [vmem:[#allocation17_spill] sm:$0xff] %v4375_v18  ;;  %v4382_v43 = vld [vmem:[%s4779_s4 + $0x1c0] sm:$0xff]  }
 0x6d6   :  { %4829 = vst [vmem:[#allocation18_spill] sm:$0xff] %v4382_v43 }
 0x6ee   :  { %v1281_v60 = vpop.f32.mrf.mxu1 }
 0x6f0   :  { %v3359_v62 = vpop.f32.mrf.mxu1 }
 0x6f2   :  { %v1284_v63 = vpop.f32.mrf.mxu1 }
 0x6f3   :  { %v1291_v2 = vpack.c.bf16 %v1284_v63, %v1281_v60 }
 0x6f4   :  { %v3360_v36 = vpop.f32.mrf.mxu1 }
 0x6f5   :  { %3362 = vmatpush3.bf16.msra.mxu0 %v1291_v2  ;;  %v4338_v36 = vld [vmem:[%s4779_s4 + $0x1f0] sm:$0xff]  }
 0x6f6   :  { %3367 = vmatprep.subr.bf16.mxu0 %v4822_v30  ;;  %4823 = vst [vmem:[#allocation12_spill] sm:$0xff] %v4338_v36 }
 0x6f8   :  { %3364 = vmatmul.mubr.msk.bf16.vlgmr.msra.gmra.mxu0 %vm444_vm3, %v3726_v35  ;;  %v4354_v35 = vld [vmem:[%s4779_s4 + $0x1e0] sm:$0xff]  }
 0x6f9   :  { %3368 = vmatpush3.bf16.msra.mxu0 %v4330_v0  ;;  %3383 = vmatprep.mubr.msk.bf16.mxu0 %vm3791_vm0, %v4822_v30  ;;  %4825 = vst [vmem:[#allocation14_spill] sm:$0xff] %v4354_v35 }
 0x6fa   :  { %3369 = vmatprep.subr.bf16.mxu0 %v4822_v30 }
 0x6fd   :  { %3370 = vmatpush3.bf16.msra.mxu0 %v4338_v36 }
 0x6fe   :  { %3371 = vmatprep.subr.bf16.mxu0 %v4822_v30 }
 0x701   :  { %3372 = vmatpush3.bf16.msra.mxu0 %v4347_v14  ;;  %v3735_v14 = vld [vmem:[%s4780_s2 + $0x38] sm:$0xff]  }
 0x702   :  { %3373 = vmatprep.subr.bf16.mxu0 %v4822_v30 }
 0x705   :  { %3374 = vmatpush3.bf16.msra.mxu0 %v4354_v35 }
 0x706   :  { %3375 = vmatprep.subr.bf16.mxu0 %v4822_v30 }
 0x709   :  { %3376 = vmatpush3.bf16.msra.mxu0 %v4361_v29 }
 0x70a   :  { %3377 = vmatprep.subr.bf16.mxu0 %v4822_v30 }
 0x70d   :  { %3378 = vmatpush3.bf16.msra.mxu0 %v4368_v32 }
 0x70e   :  { %3379 = vmatprep.subr.bf16.mxu0 %v4822_v30 }
 0x711   :  { %3380 = vmatpush3.bf16.msra.mxu0 %v4375_v18 }
 0x712   :  { %3381 = vmatprep.subr.bf16.mxu0 %v4822_v30 }
 0x715   :  { %3382 = vmatpush3.bf16.msra.mxu0 %v4382_v43 }
 0x716   :  { %3413 = vmatprep.subr.bf16.mxu0 %v4822_v30 }
 0x718   :  { %3384 = vmatmul.mubr.bf16.vlgmr.msra.gmra.mxu0 %v3979_v38 }
 0x719   :  { %3415 = vmatprep.mubr.msk.bf16.mxu0 %vm3791_vm0, %v4822_v30 }
 0x7b8   :  { %v1334_v60 = vpop.f32.mrf.mxu0 }
 0x7b9   :  { %v4390_v62 = vadd.f32 %v1334_v60, %v1180_v31  ;;  %v4400_v31 = vld [vmem:[%s4779_s4 + $0x238] sm:$0xff]   ;;  %v3779_v60 = vld [vmem:[%s4779_s4 + $0x70] sm:$0xff]  }
 0x7ba   :  { %v3365_v63 = vpop.f32.mrf.mxu0  ;;  %4830 = vst [vmem:[#allocation19_spill] sm:$0xff] %v4400_v31 }
 0x7bb   :  { %v3781_v63 = vld [vmem:[%s4779_s4 + $0x60] sm:$0xff]  }
 0x7bc   :  { %v1337_v2 = vpop.f32.mrf.mxu0 }
 0x7bd   :  { %v4392_v34 = vadd.f32 %v1337_v2, %v1181_v42  ;;  %v4417_v42 = vld [vmem:[%s4779_s4 + $0x228] sm:$0xff]   ;;  %v3782_v2 = vld [vmem:[%s4779_s4 + $0x58] sm:$0xff]  }
 0x7be   :  { %v3366_v33 = vpop.f32.mrf.mxu0  ;;  %4832 = vst [vmem:[#allocation21_spill] sm:$0xff] %v4417_v42 }
 0x7bf   :  { %v4408_v33 = vld [vmem:[%s4779_s4 + $0x230] sm:$0xff]  }
 0x7c0   :  { %4831 = vst [vmem:[#allocation20_spill] sm:$0xff] %v4408_v33 }
 0x7d8   :  { %v1442_v18 = vpop.f32.mrf.mxu0 }
 0x7da   :  { %v3385_v32 = vpop.f32.mrf.mxu0 }
 0x7db   :  { %v4445_v32 = vld [vmem:[%s4779_s4 + $0x208] sm:$0xff]  }
 0x7dc   :  { %v1445_v29 = vpop.f32.mrf.mxu0  ;;  %4836 = vst [vmem:[#allocation25_spill] sm:$0xff] %v4445_v32 }
 0x7dd   :  { %v1452_v35 = vpack.c.bf16 %v1445_v29, %v1442_v18  ;;  %v4438_v29 = vld [vmem:[%s4779_s4 + $0x210] sm:$0xff]   ;;  %v4452_v18 = vld [vmem:[%s4779_s4 + $0x200] sm:$0xff]  }
 0x7de   :  { %v3386_v43 = vpop.f32.mrf.mxu0  ;;  %4835 = vst [vmem:[#allocation24_spill] sm:$0xff] %v4438_v29  ;;  %4837 = vst [vmem:[#allocation26_spill] sm:$0xff] %v4452_v18 }
 0x7df   :  { %3388 = vmatpush3.bf16.msra.mxu1 %v1452_v35  ;;  %v4431_v35 = vld [vmem:[%s4779_s4 + $0x218] sm:$0xff]  }
 0x7e0   :  { %3393 = vmatprep.subr.bf16.mxu1 %v4822_v30  ;;  %4834 = vst [vmem:[#allocation23_spill] sm:$0xff] %v4431_v35  ;;  %v3778_v43 = vld [vmem:[%s4779_s4 + $0x78] sm:$0xff]  }
 0x7e2   :  { %3390 = vmatmul.mubr.msk.bf16.vlgmr.msra.gmra.mxu1 %vm444_vm3, %v3735_v14  ;;  %v4424_v14 = vld [vmem:[%s4779_s4 + $0x220] sm:$0xff]  }
 0x7e3   :  { %3394 = vmatpush3.bf16.msra.mxu1 %v4400_v31  ;;  %3409 = vmatprep.mubr.msk.bf16.mxu1 %vm3791_vm0, %v4822_v30  ;;  %4833 = vst [vmem:[#allocation22_spill] sm:$0xff] %v4424_v14 }
 0x7e4   :  { %3395 = vmatprep.subr.bf16.mxu1 %v4822_v30 }
 0x7e7   :  { %3396 = vmatpush3.bf16.msra.mxu1 %v4408_v33 }
 0x7e8   :  { %3397 = vmatprep.subr.bf16.mxu1 %v4822_v30 }
 0x7eb   :  { %3398 = vmatpush3.bf16.msra.mxu1 %v4417_v42 }
 0x7ec   :  { %3399 = vmatprep.subr.bf16.mxu1 %v4822_v30 }
 0x7ef   :  { %3400 = vmatpush3.bf16.msra.mxu1 %v4424_v14 }
 0x7f0   :  { %3401 = vmatprep.subr.bf16.mxu1 %v4822_v30 }
 0x7f3   :  { %3402 = vmatpush3.bf16.msra.mxu1 %v4431_v35 }
 0x7f4   :  { %3403 = vmatprep.subr.bf16.mxu1 %v4822_v30 }
 0x7f7   :  { %3404 = vmatpush3.bf16.msra.mxu1 %v4438_v29 }
 0x7f8   :  { %3405 = vmatprep.subr.bf16.mxu1 %v4822_v30 }
 0x7fb   :  { %3406 = vmatpush3.bf16.msra.mxu1 %v4445_v32 }
 0x7fc   :  { %3407 = vmatprep.subr.bf16.mxu1 %v4822_v30 }
 0x7ff   :  { %3408 = vmatpush3.bf16.msra.mxu1 %v4452_v18 }
 0x800   :  { %3439 = vmatprep.subr.bf16.mxu1 %v4822_v30 }
 0x802   :  { %3410 = vmatmul.mubr.bf16.vlgmr.msra.gmra.mxu1 %v3979_v38  ;;  %v3780_v38 = vld [vmem:[%s4779_s4 + $0x68] sm:$0xff]  }
 0x803   :  { %3440 = vmatpush3.bf16.msra.mxu1 %v3778_v43  ;;  %3455 = vmatprep.mubr.msk.bf16.mxu1 %vm3791_vm0, %v4822_v30 }
 0x804   :  { %3441 = vmatprep.subr.bf16.mxu1 %v4822_v30 }
 0x807   :  { %3442 = vmatpush3.bf16.msra.mxu1 %v3779_v60 }
 0x808   :  { %3443 = vmatprep.subr.bf16.mxu1 %v4822_v30 }
 0x80b   :  { %3444 = vmatpush3.bf16.msra.mxu1 %v3780_v38 }
 0x80c   :  { %3445 = vmatprep.subr.bf16.mxu1 %v4822_v30 }
 0x80f   :  { %3446 = vmatpush3.bf16.msra.mxu1 %v3781_v63 }
 0x810   :  { %3447 = vmatprep.subr.bf16.mxu1 %v4822_v30 }
 0x813   :  { %3448 = vmatpush3.bf16.msra.mxu1 %v3782_v2 }
 0x814   :  { %3449 = vmatprep.subr.bf16.mxu1 %v4822_v30 }
 0x817   :  { %3450 = vmatpush3.bf16.msra.mxu1 %v3929_v37 }
 0x818   :  { %3451 = vmatprep.subr.bf16.mxu1 %v4822_v30 }
 0x81b   :  { %3452 = vmatpush3.bf16.msra.mxu1 %v3940_v39  ;;  %v3744_v39 = vld [vmem:[%s4780_s2 + $0x40] sm:$0xff]  }
 0x81c   :  { %3453 = vmatprep.subr.bf16.mxu1 %v4822_v30 }
 0x81f   :  { %3454 = vmatpush3.bf16.msra.mxu1 %v3953_v41  ;;  %v3783_v41 = vld [vmem:[%s4779_s4 + $0x38] sm:$0xff]  }
 0x820   :  { %3471 = vmatprep.subr.bf16.mxu1 %v4822_v30 }
 0x8a2   :  { %v1495_v43 = vpop.f32.mrf.mxu1 }
 0x8a3   :  { %v1502_v60 = vadd.f32 %v1495_v43, %v4390_v62  ;;  %v3785_v62 = vld [vmem:[%s4779_s4 + $0x28] sm:$0xff]  }
 0x8a4   :  { %v3391_v38 = vpop.f32.mrf.mxu1 }
 0x8a6   :  { %v1498_v63 = vpop.f32.mrf.mxu1 }
 0x8a7   :  { %v1503_v2 = vadd.f32 %v1498_v63, %v4392_v34  ;;  %v3784_v34 = vld [vmem:[%s4779_s4 + $0x30] sm:$0xff]  }
 0x8a8   :  { %v3392_v18 = vpop.f32.mrf.mxu1 }
 0x8c2   :  { %v1603_v32 = vpop.f32.mrf.mxu1 }
 0x8c4   :  { %v3411_v37 = vpop.f32.mrf.mxu1 }
 0x8c6   :  { %v1606_v29 = vpop.f32.mrf.mxu1 }
 0x8c7   :  { %v1613_v35 = vpack.c.bf16 %v1606_v29, %v1603_v32  ;;  %v3788_v29 = vld [vmem:[%s4779_s4 + $0x10] sm:$0xff]   ;;  %v3789_v32 = vld [vmem:[%s4779_s4 + $0x8] sm:$0xff]  }
 0x8c8   :  { %v3412_v14 = vpop.f32.mrf.mxu1 }
 0x8c9   :  { %3414 = vmatpush3.bf16.msra.mxu0 %v1613_v35  ;;  %v3786_v14 = vld [vmem:[%s4779_s4 + $0x20] sm:$0xff]   ;;  %v3787_v35 = vld [vmem:[%s4779_s4 + $0x18] sm:$0xff]  }
 0x8ca   :  { %3419 = vmatprep.subr.bf16.mxu0 %v4822_v30 }
 0x8cc   :  { %3416 = vmatmul.mubr.msk.bf16.vlgmr.msra.gmra.mxu0 %vm444_vm3, %v3744_v39 }
 0x8cd   :  { %3420 = vmatpush3.bf16.msra.mxu0 %v3783_v41  ;;  %3435 = vmatprep.mubr.msk.bf16.mxu0 %vm3791_vm0, %v4822_v30 }
 0x8ce   :  { %3421 = vmatprep.subr.bf16.mxu0 %v4822_v30 }
 0x8d1   :  { %3422 = vmatpush3.bf16.msra.mxu0 %v3784_v34 }
 0x8d2   :  { %3423 = vmatprep.subr.bf16.mxu0 %v4822_v30 }
 0x8d5   :  { %3424 = vmatpush3.bf16.msra.mxu0 %v3785_v62 }
 0x8d6   :  { %3425 = vmatprep.subr.bf16.mxu0 %v4822_v30 }
 0x8d9   :  { %3426 = vmatpush3.bf16.msra.mxu0 %v3786_v14 }
 0x8da   :  { %3427 = vmatprep.subr.bf16.mxu0 %v4822_v30 }
 0x8dd   :  { %3428 = vmatpush3.bf16.msra.mxu0 %v3787_v35 }
 0x8de   :  { %3429 = vmatprep.subr.bf16.mxu0 %v4822_v30 }
 0x8e1   :  { %3430 = vmatpush3.bf16.msra.mxu0 %v3788_v29 }
 0x8e2   :  { %3431 = vmatprep.subr.bf16.mxu0 %v4822_v30 }
 0x8e5   :  { %3432 = vmatpush3.bf16.msra.mxu0 %v3789_v32 }
 0x8e6   :  { %3433 = vmatprep.subr.bf16.mxu0 %v4822_v30 }
 0x8e9   :  { %3434 = vmatpush3.bf16.msra.mxu0 %v3948_v40 }
 0x8ea   :  { %3459 = vmatprep.subr.bf16.mxu0 %v4822_v30 }
 0x98c   :  { %v1656_v18 = vpop.f32.mrf.mxu0 }
 0x98d   :  { %v4525_v43 = vadd.f32 %v1656_v18, %v1502_v60 }
 0x98e   :  { %v3417_v38 = vpop.f32.mrf.mxu0 }
 0x98f   :  { %v1665_v63 = vmul.f32 %v3869_v13, %v4525_v43  ;;  %v1699_v34 = vmul.f32 %v3866_v12, %v4525_v43 }
 0x990   :  { %v1659_v37 = vpop.f32.mrf.mxu0 }
 0x991   :  { %v4529_v39 = vadd.f32 %v1659_v37, %v1503_v2  ;;  %1667 = vadd.xlane.f32.xlu0 %v1665_v63  ;;  %v1671_v62 = vmul.f32 %v1665_v63, %v1665_v63  ;;  %v1705_v14 = vmul.f32 %v1699_v34, %v1699_v34 }
 0x992   :  { %v3418_v41 = vpop.f32.mrf.mxu0 }
 0x993   :  { %v1666_v40 = vmul.f32 %v3869_v13, %v4529_v39  ;;  %v1700_v60 = vmul.f32 %v3866_v12, %v4529_v39 }
 0x995   :  { %1701 = vadd.xlane.f32.xlu0 %v1699_v34  ;;  %1669 = vadd.xlane.f32.xlu1 %v1666_v40  ;;  %v1672_v35 = vmul.f32 %v1666_v40, %v1666_v40  ;;  %v1706_v2 = vmul.f32 %v1700_v60, %v1700_v60 }
 0x999   :  { %1673 = vadd.xlane.f32.xlu0 %v1671_v62  ;;  %1703 = vadd.xlane.f32.xlu1 %v1700_v60 }
 0x99d   :  { %1707 = vadd.xlane.f32.xlu0 %v1705_v14  ;;  %1675 = vadd.xlane.f32.xlu1 %v1672_v35 }
 0x9a1   :  { %1709 = vadd.xlane.f32.xlu1 %v1706_v2 }
 0xa1a   :  { %v1668_v29 = vpop.xlane.xlu0 %1667 }
 0xa1b   :  { %v1677_v38 = vmul.f32 0.015625, %v1668_v29 }
 0xa1d   :  { %v1681_v63 = vmul.f32 %v1677_v38, %v1677_v38 }
 0xa1e   :  { %v1702_v32 = vpop.xlane.xlu0 %1701  ;;  %v1670_v18 = vpop.xlane.xlu1 %1669 }
 0xa1f   :  { %v1711_v37 = vmul.f32 0.015625, %v1702_v32  ;;  %v1678_v41 = vmul.f32 0.015625, %v1670_v18 }
 0xa21   :  { %v1715_v0 = vmul.f32 %v1711_v37, %v1711_v37  ;;  %v1682_v62 = vmul.f32 %v1678_v41, %v1678_v41 }
 0xa22   :  { %v1674_v42 = vpop.xlane.xlu0 %1673  ;;  %v1704_v33 = vpop.xlane.xlu1 %1703 }
 0xa23   :  { %v1679_v31 = vmul.f32 0.015625, %v1674_v42  ;;  %v1712_v14 = vmul.f32 0.015625, %v1704_v33 }
 0xa25   :  { %v1683_v36 = vsub.f32 %v1679_v31, %v1681_v63  ;;  %v1716_v29 = vmul.f32 %v1712_v14, %v1712_v14  ;;  %v1722_v33 = vmul.f32 %v3866_v12, %v1712_v14 }
 0xa26   :  { %v1708_v8 = vpop.xlane.xlu0 %1707  ;;  %v1676_v34 = vpop.xlane.xlu1 %1675 }
 0xa27   :  { %v1685_v40 = vmax.f32 %v1683_v36, 0.0  ;;  %v1713_v35 = vmul.f32 0.015625, %v1708_v8  ;;  %v1680_v60 = vmul.f32 0.015625, %v1676_v34  ;;  %v1721_v8 = vmul.f32 %v3866_v12, %v1711_v37 }
 0xa29   :  { %v1691_v2 = vadd.f32 1e-05, %v1685_v40  ;;  %v1717_v7 = vsub.f32 %v1713_v35, %v1715_v0  ;;  %v1684_v6 = vsub.f32 %v1680_v60, %v1682_v62  ;;  %v1687_v0 = vmul.f32 %v3869_v13, %v1677_v38 }
 0xa2a   :  { %v1710_v5 = vpop.xlane.xlu1 %1709 }
 0xa2b   :  { %v1719_v32 = vmax.f32 %v1717_v7, 0.0  ;;  %v1686_v18 = vmax.f32 %v1684_v6, 0.0  ;;  %v1714_v4 = vmul.f32 0.015625, %v1710_v5  ;;  %3762 = vrsqrt.f32 %v1691_v2 }
 0xa2c   :  { %v1723_v7 = vadd.f32 %v1721_v8, %v1687_v0  ;;  %v1688_v5 = vmul.f32 %v3869_v13, %v1678_v41 }
 0xa2d   :  { %v1725_v1 = vadd.f32 1e-05, %v1719_v32  ;;  %v1692_v42 = vadd.f32 1e-05, %v1686_v18  ;;  %v1718_v31 = vsub.f32 %v1714_v4, %v1716_v29 }
 0xa2e   :  { %v1724_v34 = vadd.f32 %v1722_v33, %v1688_v5 }
 0xa2f   :  { %3764 = vrsqrt.f32 %v1725_v1  ;;  %v1720_v63 = vmax.f32 %v1718_v31, 0.0  ;;  %v3746_v31 = vld [vmem:[%s4781_s3] sm:$0xff]  }
 0xa30   :  { %3766 = vrsqrt.f32 %v1692_v42  ;;  %v1734_v14 = vsub.f32 %v4529_v39, %v1724_v34 }
 0xa31   :  { %v1726_v61 = vadd.f32 1e-05, %v1720_v63 }
 0xa33   :  { %3768 = vrsqrt.f32 %v1726_v61  ;;  %v1733_v61 = vsub.f32 %v4525_v43, %v1723_v7 }
 0xa38   :  { %v3763_v36 = vpop.eup %3762 }
 0xa39   :  { %v1695_v6 = vmul.f32 %v3763_v36, %v3869_v13 }
 0xa3c   :  { %v3765_v62 = vpop.eup %3764 }
 0xa3d   :  { %v1729_v4 = vmul.f32 %v3765_v62, %v3866_v12  ;;  %v3767_v1 = vpop.eup %3766  ;;  %v3747_v62 = vld [vmem:[%s4781_s3 + $0x10] sm:$0xff]  }
 0xa3e   :  { %v1696_v37 = vmul.f32 %v3767_v1, %v3869_v13 }
 0xa3f   :  { %v1731_v40 = vadd.f32 %v1729_v4, %v1695_v6 }
 0xa40   :  { %v3769_v35 = vpop.eup %3768 }
 0xa41   :  { %v1730_v38 = vmul.f32 %v3769_v35, %v3866_v12  ;;  %v1735_v60 = vmul.f32 %v1733_v61, %v1731_v40 }
 0xa43   :  { %v1732_v2 = vadd.f32 %v1730_v38, %v1696_v37  ;;  %v1737_v41 = vmax.f32 %v1735_v60, 0.0 }
 0xa45   :  { %v1736_v29 = vmul.f32 %v1734_v14, %v1732_v2  ;;  %v3748_v2 = vld [vmem:[%s4781_s3 + $0x18] sm:$0xff]  }
 0xa47   :  { %v1738_v32 = vmax.f32 %v1736_v29, 0.0 }
 0xa49   :  { %v4547_v18 = vpack.c.bf16 %v1738_v32, %v1737_v41 }
 0xa4b   :  { %3436 = vmatmul.mubr.bf16.vlgmr.msra.gmra.mxu0 %v4547_v18  ;;  %3456 = vmatmul.mubr.bf16.vlgmr.msra.gmra.mxu1 %v4547_v18 }
 0xa4c   :  { %3472 = vmatpush3.bf16.msra.mxu1 %v3996_v52  ;;  %3487 = vmatprep.mubr.msk.bf16.mxu1 %vm3791_vm0, %v4822_v30 }
 0xa4d   :  { %3473 = vmatprep.subr.bf16.mxu1 %v4822_v30  ;;  %3461 = vmatprep.mubr.msk.bf16.mxu0 %vm3791_vm0, %v4822_v30 }
 0xa50   :  { %3474 = vmatpush3.bf16.msra.mxu1 %v4006_v53 }
 0xa51   :  { %3475 = vmatprep.subr.bf16.mxu1 %v4822_v30 }
 0xa54   :  { %3476 = vmatpush3.bf16.msra.mxu1 %v4017_v54 }
 0xa55   :  { %3477 = vmatprep.subr.bf16.mxu1 %v4822_v30 }
 0xa58   :  { %3478 = vmatpush3.bf16.msra.mxu1 %v4024_v55 }
 0xa59   :  { %3479 = vmatprep.subr.bf16.mxu1 %v4822_v30 }
 0xa5c   :  { %3480 = vmatpush3.bf16.msra.mxu1 %v4031_v56 }
 0xa5d   :  { %3481 = vmatprep.subr.bf16.mxu1 %v4822_v30 }
 0xa60   :  { %3482 = vmatpush3.bf16.msra.mxu1 %v4038_v57 }
 0xa61   :  { %3483 = vmatprep.subr.bf16.mxu1 %v4822_v30 }
 0xa64   :  { %3484 = vmatpush3.bf16.msra.mxu1 %v4045_v58 }
 0xa65   :  { %3485 = vmatprep.subr.bf16.mxu1 %v4822_v30 }
 0xa68   :  { %3486 = vmatpush3.bf16.msra.mxu1 %v4052_v59  ;;  %v3745_v59 = vld [vmem:[%s4781_s3 + $0x8] sm:$0xff]  }
 0xa69   :  { %3517 = vmatprep.subr.bf16.mxu1 %v4822_v30 }
 0xa6b   :  { %3488 = vmatmul.mubr.bf16.vlgmr.msra.gmra.mxu1 %v4547_v18 }
 0xa6c   :  { %3519 = vmatprep.mubr.msk.bf16.mxu1 %vm3791_vm0, %v4822_v30 }
 0xb0b   :  { %v1774_v52 = vpop.f32.mrf.mxu0  ;;  %v1818_v53 = vpop.f32.mrf.mxu1 }
 0xb0d   :  { %v3437_v54 = vpop.f32.mrf.mxu0  ;;  %v3457_v55 = vpop.f32.mrf.mxu1 }
 0xb0f   :  { %v1777_v56 = vpop.f32.mrf.mxu0  ;;  %v1821_v57 = vpop.f32.mrf.mxu1 }
 0xb10   :  { %v1828_v43 = vpack.c.bf16 %v1821_v57, %v1818_v53  ;;  %v1783_v42 = vpack.c.bf16 %v1777_v56, %v1774_v52  ;;  %v4838_v57 = vld [vmem:[#allocation4_spill] sm:$0xff] }
 0xb11   :  { %v3438_v39 = vpop.f32.mrf.mxu0  ;;  %v3458_v58 = vpop.f32.mrf.mxu1 }
 0xb12   :  { %3460 = vmatpush3.bf16.msra.mxu0 %v1828_v43  ;;  %v4839_v43 = vld [vmem:[#allocation5_spill] sm:$0xff]  ;;  %v4840_v39 = vld [vmem:[#allocation6_spill] sm:$0xff]  ;;  %v4841_v58 = vld [vmem:[#allocation7_spill] sm:$0xff] }
 0xb13   :  { %3465 = vmatprep.subr.bf16.mxu0 %v4822_v30 }
 0xb15   :  { %3462 = vmatmul.mubr.msk.bf16.vlgmr.msra.gmra.mxu0 %vm444_vm3, %v3745_v59  ;;  %v4843_v59 = vld [vmem:[#allocation9_spill] sm:$0xff] }
 0xb16   :  { %3466 = vmatpush3.bf16.msra.mxu0 %v1783_v42  ;;  %3467 = vmatprep.mubr.msk.bf16.mxu0 %vm3791_vm0, %v4822_v30  ;;  %v4844_v42 = vld [vmem:[#allocation10_spill] sm:$0xff] }
 0xb17   :  { %3491 = vmatprep.subr.bf16.mxu0 %v4822_v30 }
 0xb1d   :  { %3468 = vmatmul.mubr.msk.bf16.vlgmr.msra.gmra.mxu0 %vm444_vm3, %v3746_v31 }
 0xb1e   :  { %3493 = vmatprep.mubr.msk.bf16.mxu0 %vm3791_vm0, %v4822_v30 }
 0xb2b   :  { %v1961_v63 = vpop.f32.mrf.mxu1 }
 0xb2d   :  { %v3489_v8 = vpop.f32.mrf.mxu1 }
 0xb2f   :  { %v1964_v36 = vpop.f32.mrf.mxu1 }
 0xb30   :  { %v1971_v0 = vpack.c.bf16 %v1964_v36, %v1961_v63 }
 0xb31   :  { %v3490_v33 = vpop.f32.mrf.mxu1 }
 0xb32   :  { %3492 = vmatpush3.bf16.msra.mxu0 %v1971_v0 }
 0xb33   :  { %3497 = vmatprep.subr.bf16.mxu0 %v4822_v30 }
 0xb35   :  { %3494 = vmatmul.mubr.msk.bf16.vlgmr.msra.gmra.mxu0 %vm444_vm3, %v3747_v62 }
 0xb36   :  { %3498 = vmatpush3.bf16.msra.mxu0 %v4066_v16  ;;  %3513 = vmatprep.mubr.msk.bf16.mxu0 %vm3791_vm0, %v4822_v30 }
 0xb37   :  { %3499 = vmatprep.subr.bf16.mxu0 %v4822_v30 }
 0xb3a   :  { %3500 = vmatpush3.bf16.msra.mxu0 %v4074_v17 }
 0xb3b   :  { %3501 = vmatprep.subr.bf16.mxu0 %v4822_v30 }
 0xb3e   :  { %3502 = vmatpush3.bf16.msra.mxu0 %v4083_v19 }
 0xb3f   :  { %3503 = vmatprep.subr.bf16.mxu0 %v4822_v30 }
 0xb42   :  { %3504 = vmatpush3.bf16.msra.mxu0 %v4090_v20 }
 0xb43   :  { %3505 = vmatprep.subr.bf16.mxu0 %v4822_v30 }
 0xb46   :  { %3506 = vmatpush3.bf16.msra.mxu0 %v4097_v21 }
 0xb47   :  { %3507 = vmatprep.subr.bf16.mxu0 %v4822_v30 }
 0xb4a   :  { %3508 = vmatpush3.bf16.msra.mxu0 %v4104_v22 }
 0xb4b   :  { %3509 = vmatprep.subr.bf16.mxu0 %v4822_v30 }
 0xb4e   :  { %3510 = vmatpush3.bf16.msra.mxu0 %v4111_v23 }
 0xb4f   :  { %3511 = vmatprep.subr.bf16.mxu0 %v4822_v30 }
 0xb52   :  { %3512 = vmatpush3.bf16.msra.mxu0 %v4118_v24 }
 0xb53   :  { %3543 = vmatprep.subr.bf16.mxu0 %v4822_v30 }
 0xb55   :  { %3514 = vmatmul.mubr.bf16.vlgmr.msra.gmra.mxu0 %v4547_v18 }
 0xb56   :  { %3545 = vmatprep.mubr.msk.bf16.mxu0 %vm3791_vm0, %v4822_v30 }
 0xbd5   :  { %v1871_v16 = vpop.f32.mrf.mxu0 }
 0xbd7   :  { %v3463_v17 = vpop.f32.mrf.mxu0 }
 0xbd9   :  { %v1874_v19 = vpop.f32.mrf.mxu0 }
 0xbdb   :  { %v3464_v20 = vpop.f32.mrf.mxu0 }
 0xbdd   :  { %v1920_v21 = vpop.f32.mrf.mxu0 }
 0xbde   :  { %v1921_v22 = vadd.f32 %v1920_v21, %v1871_v16  ;;  %v3751_v21 = vld [vmem:[%s4781_s3 + $0x30] sm:$0xff]  }
 0xbdf   :  { %v3469_v7 = vpop.f32.mrf.mxu0 }
 0xbe0   :  { %v4846_v7 = vld [vmem:[#allocation12_spill] sm:$0xff] }
 0xbe1   :  { %v1923_v5 = vpop.f32.mrf.mxu0 }
 0xbe2   :  { %v1924_v23 = vadd.f32 %v1923_v5, %v1874_v19  ;;  %v4847_v5 = vld [vmem:[#allocation13_spill] sm:$0xff] }
 0xbe3   :  { %v3470_v6 = vpop.f32.mrf.mxu0 }
 0xbe4   :  { %v4849_v6 = vld [vmem:[#allocation15_spill] sm:$0xff] }
 0xbf5   :  { %v2014_v4 = vpop.f32.mrf.mxu0 }
 0xbf6   :  { %v2021_v1 = vadd.f32 %v2014_v4, %v1921_v22  ;;  %v4845_v22 = vld [vmem:[#allocation11_spill] sm:$0xff]  ;;  %v4850_v4 = vld [vmem:[#allocation16_spill] sm:$0xff] }
 0xbf7   :  { %v3495_v24 = vpop.f32.mrf.mxu0 }
 0xbf8   :  { %v4852_v24 = vld [vmem:[#allocation18_spill] sm:$0xff] }
 0xbf9   :  { %v2017_v34 = vpop.f32.mrf.mxu0 }
 0xbfa   :  { %v2022_v40 = vadd.f32 %v2017_v34, %v1924_v23  ;;  %v4848_v23 = vld [vmem:[#allocation14_spill] sm:$0xff] }
 0xbfb   :  { %v3496_v35 = vpop.f32.mrf.mxu0 }
 0xc15   :  { %v2057_v61 = vpop.f32.mrf.mxu0 }
 0xc17   :  { %v3515_v37 = vpop.f32.mrf.mxu0 }
 0xc19   :  { %v2060_v38 = vpop.f32.mrf.mxu0 }
 0xc1a   :  { %v2067_v14 = vpack.c.bf16 %v2060_v38, %v2057_v61 }
 0xc1b   :  { %v3516_v60 = vpop.f32.mrf.mxu0 }
 0xc1c   :  { %3518 = vmatpush3.bf16.msra.mxu1 %v2067_v14 }
 0xc1d   :  { %3523 = vmatprep.subr.bf16.mxu1 %v4822_v30 }
 0xc1f   :  { %3520 = vmatmul.mubr.msk.bf16.vlgmr.msra.gmra.mxu1 %vm444_vm3, %v3748_v2 }
 0xc20   :  { %3524 = vmatpush3.bf16.msra.mxu1 %v4132_v44  ;;  %3539 = vmatprep.mubr.msk.bf16.mxu1 %vm3791_vm0, %v4822_v30 }
 0xc21   :  { %3525 = vmatprep.subr.bf16.mxu1 %v4822_v30 }
 0xc24   :  { %3526 = vmatpush3.bf16.msra.mxu1 %v4140_v45 }
 0xc25   :  { %3527 = vmatprep.subr.bf16.mxu1 %v4822_v30 }
 0xc28   :  { %3528 = vmatpush3.bf16.msra.mxu1 %v4149_v46 }
 0xc29   :  { %3529 = vmatprep.subr.bf16.mxu1 %v4822_v30 }
 0xc2c   :  { %3530 = vmatpush3.bf16.msra.mxu1 %v4156_v47 }
 0xc2d   :  { %3531 = vmatprep.subr.bf16.mxu1 %v4822_v30 }
 0xc30   :  { %3532 = vmatpush3.bf16.msra.mxu1 %v4163_v48 }
 0xc31   :  { %3533 = vmatprep.subr.bf16.mxu1 %v4822_v30 }
 0xc34   :  { %3534 = vmatpush3.bf16.msra.mxu1 %v4170_v49 }
 0xc35   :  { %3535 = vmatprep.subr.bf16.mxu1 %v4822_v30 }
 0xc38   :  { %3536 = vmatpush3.bf16.msra.mxu1 %v4177_v50 }
 0xc39   :  { %3537 = vmatprep.subr.bf16.mxu1 %v4822_v30 }
 0xc3c   :  { %3538 = vmatpush3.bf16.msra.mxu1 %v4184_v51  ;;  %v3749_v51 = vld [vmem:[%s4781_s3 + $0x20] sm:$0xff]  }
 0xc3d   :  { %3569 = vmatprep.subr.bf16.mxu1 %v4822_v30 }
 0xc3f   :  { %3540 = vmatmul.mubr.bf16.vlgmr.msra.gmra.mxu1 %v4547_v18 }
 0xc40   :  { %3571 = vmatprep.mubr.msk.bf16.mxu1 %vm3791_vm0, %v4822_v30 }
 0xcdf   :  { %v2110_v44 = vpop.f32.mrf.mxu1 }
 0xce0   :  { %v2117_v45 = vadd.f32 %v2110_v44, %v2021_v1  ;;  %v4851_v1 = vld [vmem:[#allocation17_spill] sm:$0xff] }
 0xce1   :  { %v3521_v46 = vpop.f32.mrf.mxu1 }
 0xce2   :  { %v3752_v46 = vld [vmem:[%s4781_s3 + $0x38] sm:$0xff]  }
 0xce3   :  { %v2113_v47 = vpop.f32.mrf.mxu1 }
 0xce4   :  { %v2118_v48 = vadd.f32 %v2113_v47, %v2022_v40  ;;  %v4853_v47 = vld [vmem:[#allocation19_spill] sm:$0xff] }
 0xce5   :  { %v3522_v49 = vpop.f32.mrf.mxu1 }
 0xce6   :  { %v4855_v49 = vld [vmem:[#allocation21_spill] sm:$0xff] }
 0xcff   :  { %v2153_v29 = vpop.f32.mrf.mxu1 }
 0xd01   :  { %v3541_v41 = vpop.f32.mrf.mxu1 }
 0xd02   :  { %v4857_v41 = vld [vmem:[#allocation23_spill] sm:$0xff] }
 0xd03   :  { %v2156_v50 = vpop.f32.mrf.mxu1 }
 0xd04   :  { %v2163_v32 = vpack.c.bf16 %v2156_v50, %v2153_v29  ;;  %v4856_v29 = vld [vmem:[#allocation22_spill] sm:$0xff]  ;;  %v4858_v50 = vld [vmem:[#allocation24_spill] sm:$0xff] }
 0xd05   :  { %v3542_v52 = vpop.f32.mrf.mxu1 }
 0xd06   :  { %3544 = vmatpush3.bf16.msra.mxu0 %v2163_v32  ;;  %v4859_v32 = vld [vmem:[#allocation25_spill] sm:$0xff]  ;;  %v4860_v52 = vld [vmem:[#allocation26_spill] sm:$0xff] }
 0xd07   :  { %3549 = vmatprep.subr.bf16.mxu0 %v4822_v30 }
 0xd09   :  { %3546 = vmatmul.mubr.msk.bf16.vlgmr.msra.gmra.mxu0 %vm444_vm3, %v3749_v51 }
 0xd0a   :  { %3550 = vmatpush3.bf16.msra.mxu0 %v4198_v9  ;;  %3565 = vmatprep.mubr.msk.bf16.mxu0 %vm3791_vm0, %v4822_v30 }
 0xd0b   :  { %3551 = vmatprep.subr.bf16.mxu0 %v4822_v30 }
 0xd0e   :  { %3552 = vmatpush3.bf16.msra.mxu0 %v4206_v10 }
 0xd0f   :  { %3553 = vmatprep.subr.bf16.mxu0 %v4822_v30 }
 0xd12   :  { %3554 = vmatpush3.bf16.msra.mxu0 %v4215_v11 }
 0xd13   :  { %3555 = vmatprep.subr.bf16.mxu0 %v4822_v30 }
 0xd16   :  { %3556 = vmatpush3.bf16.msra.mxu0 %v4222_v15 }
 0xd17   :  { %3557 = vmatprep.subr.bf16.mxu0 %v4822_v30 }
 0xd1a   :  { %3558 = vmatpush3.bf16.msra.mxu0 %v4229_v25 }
 0xd1b   :  { %3559 = vmatprep.subr.bf16.mxu0 %v4822_v30 }
 0xd1e   :  { %3560 = vmatpush3.bf16.msra.mxu0 %v4236_v26 }
 0xd1f   :  { %3561 = vmatprep.subr.bf16.mxu0 %v4822_v30 }
 0xd22   :  { %3562 = vmatpush3.bf16.msra.mxu0 %v4243_v27 }
 0xd23   :  { %3563 = vmatprep.subr.bf16.mxu0 %v4822_v30 }
 0xd26   :  { %3564 = vmatpush3.bf16.msra.mxu0 %v4250_v28  ;;  %v3750_v28 = vld [vmem:[%s4781_s3 + $0x28] sm:$0xff]  }
 0xd27   :  { %3595 = vmatprep.subr.bf16.mxu0 %v4822_v30 }
 0xd29   :  { %3566 = vmatmul.mubr.bf16.vlgmr.msra.gmra.mxu0 %v4547_v18 }
 0xd2a   :  { %3597 = vmatprep.mubr.msk.bf16.mxu0 %vm3791_vm0, %v4822_v30 }
 0xdc9   :  { %v2206_v9 = vpop.f32.mrf.mxu0 }
 0xdca   :  { %v2213_v10 = vadd.f32 %v2206_v9, %v2117_v45 }
 0xdcb   :  { %v3547_v11 = vpop.f32.mrf.mxu0 }
 0xdcd   :  { %v2209_v15 = vpop.f32.mrf.mxu0 }
 0xdce   :  { %v2214_v25 = vadd.f32 %v2209_v15, %v2118_v48  ;;  %v4854_v48 = vld [vmem:[#allocation20_spill] sm:$0xff] }
 0xdcf   :  { %v3548_v26 = vpop.f32.mrf.mxu0 }
 0xde9   :  { %v2249_v53 = vpop.f32.mrf.mxu0 }
 0xdeb   :  { %v3567_v54 = vpop.f32.mrf.mxu0 }
 0xded   :  { %v2252_v27 = vpop.f32.mrf.mxu0 }
 0xdee   :  { %v2259_v55 = vpack.c.bf16 %v2252_v27, %v2249_v53 }
 0xdef   :  { %v3568_v56 = vpop.f32.mrf.mxu0 }
 0xdf0   :  { %3570 = vmatpush3.bf16.msra.mxu1 %v2259_v55  ;;  %v3753_v56 = vld [vmem:[%s4781_s3 + $0x40] sm:$0xff]  }
 0xdf1   :  { %3575 = vmatprep.subr.bf16.mxu1 %v4822_v30 }
 0xdf3   :  { %3572 = vmatmul.mubr.msk.bf16.vlgmr.msra.gmra.mxu1 %vm444_vm3, %v3750_v28 }
 0xdf4   :  { %3576 = vmatpush3.bf16.msra.mxu1 %v4264_v3  ;;  %3591 = vmatprep.mubr.msk.bf16.mxu1 %vm3791_vm0, %v4822_v30  ;;  %v4842_v3 = vld [vmem:[#allocation8_spill] sm:$0xff] }
 0xdf5   :  { %3577 = vmatprep.subr.bf16.mxu1 %v4822_v30 }
 0xdf8   :  { %3578 = vmatpush3.bf16.msra.mxu1 %v4838_v57 }
 0xdf9   :  { %3579 = vmatprep.subr.bf16.mxu1 %v4822_v30 }
 0xdfc   :  { %3580 = vmatpush3.bf16.msra.mxu1 %v4839_v43 }
 0xdfd   :  { %3581 = vmatprep.subr.bf16.mxu1 %v4822_v30 }
 0xe00   :  { %3582 = vmatpush3.bf16.msra.mxu1 %v4840_v39 }
 0xe01   :  { %3583 = vmatprep.subr.bf16.mxu1 %v4822_v30 }
 0xe04   :  { %3584 = vmatpush3.bf16.msra.mxu1 %v4841_v58 }
 0xe05   :  { %3585 = vmatprep.subr.bf16.mxu1 %v4822_v30 }
 0xe08   :  { %3586 = vmatpush3.bf16.msra.mxu1 %v4842_v3 }
 0xe09   :  { %3587 = vmatprep.subr.bf16.mxu1 %v4822_v30 }
 0xe0c   :  { %3588 = vmatpush3.bf16.msra.mxu1 %v4843_v59 }
 0xe0d   :  { %3589 = vmatprep.subr.bf16.mxu1 %v4822_v30 }
 0xe10   :  { %3590 = vmatpush3.bf16.msra.mxu1 %v4844_v42 }
 0xe11   :  { %3621 = vmatprep.subr.bf16.mxu1 %v4822_v30 }
 0xe13   :  { %3592 = vmatmul.mubr.bf16.vlgmr.msra.gmra.mxu1 %v4547_v18 }
 0xe14   :  { %3623 = vmatprep.mubr.msk.bf16.mxu1 %vm3791_vm0, %v4822_v30 }
 0xeb3   :  { %v2302_v31 = vpop.f32.mrf.mxu1 }
 0xeb4   :  { %v2309_v63 = vadd.f32 %v2302_v31, %v2213_v10 }
 0xeb5   :  { %v3573_v8 = vpop.f32.mrf.mxu1 }
 0xeb7   :  { %v2305_v36 = vpop.f32.mrf.mxu1 }
 0xeb8   :  { %v2310_v0 = vadd.f32 %v2305_v36, %v2214_v25 }
 0xeb9   :  { %v3574_v33 = vpop.f32.mrf.mxu1 }
 0xed3   :  { %v2345_v62 = vpop.f32.mrf.mxu1 }
 0xed5   :  { %v3593_v16 = vpop.f32.mrf.mxu1 }
 0xed7   :  { %v2348_v17 = vpop.f32.mrf.mxu1 }
 0xed8   :  { %v2355_v19 = vpack.c.bf16 %v2348_v17, %v2345_v62 }
 0xed9   :  { %v3594_v20 = vpop.f32.mrf.mxu1 }
 0xeda   :  { %3596 = vmatpush3.bf16.msra.mxu0 %v2355_v19 }
 0xedb   :  { %3601 = vmatprep.subr.bf16.mxu0 %v4822_v30 }
 0xedd   :  { %3598 = vmatmul.mubr.msk.bf16.vlgmr.msra.gmra.mxu0 %vm444_vm3, %v3751_v21 }
 0xede   :  { %3602 = vmatpush3.bf16.msra.mxu0 %v4845_v22  ;;  %3617 = vmatprep.mubr.msk.bf16.mxu0 %vm3791_vm0, %v4822_v30 }
 0xedf   :  { %3603 = vmatprep.subr.bf16.mxu0 %v4822_v30 }
 0xee2   :  { %3604 = vmatpush3.bf16.msra.mxu0 %v4846_v7 }
 0xee3   :  { %3605 = vmatprep.subr.bf16.mxu0 %v4822_v30 }
 0xee6   :  { %3606 = vmatpush3.bf16.msra.mxu0 %v4847_v5 }
 0xee7   :  { %3607 = vmatprep.subr.bf16.mxu0 %v4822_v30 }
 0xeea   :  { %3608 = vmatpush3.bf16.msra.mxu0 %v4848_v23 }
 0xeeb   :  { %3609 = vmatprep.subr.bf16.mxu0 %v4822_v30 }
 0xeee   :  { %3610 = vmatpush3.bf16.msra.mxu0 %v4849_v6 }
 0xeef   :  { %3611 = vmatprep.subr.bf16.mxu0 %v4822_v30 }
 0xef2   :  { %3612 = vmatpush3.bf16.msra.mxu0 %v4850_v4 }
 0xef3   :  { %3613 = vmatprep.subr.bf16.mxu0 %v4822_v30 }
 0xef6   :  { %3614 = vmatpush3.bf16.msra.mxu0 %v4851_v1 }
 0xef7   :  { %3615 = vmatprep.subr.bf16.mxu0 %v4822_v30 }
 0xefa   :  { %3616 = vmatpush3.bf16.msra.mxu0 %v4852_v24 }
 0xefb   :  { %3647 = vmatprep.subr.bf16.mxu0 %v4822_v30 }
 0xefd   :  { %3618 = vmatmul.mubr.bf16.vlgmr.msra.gmra.mxu0 %v4547_v18 }
 0xefe   :  { %3649 = vmatprep.mubr.msk.bf16.mxu0 %vm3791_vm0, %v4822_v30 }
 0xf9d   :  { %v2398_v34 = vpop.f32.mrf.mxu0 }
 0xf9e   :  { %v2405_v40 = vadd.f32 %v2398_v34, %v2309_v63 }
 0xf9f   :  { %v3599_v35 = vpop.f32.mrf.mxu0 }
 0xfa1   :  { %v2401_v61 = vpop.f32.mrf.mxu0 }
 0xfa2   :  { %v2406_v37 = vadd.f32 %v2401_v61, %v2310_v0 }
 0xfa3   :  { %v3600_v38 = vpop.f32.mrf.mxu0 }
 0xfbd   :  { %v2441_v14 = vpop.f32.mrf.mxu0 }
 0xfbf   :  { %v3619_v60 = vpop.f32.mrf.mxu0 }
 0xfc1   :  { %v2444_v2 = vpop.f32.mrf.mxu0 }
 0xfc2   :  { %v2451_v44 = vpack.c.bf16 %v2444_v2, %v2441_v14 }
 0xfc3   :  { %v3620_v45 = vpop.f32.mrf.mxu0 }
 0xfc4   :  { %3622 = vmatpush3.bf16.msra.mxu1 %v2451_v44 }
 0xfc5   :  { %3627 = vmatprep.subr.bf16.mxu1 %v4822_v30 }
 0xfc7   :  { %3624 = vmatmul.mubr.msk.bf16.vlgmr.msra.gmra.mxu1 %vm444_vm3, %v3752_v46 }
 0xfc8   :  { %3628 = vmatpush3.bf16.msra.mxu1 %v4853_v47  ;;  %3643 = vmatprep.mubr.msk.bf16.mxu1 %vm3791_vm0, %v4822_v30 }
 0xfc9   :  { %3629 = vmatprep.subr.bf16.mxu1 %v4822_v30 }
 0xfcc   :  { %3630 = vmatpush3.bf16.msra.mxu1 %v4854_v48 }
 0xfcd   :  { %3631 = vmatprep.subr.bf16.mxu1 %v4822_v30 }
 0xfd0   :  { %3632 = vmatpush3.bf16.msra.mxu1 %v4855_v49 }
 0xfd1   :  { %3633 = vmatprep.subr.bf16.mxu1 %v4822_v30 }
 0xfd4   :  { %3634 = vmatpush3.bf16.msra.mxu1 %v4856_v29 }
 0xfd5   :  { %3635 = vmatprep.subr.bf16.mxu1 %v4822_v30 }
 0xfd8   :  { %3636 = vmatpush3.bf16.msra.mxu1 %v4857_v41 }
 0xfd9   :  { %3637 = vmatprep.subr.bf16.mxu1 %v4822_v30 }
 0xfdc   :  { %3638 = vmatpush3.bf16.msra.mxu1 %v4858_v50 }
 0xfdd   :  { %3639 = vmatprep.subr.bf16.mxu1 %v4822_v30 }
 0xfe0   :  { %3640 = vmatpush3.bf16.msra.mxu1 %v4859_v32 }
 0xfe1   :  { %3641 = vmatprep.subr.bf16.mxu1 %v4822_v30 }
 0xfe4   :  { %3642 = vmatpush3.bf16.msra.mxu1 %v4860_v52 }
 0xfe7   :  { %3644 = vmatmul.mubr.bf16.vlgmr.msra.gmra.mxu1 %v4547_v18 }
0x1087   :  { %v2494_v51 = vpop.f32.mrf.mxu1 }
0x1088   :  { %v2501_v9 = vadd.f32 %v2494_v51, %v2405_v40 }
0x1089   :  { %v3625_v10 = vpop.f32.mrf.mxu1 }
0x108b   :  { %v2497_v11 = vpop.f32.mrf.mxu1 }
0x108c   :  { %v2502_v15 = vadd.f32 %v2497_v11, %v2406_v37 }
0x108d   :  { %v3626_v25 = vpop.f32.mrf.mxu1 }
0x10a7   :  { %v2537_v26 = vpop.f32.mrf.mxu1 }
0x10a9   :  { %v3645_v53 = vpop.f32.mrf.mxu1 }
0x10ab   :  { %v2540_v54 = vpop.f32.mrf.mxu1 }
0x10ac   :  { %v2547_v27 = vpack.c.bf16 %v2540_v54, %v2537_v26 }
0x10ad   :  { %v3646_v55 = vpop.f32.mrf.mxu1 }
0x10ae   :  { %3648 = vmatpush3.bf16.msra.mxu0 %v2547_v27 }
0x10b1   :  { %3650 = vmatmul.mubr.msk.bf16.vlgmr.msra.gmra.mxu0 %vm444_vm3, %v3753_v56 }
0x1171   :  { %v2590_v30 = vpop.f32.mrf.mxu0 }
0x1172   :  { %v4745_v18 = vadd.f32 %v2590_v30, %v2501_v9 }
0x1173   :  { %v3651_v28 = vpop.f32.mrf.mxu0 }
0x1174   :  { %v2599_v57 = vmul.f32 %v3869_v13, %v4745_v18  ;;  %v2633_v3 = vmul.f32 %v3866_v12, %v4745_v18 }
0x1175   :  { %v2593_v43 = vpop.f32.mrf.mxu0 }
0x1176   :  { %v4749_v39 = vadd.f32 %v2593_v43, %v2502_v15  ;;  %2601 = vadd.xlane.f32.xlu0 %v2599_v57  ;;  %v2605_v42 = vmul.f32 %v2599_v57, %v2599_v57  ;;  %v2639_v63 = vmul.f32 %v2633_v3, %v2633_v3  ;;  %v4861_v57 = vld [vmem:[#allocation2_spill] sm:$0xff] }
0x1177   :  { %v3652_v58 = vpop.f32.mrf.mxu0  ;;  %v4862_v43 = vmax.f32 %v4861_v57, 0.0 }
0x1178   :  { %v2600_v59 = vmul.f32 %v3869_v13, %v4749_v39  ;;  %v2634_v31 = vmul.f32 %v3866_v12, %v4749_v39 }
0x117a   :  { %2635 = vadd.xlane.f32.xlu0 %v2633_v3  ;;  %2603 = vadd.xlane.f32.xlu1 %v2600_v59  ;;  %v2606_v8 = vmul.f32 %v2600_v59, %v2600_v59  ;;  %v2640_v36 = vmul.f32 %v2634_v31, %v2634_v31 }
0x117e   :  { %2607 = vadd.xlane.f32.xlu0 %v2605_v42  ;;  %2637 = vadd.xlane.f32.xlu1 %v2634_v31 }
0x1182   :  { %2641 = vadd.xlane.f32.xlu0 %v2639_v63  ;;  %2609 = vadd.xlane.f32.xlu1 %v2606_v8 }
0x1186   :  { %2643 = vadd.xlane.f32.xlu1 %v2640_v36 }
0x11ff   :  { %v2602_v0 = vpop.xlane.xlu0 %2601 }
0x1200   :  { %v2611_v16 = vmul.f32 0.015625, %v2602_v0 }
0x1202   :  { %v2615_v22 = vmul.f32 %v2611_v16, %v2611_v16  ;;  %v2621_v50 = vmul.f32 %v3869_v13, %v2611_v16 }
0x1203   :  { %v2636_v33 = vpop.xlane.xlu0 %2635  ;;  %v2604_v62 = vpop.xlane.xlu1 %2603 }
0x1204   :  { %v2645_v17 = vmul.f32 0.015625, %v2636_v33  ;;  %v2612_v19 = vmul.f32 0.015625, %v2604_v62 }
0x1206   :  { %v2649_v23 = vmul.f32 %v2645_v17, %v2645_v17  ;;  %v2616_v6 = vmul.f32 %v2612_v19, %v2612_v19  ;;  %v2655_v41 = vmul.f32 %v3866_v12, %v2645_v17  ;;  %v2622_v10 = vmul.f32 %v3869_v13, %v2612_v19 }
0x1207   :  { %v2608_v20 = vpop.xlane.xlu0 %2607  ;;  %v2638_v21 = vpop.xlane.xlu1 %2637 }
0x1208   :  { %v2613_v7 = vmul.f32 0.015625, %v2608_v20  ;;  %v2646_v34 = vmul.f32 0.015625, %v2638_v21  ;;  %v2657_v52 = vadd.f32 %v2655_v41, %v2621_v50 }
0x120a   :  { %v2617_v5 = vsub.f32 %v2613_v7, %v2615_v22  ;;  %v2650_v60 = vmul.f32 %v2646_v34, %v2646_v34  ;;  %v2656_v51 = vmul.f32 %v3866_v12, %v2646_v34  ;;  %v2667_v26 = vsub.f32 %v4745_v18, %v2657_v52  ;;  %v4863_v18 = vld [vmem:[#allocation3_spill] sm:$0xff] }
0x120b   :  { %v2642_v4 = vpop.xlane.xlu0 %2641  ;;  %v2610_v1 = vpop.xlane.xlu1 %2609  ;;  %v4864_v42 = vmax.f32 %v4863_v18, 0.0 }
0x120c   :  { %v2619_v24 = vmax.f32 %v2617_v5, 0.0  ;;  %v2647_v40 = vmul.f32 0.015625, %v2642_v4  ;;  %v2614_v35 = vmul.f32 0.015625, %v2610_v1  ;;  %v2658_v53 = vadd.f32 %v2656_v51, %v2622_v10 }
0x120e   :  { %v2625_v61 = vadd.f32 1e-05, %v2619_v24  ;;  %v2651_v37 = vsub.f32 %v2647_v40, %v2649_v23  ;;  %v2618_v38 = vsub.f32 %v2614_v35, %v2616_v6  ;;  %v2668_v28 = vsub.f32 %v4749_v39, %v2658_v53 }
0x120f   :  { %v2644_v14 = vpop.xlane.xlu1 %2643 }
0x1210   :  { %v2653_v2 = vmax.f32 %v2651_v37, 0.0  ;;  %v2620_v44 = vmax.f32 %v2618_v38, 0.0  ;;  %v2648_v45 = vmul.f32 0.015625, %v2644_v14  ;;  %3770 = vrsqrt.f32 %v2625_v61 }
0x1212   :  { %v2659_v46 = vadd.f32 1e-05, %v2653_v2  ;;  %v2626_v47 = vadd.f32 1e-05, %v2620_v44  ;;  %v2652_v48 = vsub.f32 %v2648_v45, %v2650_v60 }
0x1214   :  { %3772 = vrsqrt.f32 %v2659_v46  ;;  %v2654_v49 = vmax.f32 %v2652_v48, 0.0 }
0x1215   :  { %3774 = vrsqrt.f32 %v2626_v47 }
0x1216   :  { %v2660_v29 = vadd.f32 1e-05, %v2654_v49 }
0x1218   :  { %3776 = vrsqrt.f32 %v2660_v29 }
0x121d   :  { %v3771_v32 = vpop.eup %3770 }
0x121e   :  { %v2629_v11 = vmul.f32 %v3771_v32, %v3869_v13 }
0x1221   :  { %v3773_v9 = vpop.eup %3772 }
0x1222   :  { %v2663_v15 = vmul.f32 %v3773_v9, %v3866_v12  ;;  %v3775_v25 = vpop.eup %3774 }
0x1223   :  { %v2630_v56 = vmul.f32 %v3775_v25, %v3869_v13 }
0x1224   :  { %v2665_v54 = vadd.f32 %v2663_v15, %v2629_v11 }
0x1225   :  { %v3777_v27 = vpop.eup %3776 }
0x1226   :  { %v2669_v55 = vmul.f32 %v2667_v26, %v2665_v54  ;;  %v2664_v30 = vmul.f32 %v3777_v27, %v3866_v12 }
0x1228   :  { %v2671_v58 = vadd.f32 %v2669_v55, %v4862_v43  ;;  %v2666_v3 = vadd.f32 %v2664_v30, %v2630_v56 }
0x122a   :  { %2673 = vst [vmem:[%s4782_s5] sm:$0xff] %v2671_v58  ;;  %v2670_v59 = vmul.f32 %v2668_v28, %v2666_v3 }
0x122c   :  { %v2672_v31 = vadd.f32 %v2670_v59, %v4864_v42 }
0x122e   :  { %2674 = vst [vmem:[%s4782_s5 + $0x8] sm:$0xff] %v2672_v31 }

</bundles_post_ra>
